<compile_context>
chip_gen: v6e
topology: v6e:2x2x1
jax: 0.10.0
libtpu: 0.0.40
codegen_flags: <defaults>
</compile_context>

<pallas_src>
import functools

import jax
import jax.numpy as jnp
from jax.experimental import pallas as pl
from jax.experimental.pallas import tpu as pltpu


def _default_vmem_limit():
    # Generation-aware VMEM cap (~75% of physical per TensorCore: v7x 64 MiB,
    # v5e/v6e 128 MiB) instead of a fixed constant.
    try:
        cap = pltpu.get_tpu_info().vmem_capacity_bytes
    except Exception:
        cap = 64 * 1024 * 1024
    return int(cap * 3 // 4)


_VMEM_LIMIT = _default_vmem_limit()
_TILE_VMEM_BUDGET = _VMEM_LIMIT // 2      # for kernel A's double-buffered row tiles


def _round_up(x, m):
    return ((x + m - 1) // m) * m


def _pick_row_tile(n_rows, desired, bytes_per_row):
    """Large multiple-of-16 row tile that fits VMEM (double-buffered), prefers
    >= 2 grid steps (pipeline / megacore) and a divisor of n_rows (no pad copy)."""
    cap = max(16, _TILE_VMEM_BUDGET // (2 * bytes_per_row))
    tp = min(desired, cap, _round_up(n_rows, 16))
    tp = max(16, (tp // 16) * 16)
    if -(-n_rows // tp) < 2 and n_rows > 32:
        tp = max(16, ((n_rows // 2) // 16) * 16)
    # prefer an exact divisor of n_rows so the wrapper never pads / re-slices
    t = tp
    while t >= 16 and n_rows % t != 0:
        t -= 16
    if t >= 16 and n_rows % t == 0 and t >= tp // 2:
        tp = t
    return tp


# ----------------------------------------------------------------------------
# Kernel A: BN1 + ReLU + 1x1 conv, plus per-block partial BN2 batch statistics
# ----------------------------------------------------------------------------
def _bn_relu_conv1x1_kernel(x_ref, sb_ref, w_ref, y_ref, stat_ref, *,
                            n_valid, need_mask):
    # x_ref   : (tp, Cin)   bf16   flattened NHWC pixels
    # sb_ref  : (2, Cin)    f32    row 0 = BN1 scale, row 1 = BN1 bias
    # w_ref   : (Cin, Cmid) bf16   1x1 conv weight (transposed)
    # y_ref   : (tp, Cmid)  bf16   intermediate activations
    # stat_ref: (2, Cmid)   f32    this block's partial [sum; sum-of-squares]
    i = pl.program_id(0)

    x = x_ref[...].astype(jnp.float32)
    t = jnp.maximum(x * sb_ref[0:1, :] + sb_ref[1:2, :], 0.0)        # BN1 + ReLU (f32 VPU)
    y = jnp.dot(t.astype(jnp.bfloat16), w_ref[...],
                preferred_element_type=jnp.float32)                  # MXU, f32 accum
    yb = y.astype(jnp.bfloat16)
    y_ref[...] = yb

    # Stats of the *rounded* values kernel B will normalize (self-consistent BN2).
    yv = yb.astype(jnp.float32)
    if need_mask:                                                    # mask padded rows
        tp = yv.shape[0]
        row = i * tp + jax.lax.broadcasted_iota(jnp.int32, (tp, 1), 0)
        yv = jnp.where(row < n_valid, yv, 0.0)

    s = jnp.sum(yv, axis=0, keepdims=True)
    ss = jnp.sum(yv * yv, axis=0, keepdims=True)
    stat_ref[...] = jnp.concatenate([s, ss], axis=0)                 # (2, Cmid)


# ----------------------------------------------------------------------------
# Kernel B: BN2 + ReLU + 3x3 conv (padding=1), width-packed K, NCHW lane-dense out
# ----------------------------------------------------------------------------
def _bn_relu_conv3x3_kernel(y_ref, sb_ref, w_ref, o_ref, col_ref, *, H, W, Cmid, Cout):
    # y_ref  : (H, W, Cmid)      bf16   intermediate activations (one image)
    # sb_ref : (2, Cmid)         f32    BN2 scale / bias
    # w_ref  : (3, 3*Cmid, Cout) bf16   weights, [dy] rows stacked as (dx, cin)
    # o_ref  : (Cout, H*W)       f32    NCHW output slab (lane dim = H*W)
    # col_ref: (H+2, W, 3*Cmid)  bf16   VMEM im2col slab (width taps packed on lanes)
    C3 = 3 * Cmid

    a = jnp.maximum(y_ref[...].astype(jnp.float32) * sb_ref[0:1, :] + sb_ref[1:2, :],
                    0.0)                                             # BN2 + ReLU (f32)
    ab = a.astype(jnp.bfloat16)

    # Width-tap packing: slot dx holds in_padded(., w + dx) = a[., w + dx - 1].
    zc = jnp.zeros((H, 1, Cmid), jnp.bfloat16)
    left = jnp.concatenate([zc, ab[:, :W - 1, :]], axis=1)           # dx = 0 tap
    right = jnp.concatenate([ab[:, 1:, :], zc], axis=1)              # dx = 2 tap
    body = jnp.concatenate([left, ab, right], axis=-1)               # (H, W, 3*Cmid)

    # Only the two halo rows are re-zeroed each step (megacore-safe, no full-slab zero).
    col_ref[0, :, :] = jnp.zeros((W, C3), jnp.bfloat16)
    col_ref[H + 1, :, :] = jnp.zeros((W, C3), jnp.bfloat16)
    col_ref[1:H + 1, :, :] = body

    # 3 matmuls (K = 3*Cmid); height shifts are free leading-dim slices.
    # TODO(synk): for much larger H*W, chunk the M dim to bound acc vreg pressure.
    acc = jnp.zeros((H * W, Cout), jnp.float32)
    for dy in range(3):
        tap = col_ref[dy:dy + H, :, :].reshape(H * W, C3)
        acc = acc + jnp.dot(tap, w_ref[dy], preferred_element_type=jnp.float32)

    # Lane-dense store: (Cout, H*W) with H*W a multiple of 128 -> unmasked vst,
    # and the output is already NCHW (no XLA transpose pass afterwards).
    o_ref[...] = jnp.transpose(acc).astype(o_ref.dtype)


# ----------------------------------------------------------------------------
# Wrapper
# ----------------------------------------------------------------------------
def dense_layer_forward(x_nchw, g1, b1, w1, g2, b2, w2, *, eps=1e-5, row_tile=2048):
    """x_nchw: (N, Cin, H, W). w1: (Cmid, Cin, 1, 1). w2: (Cout, Cmid, 3, 3).
    Returns concat([x, out], channel) of shape (N, Cin + Cout, H, W), f32."""
    N, Cin, H, W = x_nchw.shape
    Cmid = w1.shape[0]
    Cout = w2.shape[0]
    P = N * H * W

    x32 = x_nchw.astype(jnp.float32)

    # --- BN1 batch stats: single fused pass over the (small) input in XLA -------
    s1 = jnp.sum(x32, axis=(0, 2, 3))
    ss1 = jnp.sum(x32 * x32, axis=(0, 2, 3))
    mean1 = s1 / P
    var1 = jnp.maximum(ss1 / P - mean1 * mean1, 0.0)   # clamped E[x^2]-E[x]^2
    scale1 = g1 / jnp.sqrt(var1 + eps)
    bias1 = b1 - mean1 * scale1
    sb1 = jnp.stack([scale1, bias1], axis=0).astype(jnp.float32)       # (2, Cin)

    w1k = w1.reshape(Cmid, Cin).T.astype(jnp.bfloat16)                 # (Cin, Cmid)

    # --- single NCHW -> channel-last layout copy, done in bf16 (half the HBM) ---
    x2d = jnp.transpose(x_nchw.astype(jnp.bfloat16), (0, 2, 3, 1)).reshape(P, Cin)

    bytes_per_row = Cin * 2 + Cmid * 2
    tp = _pick_row_tile(P, row_tile, bytes_per_row)
    Ppad = _round_up(P, tp)
    if Ppad != P:
        x2d = jnp.pad(x2d, ((0, Ppad - P), (0, 0)))
    G = Ppad // tp

    y_mid, stats = pl.pallas_call(
        functools.partial(_bn_relu_conv1x1_kernel, n_valid=P, need_mask=(Ppad != P)),
        out_shape=(jax.ShapeDtypeStruct((Ppad, Cmid), jnp.bfloat16),
                   jax.ShapeDtypeStruct((G, 2, Cmid), jnp.float32)),
        grid=(G,),
        in_specs=[pl.BlockSpec((tp, Cin), lambda i: (i, 0)),
                  pl.BlockSpec((2, Cin), lambda i: (0, 0)),
                  pl.BlockSpec((Cin, Cmid), lambda i: (0, 0))],
        out_specs=(pl.BlockSpec((tp, Cmid), lambda i: (i, 0)),
                   pl.BlockSpec((None, 2, Cmid), lambda i: (i, 0, 0))),
        compiler_params=pltpu.CompilerParams(
            dimension_semantics=("parallel",),          # per-block partial stats => shardable
            vmem_limit_bytes=_VMEM_LIMIT),
        cost_estimate=pl.CostEstimate(
            flops=2 * Ppad * Cin * Cmid,
            transcendentals=0,
            bytes_accessed=Ppad * Cin * 2 + Ppad * Cmid * 2
                           + G * 2 * Cmid * 4 + 2 * Cin * 4 + Cin * Cmid * 2),
    )(x2d, sb1, w1k)

    # --- fold BN2 (partial batch stats came out of kernel A) into scale/bias ----
    s2 = jnp.sum(stats[:, 0, :], axis=0)
    ss2 = jnp.sum(stats[:, 1, :], axis=0)
    mean2 = s2 / P
    var2 = jnp.maximum(ss2 / P - mean2 * mean2, 0.0)
    scale2 = g2 / jnp.sqrt(var2 + eps)
    bias2 = b2 - mean2 * scale2
    sb2 = jnp.stack([scale2, bias2], axis=0).astype(jnp.float32)       # (2, Cmid)

    y_flat = y_mid[:P] if Ppad != P else y_mid
    y_nhwc = y_flat.reshape(N, H, W, Cmid)                             # free reshape
    # Width taps stacked along input channels per dy: w2k[dy] is (3*Cmid, Cout).
    w2k = jnp.transpose(w2, (2, 3, 1, 0)).reshape(3, 3 * Cmid, Cout).astype(jnp.bfloat16)

    # TODO(synk): for N >> 2, block several images per grid step to amortize the
    # ~0.35us/step overhead; with N=2 we already have one step per v7x core.
    out_flat = pl.pallas_call(
        functools.partial(_bn_relu_conv3x3_kernel, H=H, W=W, Cmid=Cmid, Cout=Cout),
        out_shape=jax.ShapeDtypeStruct((N, Cout, H * W), jnp.float32),
        grid=(N,),
        in_specs=[pl.BlockSpec((None, H, W, Cmid), lambda n: (n, 0, 0, 0)),
                  pl.BlockSpec((2, Cmid), lambda n: (0, 0)),
                  pl.BlockSpec((3, 3 * Cmid, Cout), lambda n: (0, 0, 0))],
        out_specs=pl.BlockSpec((None, Cout, H * W), lambda n: (n, 0, 0)),
        scratch_shapes=[pltpu.VMEM((H + 2, W, 3 * Cmid), jnp.bfloat16)],
        compiler_params=pltpu.CompilerParams(
            dimension_semantics=("parallel",),
            vmem_limit_bytes=_VMEM_LIMIT),
        cost_estimate=pl.CostEstimate(
            flops=2 * N * H * W * 9 * Cmid * Cout,
            transcendentals=0,
            bytes_accessed=N * H * W * (Cmid * 2 + Cout * 4) + 9 * Cmid * Cout * 2),
    )(y_nhwc, sb2, w2k)

    out_nchw = out_flat.reshape(N, Cout, H, W)                         # free reshape (already NCHW)
    return jnp.concatenate([x32, out_nchw], axis=1)


# ----------------------------------------------------------------------------
# Pure-JAX reference following the PyTorch op order exactly (all f32)
# ----------------------------------------------------------------------------
def _reference(x, g1, b1, w1, g2, b2, w2, eps=1e-5):
    def bn(t, g, b):
        m = jnp.mean(t, axis=(0, 2, 3), keepdims=True)
        v = jnp.mean((t - m) ** 2, axis=(0, 2, 3), keepdims=True)
        return (t - m) / jnp.sqrt(v + eps) * g[None, :, None, None] + b[None, :, None, None]

    h = jnp.maximum(bn(x, g1, b1), 0.0)
    h = jax.lax.conv_general_dilated(h, w1, (1, 1), 'VALID',
                                     dimension_numbers=('NCHW', 'OIHW', 'NCHW'))
    h = jnp.maximum(bn(h, g2, b2), 0.0)
    h = jax.lax.conv_general_dilated(h, w2, (1, 1), ((1, 1), (1, 1)),
                                     dimension_numbers=('NCHW', 'OIHW', 'NCHW'))
    return jnp.concatenate([x, h], axis=1)


if __name__ == "__main__":
    key = jax.random.PRNGKey(0)
    ks = jax.random.split(key, 7)

    # DenseLayer(in_channel=4): mid_channels = 32*4 = 128, growth_rate = 32
    N, Cin, H, W = 2, 4, 16, 16
    Cmid, Cout = 32 * 4, 32

    x = jax.random.normal(ks[0], (N, Cin, H, W), dtype=jnp.float32)
    g1 = 1.0 + 0.1 * jax.random.normal(ks[1], (Cin,), dtype=jnp.float32)
    b1 = 0.1 * jax.random.normal(ks[2], (Cin,), dtype=jnp.float32)
    w1 = 0.2 * jax.random.normal(ks[3], (Cmid, Cin, 1, 1), dtype=jnp.float32)
    g2 = 1.0 + 0.1 * jax.random.normal(ks[4], (Cmid,), dtype=jnp.float32)
    b2 = 0.1 * jax.random.normal(ks[5], (Cmid,), dtype=jnp.float32)
    w2 = 0.05 * jax.random.normal(ks[6], (Cout, Cmid, 3, 3), dtype=jnp.float32)

    out = jax.jit(dense_layer_forward)(x, g1, b1, w1, g2, b2, w2)
    out = jax.block_until_ready(out)

    ref = _reference(x, g1, b1, w1, g2, b2, w2)
    assert out.shape == (N, Cin + Cout, H, W), out.shape
    rel_err = float(jnp.linalg.norm(out - ref) / jnp.linalg.norm(ref))
    assert rel_err < 2e-2, rel_err   # bf16 MXU inputs, f32 accumulation

    print("KERNEL_OK")
</pallas_src>

<mosaic_0001>
module attributes {stable_mosaic.version = 11 : i64} {
  func.func @_bn_relu_conv1x1_kernel(%arg0: i32, %arg1: memref<256x4xbf16, #tpu.memory_space<vmem>>, %arg2: memref<2x4xf32, #tpu.memory_space<vmem>>, %arg3: memref<4x128xbf16, #tpu.memory_space<vmem>>, %arg4: memref<256x128xbf16, #tpu.memory_space<vmem>>, %arg5: memref<1x2x128xf32, #tpu.memory_space<vmem>>) attributes {dimension_semantics = [#tpu.dimension_semantics<parallel>], iteration_bounds = array<i64: 2>, scalar_prefetch = 0 : i64, scratch_operands = 0 : i64, tpu.core_type = #tpu.core_type<tc>, window_params = [{transform_indices = @transform_0, window_bounds = array<i64: 256, 4>}, {pipeline_mode = #tpu.pipeline_mode<synchronous>, transform_indices = @transform_1, window_bounds = array<i64: 2, 4>}, {pipeline_mode = #tpu.pipeline_mode<synchronous>, transform_indices = @transform_2, window_bounds = array<i64: 4, 128>}, {transform_indices = @transform_3, window_bounds = array<i64: 256, 128>}, {transform_indices = @transform_4, window_bounds = array<i64: 1, 2, 128>}]} {
    %c0 = arith.constant 0 : index
    %c0_0 = arith.constant 0 : index
    %0 = vector.load %arg1[%c0, %c0_0] : memref<256x4xbf16, #tpu.memory_space<vmem>>, vector<256x4xbf16>
    %1 = arith.extf %0 : vector<256x4xbf16> to vector<256x4xf32>
    %c0_1 = arith.constant 0 : index
    %c0_2 = arith.constant 0 : index
    %2 = vector.load %arg2[%c0_1, %c0_2] : memref<2x4xf32, #tpu.memory_space<vmem>>, vector<1x4xf32>
    %3 = vector.broadcast %2 : vector<1x4xf32> to vector<256x4xf32>
    %4 = arith.mulf %1, %3 : vector<256x4xf32>
    %c1 = arith.constant 1 : index
    %c0_3 = arith.constant 0 : index
    %5 = vector.load %arg2[%c1, %c0_3] : memref<2x4xf32, #tpu.memory_space<vmem>>, vector<1x4xf32>
    %6 = vector.broadcast %5 : vector<1x4xf32> to vector<256x4xf32>
    %7 = arith.addf %4, %6 : vector<256x4xf32>
    %cst = arith.constant 0.000000e+00 : f32
    %8 = vector.broadcast %cst : f32 to vector<256x4xf32>
    %9 = arith.maximumf %7, %8 : vector<256x4xf32>
    %10 = arith.truncf %9 : vector<256x4xf32> to vector<256x4xbf16>
    %c0_4 = arith.constant 0 : index
    %c0_5 = arith.constant 0 : index
    %11 = vector.load %arg3[%c0_4, %c0_5] : memref<4x128xbf16, #tpu.memory_space<vmem>>, vector<4x128xbf16>
    %cst_6 = arith.constant dense<0.000000e+00> : vector<256x128xf32>
    %12 = tpu.matmul %10, %11, %cst_6 {dimension_numbers = #tpu.dot_dimension_numbers<[1], [0], [0], [1], [0, 0, 1, 1], [], []>} : vector<256x4xbf16>, vector<4x128xbf16>, vector<256x128xf32> -> vector<256x128xf32>
    %13 = arith.truncf %12 : vector<256x128xf32> to vector<256x128xbf16>
    %c0_7 = arith.constant 0 : index
    %c0_8 = arith.constant 0 : index
    %14 = vector.load %arg4[%c0_7, %c0_8] : memref<256x128xbf16, #tpu.memory_space<vmem>>, vector<256x128xbf16>
    tpu.vector_store %arg4[%c0_7, %c0_8], %13 {strides = array<i32>} : memref<256x128xbf16, #tpu.memory_space<vmem>>, vector<256x128xbf16>,
    %15 = arith.extf %13 : vector<256x128xbf16> to vector<256x128xf32>
    %cst_9 = arith.constant dense<0.000000e+00> : vector<128xf32>
    %16 = vector.multi_reduction <add>, %15, %cst_9 [0] : vector<256x128xf32> to vector<128xf32>
    %17 = vector.shape_cast %16 : vector<128xf32> to vector<1x128xf32>
    %18 = arith.mulf %15, %15 : vector<256x128xf32>
    %cst_10 = arith.constant dense<0.000000e+00> : vector<128xf32>
    %19 = vector.multi_reduction <add>, %18, %cst_10 [0] : vector<256x128xf32> to vector<128xf32>
    %20 = vector.shape_cast %19 : vector<128xf32> to vector<1x128xf32>
    %21 = tpu.concatenate %17, %20 in 0 : vector<1x128xf32>, vector<1x128xf32> -> vector<2x128xf32>
    %c0_11 = arith.constant 0 : index
    %c0_12 = arith.constant 0 : index
    %c0_13 = arith.constant 0 : index
    %22 = vector.load %arg5[%c0_11, %c0_12, %c0_13] : memref<1x2x128xf32, #tpu.memory_space<vmem>>, vector<1x2x128xf32>
    %23 = vector.shape_cast %22 : vector<1x2x128xf32> to vector<2x128xf32>
    %24 = vector.shape_cast %21 : vector<2x128xf32> to vector<1x2x128xf32>
    tpu.vector_store %arg5[%c0_11, %c0_12, %c0_13], %24 {strides = array<i32>} : memref<1x2x128xf32, #tpu.memory_space<vmem>>, vector<1x2x128xf32>,
    return
  }
  func.func @transform_0(%arg0: i32) -> (i32, i32) {
    %c0_i32 = arith.constant 0 : i32
    %c0_i32_0 = arith.constant 0 : i32
    return %arg0, %c0_i32 : i32, i32
  }
  func.func @transform_1(%arg0: i32) -> (i32, i32) {
    %c0_i32 = arith.constant 0 : i32
    %c0_i32_0 = arith.constant 0 : i32
    %c0_i32_1 = arith.constant 0 : i32
    return %c0_i32, %c0_i32_0 : i32, i32
  }
  func.func @transform_2(%arg0: i32) -> (i32, i32) {
    %c0_i32 = arith.constant 0 : i32
    %c0_i32_0 = arith.constant 0 : i32
    %c0_i32_1 = arith.constant 0 : i32
    return %c0_i32, %c0_i32_0 : i32, i32
  }
  func.func @transform_3(%arg0: i32) -> (i32, i32) {
    %c0_i32 = arith.constant 0 : i32
    %c0_i32_0 = arith.constant 0 : i32
    return %arg0, %c0_i32 : i32, i32
  }
  func.func @transform_4(%arg0: i32) -> (i32, i32, i32) {
    %c0_i32 = arith.constant 0 : i32
    %c0_i32_0 = arith.constant 0 : i32
    %c0_i32_1 = arith.constant 0 : i32
    return %arg0, %c0_i32, %c0_i32_0 : i32, i32, i32
  }
}

module attributes {stable_mosaic.version = 11 : i64} {
  func.func @_bn_relu_conv3x3_kernel(%arg0: i32, %arg1: memref<1x16x16x128xbf16, #tpu.memory_space<vmem>>, %arg2: memref<2x128xf32, #tpu.memory_space<vmem>>, %arg3: memref<3x384x32xbf16, #tpu.memory_space<vmem>>, %arg4: memref<1x32x256xf32, #tpu.memory_space<vmem>>, %arg5: memref<18x16x384xbf16, #tpu.memory_space<vmem>>) attributes {dimension_semantics = [#tpu.dimension_semantics<parallel>], iteration_bounds = array<i64: 2>, scalar_prefetch = 0 : i64, scratch_operands = 1 : i64, tpu.core_type = #tpu.core_type<tc>, window_params = [{transform_indices = @transform_0, window_bounds = array<i64: 1, 16, 16, 128>}, {pipeline_mode = #tpu.pipeline_mode<synchronous>, transform_indices = @transform_1, window_bounds = array<i64: 2, 128>}, {pipeline_mode = #tpu.pipeline_mode<synchronous>, transform_indices = @transform_2, window_bounds = array<i64: 3, 384, 32>}, {transform_indices = @transform_3, window_bounds = array<i64: 1, 32, 256>}]} {
    %c0 = arith.constant 0 : index
    %c0_0 = arith.constant 0 : index
    %c0_1 = arith.constant 0 : index
    %c0_2 = arith.constant 0 : index
    %0 = vector.load %arg1[%c0, %c0_0, %c0_1, %c0_2] : memref<1x16x16x128xbf16, #tpu.memory_space<vmem>>, vector<1x16x16x128xbf16>
    %1 = vector.shape_cast %0 : vector<1x16x16x128xbf16> to vector<16x16x128xbf16>
    %2 = arith.extf %1 : vector<16x16x128xbf16> to vector<16x16x128xf32>
    %c0_3 = arith.constant 0 : index
    %c0_4 = arith.constant 0 : index
    %3 = vector.load %arg2[%c0_3, %c0_4] : memref<2x128xf32, #tpu.memory_space<vmem>>, vector<1x128xf32>
    %4 = vector.shape_cast %3 : vector<1x128xf32> to vector<1x1x128xf32>
    %5 = vector.broadcast %4 : vector<1x1x128xf32> to vector<16x16x128xf32>
    %6 = arith.mulf %2, %5 : vector<16x16x128xf32>
    %c1 = arith.constant 1 : index
    %c0_5 = arith.constant 0 : index
    %7 = vector.load %arg2[%c1, %c0_5] : memref<2x128xf32, #tpu.memory_space<vmem>>, vector<1x128xf32>
    %8 = vector.shape_cast %7 : vector<1x128xf32> to vector<1x1x128xf32>
    %9 = vector.broadcast %8 : vector<1x1x128xf32> to vector<16x16x128xf32>
    %10 = arith.addf %6, %9 : vector<16x16x128xf32>
    %cst = arith.constant 0.000000e+00 : f32
    %11 = vector.broadcast %cst : f32 to vector<16x16x128xf32>
    %12 = arith.maximumf %10, %11 : vector<16x16x128xf32>
    %13 = arith.truncf %12 : vector<16x16x128xf32> to vector<16x16x128xbf16>
    %cst_6 = arith.constant 0.000000e+00 : bf16
    %14 = vector.broadcast %cst_6 : bf16 to vector<16x1x128xbf16>
    %15 = vector.extract_strided_slice %13 {offsets = [0, 0, 0], sizes = [16, 15, 128], strides = [1, 1, 1]} : vector<16x16x128xbf16> to vector<16x15x128xbf16>
    %16 = tpu.concatenate %14, %15 in 1 : vector<16x1x128xbf16>, vector<16x15x128xbf16> -> vector<16x16x128xbf16>
    %17 = vector.extract_strided_slice %13 {offsets = [0, 1, 0], sizes = [16, 15, 128], strides = [1, 1, 1]} : vector<16x16x128xbf16> to vector<16x15x128xbf16>
    %18 = tpu.concatenate %17, %14 in 1 : vector<16x15x128xbf16>, vector<16x1x128xbf16> -> vector<16x16x128xbf16>
    %19 = tpu.concatenate %16, %13, %18 in 2 : vector<16x16x128xbf16>, vector<16x16x128xbf16>, vector<16x16x128xbf16> -> vector<16x16x384xbf16>
    %cst_7 = arith.constant 0.000000e+00 : bf16
    %20 = vector.broadcast %cst_7 : bf16 to vector<16x384xbf16>
    %c0_8 = arith.constant 0 : index
    %c0_9 = arith.constant 0 : index
    %c0_10 = arith.constant 0 : index
    %21 = vector.load %arg5[%c0_8, %c0_9, %c0_10] : memref<18x16x384xbf16, #tpu.memory_space<vmem>>, vector<1x16x384xbf16>
    %22 = vector.shape_cast %21 : vector<1x16x384xbf16> to vector<16x384xbf16>
    %23 = vector.shape_cast %20 : vector<16x384xbf16> to vector<1x16x384xbf16>
    tpu.vector_store %arg5[%c0_8, %c0_9, %c0_10], %23 {strides = array<i32>} : memref<18x16x384xbf16, #tpu.memory_space<vmem>>, vector<1x16x384xbf16>,
    %cst_11 = arith.constant 0.000000e+00 : bf16
    %24 = vector.broadcast %cst_11 : bf16 to vector<16x384xbf16>
    %c17 = arith.constant 17 : index
    %c0_12 = arith.constant 0 : index
    %c0_13 = arith.constant 0 : index
    %25 = vector.load %arg5[%c17, %c0_12, %c0_13] : memref<18x16x384xbf16, #tpu.memory_space<vmem>>, vector<1x16x384xbf16>
    %26 = vector.shape_cast %25 : vector<1x16x384xbf16> to vector<16x384xbf16>
    %27 = vector.shape_cast %24 : vector<16x384xbf16> to vector<1x16x384xbf16>
    tpu.vector_store %arg5[%c17, %c0_12, %c0_13], %27 {strides = array<i32>} : memref<18x16x384xbf16, #tpu.memory_space<vmem>>, vector<1x16x384xbf16>,
    %c1_14 = arith.constant 1 : index
    %c0_15 = arith.constant 0 : index
    %c0_16 = arith.constant 0 : index
    %28 = vector.load %arg5[%c1_14, %c0_15, %c0_16] : memref<18x16x384xbf16, #tpu.memory_space<vmem>>, vector<16x16x384xbf16>
    tpu.vector_store %arg5[%c1_14, %c0_15, %c0_16], %19 {strides = array<i32>} : memref<18x16x384xbf16, #tpu.memory_space<vmem>>, vector<16x16x384xbf16>,
    %cst_17 = arith.constant 0.000000e+00 : f32
    %29 = vector.broadcast %cst_17 : f32 to vector<256x32xf32>
    %c0_18 = arith.constant 0 : index
    %c0_19 = arith.constant 0 : index
    %c0_20 = arith.constant 0 : index
    %30 = vector.load %arg5[%c0_18, %c0_19, %c0_20] : memref<18x16x384xbf16, #tpu.memory_space<vmem>>, vector<16x16x384xbf16>
    %31 = vector.shape_cast %30 : vector<16x16x384xbf16> to vector<256x384xbf16>
    %c0_21 = arith.constant 0 : index
    %c0_22 = arith.constant 0 : index
    %c0_23 = arith.constant 0 : index
    %32 = vector.load %arg3[%c0_21, %c0_22, %c0_23] : memref<3x384x32xbf16, #tpu.memory_space<vmem>>, vector<1x384x32xbf16>
    %33 = vector.shape_cast %32 : vector<1x384x32xbf16> to vector<384x32xbf16>
    %cst_24 = arith.constant dense<0.000000e+00> : vector<256x32xf32>
    %34 = tpu.matmul %31, %33, %cst_24 {dimension_numbers = #tpu.dot_dimension_numbers<[1], [0], [0], [1], [0, 0, 1, 1], [], []>} : vector<256x384xbf16>, vector<384x32xbf16>, vector<256x32xf32> -> vector<256x32xf32>
    %35 = arith.addf %29, %34 : vector<256x32xf32>
    %c1_25 = arith.constant 1 : index
    %c0_26 = arith.constant 0 : index
    %c0_27 = arith.constant 0 : index
    %36 = vector.load %arg5[%c1_25, %c0_26, %c0_27] : memref<18x16x384xbf16, #tpu.memory_space<vmem>>, vector<16x16x384xbf16>
    %37 = vector.shape_cast %36 : vector<16x16x384xbf16> to vector<256x384xbf16>
    %c1_28 = arith.constant 1 : index
    %c0_29 = arith.constant 0 : index
    %c0_30 = arith.constant 0 : index
    %38 = vector.load %arg3[%c1_28, %c0_29, %c0_30] : memref<3x384x32xbf16, #tpu.memory_space<vmem>>, vector<1x384x32xbf16>
    %39 = vector.shape_cast %38 : vector<1x384x32xbf16> to vector<384x32xbf16>
    %cst_31 = arith.constant dense<0.000000e+00> : vector<256x32xf32>
    %40 = tpu.matmul %37, %39, %cst_31 {dimension_numbers = #tpu.dot_dimension_numbers<[1], [0], [0], [1], [0, 0, 1, 1], [], []>} : vector<256x384xbf16>, vector<384x32xbf16>, vector<256x32xf32> -> vector<256x32xf32>
    %41 = arith.addf %35, %40 : vector<256x32xf32>
    %c2 = arith.constant 2 : index
    %c0_32 = arith.constant 0 : index
    %c0_33 = arith.constant 0 : index
    %42 = vector.load %arg5[%c2, %c0_32, %c0_33] : memref<18x16x384xbf16, #tpu.memory_space<vmem>>, vector<16x16x384xbf16>
    %43 = vector.shape_cast %42 : vector<16x16x384xbf16> to vector<256x384xbf16>
    %c2_34 = arith.constant 2 : index
    %c0_35 = arith.constant 0 : index
    %c0_36 = arith.constant 0 : index
    %44 = vector.load %arg3[%c2_34, %c0_35, %c0_36] : memref<3x384x32xbf16, #tpu.memory_space<vmem>>, vector<1x384x32xbf16>
    %45 = vector.shape_cast %44 : vector<1x384x32xbf16> to vector<384x32xbf16>
    %cst_37 = arith.constant dense<0.000000e+00> : vector<256x32xf32>
    %46 = tpu.matmul %43, %45, %cst_37 {dimension_numbers = #tpu.dot_dimension_numbers<[1], [0], [0], [1], [0, 0, 1, 1], [], []>} : vector<256x384xbf16>, vector<384x32xbf16>, vector<256x32xf32> -> vector<256x32xf32>
    %47 = arith.addf %41, %46 : vector<256x32xf32>
    %48 = tpu.transpose %47, [1, 0] : vector<256x32xf32> -> vector<32x256xf32>
    %c0_38 = arith.constant 0 : index
    %c0_39 = arith.constant 0 : index
    %c0_40 = arith.constant 0 : index
    %49 = vector.load %arg4[%c0_38, %c0_39, %c0_40] : memref<1x32x256xf32, #tpu.memory_space<vmem>>, vector<1x32x256xf32>
    %50 = vector.shape_cast %49 : vector<1x32x256xf32> to vector<32x256xf32>
    %51 = vector.shape_cast %48 : vector<32x256xf32> to vector<1x32x256xf32>
    tpu.vector_store %arg4[%c0_38, %c0_39, %c0_40], %51 {strides = array<i32>} : memref<1x32x256xf32, #tpu.memory_space<vmem>>, vector<1x32x256xf32>,
    return
  }
  func.func @transform_0(%arg0: i32) -> (i32, i32, i32, i32) {
    %c0_i32 = arith.constant 0 : i32
    %c0_i32_0 = arith.constant 0 : i32
    %c0_i32_1 = arith.constant 0 : i32
    %c0_i32_2 = arith.constant 0 : i32
    return %arg0, %c0_i32, %c0_i32_0, %c0_i32_1 : i32, i32, i32, i32
  }
  func.func @transform_1(%arg0: i32) -> (i32, i32) {
    %c0_i32 = arith.constant 0 : i32
    %c0_i32_0 = arith.constant 0 : i32
    %c0_i32_1 = arith.constant 0 : i32
    return %c0_i32, %c0_i32_0 : i32, i32
  }
  func.func @transform_2(%arg0: i32) -> (i32, i32, i32) {
    %c0_i32 = arith.constant 0 : i32
    %c0_i32_0 = arith.constant 0 : i32
    %c0_i32_1 = arith.constant 0 : i32
    %c0_i32_2 = arith.constant 0 : i32
    return %c0_i32, %c0_i32_0, %c0_i32_1 : i32, i32, i32
  }
  func.func @transform_3(%arg0: i32) -> (i32, i32, i32) {
    %c0_i32 = arith.constant 0 : i32
    %c0_i32_0 = arith.constant 0 : i32
    %c0_i32_1 = arith.constant 0 : i32
    return %arg0, %c0_i32, %c0_i32_0 : i32, i32, i32
  }
}

</mosaic_0001>

<bundles_post_ra>
// kernel: dense_layer_forward.2
= control target key start
LH: loop header
LB: loop body
LE: loop exit
PB: predicated region body
PF: predicated region fallthrough
CT: control target
= control target key end

     0   :  { %s1366_s15 = smov 0   ;;  %s1545_s0 = inlined_call_operand.vmem [shape: bf16[512,4], index: 0, kind: input, shape index: {}]   ;;  %s1546_s1 = inlined_call_operand.vmem [shape: f32[2,4], index: 1, kind: input, shape index: {}]   ;;  %s1547_s2 = inlined_call_operand.vmem [shape: bf16[4,128], index: 2, kind: input, shape index: {}]   ;;  %s1548_s3 = inlined_call_operand.vmem [shape: bf16[512,128], index: 3, kind: output, shape index: {0}]   ;;  %s1549_s4 = inlined_call_operand.vmem [shape: f32[2,2,128], index: 4, kind: output, shape index: {1}]  }
   0x1 LB: > { %s1372_s16 = sadd.s32 4294967295, %s1339_s15   ;;  %p1006_p0 = scmp.ge.s32.totalorder %s1339_s15, 1  ;;  %s1339_s15 = sphi %s1366_s15, %s15_s15  }
   0x2   : > { %p166_p1 = scmp.lt.s32.totalorder %s1339_s15, 3 }
   0x4   : > { %p167_p2 = pnand %p1006_p0, %p166_p1 }
   0x5   : > { %s1007_s19 = sshll.u32 (!%p167_p2), %s1372_s16, 5  ;;  %p208_p4 = scmp.lt.s32.totalorder (!%p167_p2), %s1372_s16, 1 }
   0x6   : > { %170 = sbr.rel (%p167_p2) target bundleno = 309 (0x135), region = 32  ;;  %p197_p3 = scmp.lt.s32.totalorder (!%p167_p2), %s1007_s19, 63 }
   0xb   : > { %v399_v0 = vld [vmem:[%s1547_s2] sm:$0x3]  ;;  %vm449_vm0 = vcmask 1041408   ;;  %s1551_s19 = smov (!%p197_p3, %s1007_s19), 63  ;;  %vm400_vm1 = vcmask 31744   ;;  %s1553_s16 = smov (!%p208_p4, %s1372_s16), 1 }
   0xc   : > { %1323 = vmatprep.subr.msk.bf16.mxu0 %vm449_vm0, %v399_v0  ;;  %v451_v1 = vsel %vm449_vm0, %v399_v0, 0  ;;  %1324 = vmatprep.subr.msk.bf16.mxu1 %vm449_vm0, %v399_v0  ;;  %s1008_s20 = sshll.u32 %s1551_s19, 2  ;;  %v1393_v2 = vld [vmem:[%s1546_s1] ss:$0 sm:$0xff]  ;;  %v1402_v11 = vld [vmem:[%s1546_s1 + $0x1] ss:$0 sm:$0xff] }
   0xd   : > { %1288 = vmatpush3.bf16.msra.mxu0 %v451_v1  ;;  %1322 = vmatpush3.bf16.msra.mxu1 %v451_v1  ;;  %s1388_s23 = scalar_lea.vmem %s1545_s0, %s1008_s20  ;;  %s1509_s30 = scalar_lea.vmem %s1548_s3, %s1008_s20  ;;  %vm912_vm2 = vcmask 1040384  }
   0xe   : > { %v1097_v3 = vld [vmem:[%s1388_s23] sm:$0xff]   ;;  %v1240_v4 = vld [vmem:[%s1388_s23 + $0x8] sm:$0xff]   ;;  %v1241_v5 = vld [vmem:[%s1388_s23 + $0x10] sm:$0xff]   ;;  %s1011_s5 = sshll.u32 %s1553_s16, 1 }
   0xf   : > { %v1098_v6 = vunpack.c.l.bf16 %v1097_v3  ;;  %v1099_v7 = vunpack.c.h.bf16 %v1097_v3  ;;  %v1102_v8 = vunpack.c.l.bf16 %v1240_v4  ;;  %v1103_v9 = vunpack.c.h.bf16 %v1240_v4  ;;  %v1242_v10 = vld [vmem:[%s1388_s23 + $0x18] sm:$0xff]   ;;  %v1243_v32 = vld [vmem:[%s1388_s23 + $0x20] sm:$0xff]   ;;  %v1244_v37 = vld [vmem:[%s1388_s23 + $0x28] sm:$0xff]   ;;  %s211_s8 = scalar_lea.vmem %s1549_s4, %s1011_s5 }
  0x10   : > { %v1106_v12 = vunpack.c.l.bf16 %v1241_v5  ;;  %v1107_v13 = vunpack.c.h.bf16 %v1241_v5  ;;  %v1110_v14 = vunpack.c.l.bf16 %v1242_v10  ;;  %v1111_v15 = vunpack.c.h.bf16 %v1242_v10  ;;  %v1245_v42 = vld [vmem:[%s1388_s23 + $0x30] sm:$0xff]   ;;  %v1246_v47 = vld [vmem:[%s1388_s23 + $0x38] sm:$0xff]   ;;  %v1247_v5 = vld [vmem:[%s1388_s23 + $0x40] sm:$0xff]  }
  0x11   : > { %v282_v16 = vmul.f32 %v1098_v6, %v1393_v2  ;;  %v283_v17 = vmul.f32 %v1099_v7, %v1393_v2  ;;  %v284_v18 = vmul.f32 %v1102_v8, %v1393_v2  ;;  %v285_v19 = vmul.f32 %v1103_v9, %v1393_v2 }
  0x12   : > { %v286_v20 = vmul.f32 %v1106_v12, %v1393_v2  ;;  %v287_v21 = vmul.f32 %v1107_v13, %v1393_v2  ;;  %v288_v22 = vmul.f32 %v1110_v14, %v1393_v2  ;;  %v289_v23 = vmul.f32 %v1111_v15, %v1393_v2  ;;  %v1248_v15 = vld [vmem:[%s1388_s23 + $0x48] sm:$0xff]  }
  0x13   : > { %v319_v24 = vadd.f32 %v1402_v11, %v282_v16  ;;  %v320_v25 = vadd.f32 %v1402_v11, %v283_v17  ;;  %v321_v26 = vadd.f32 %v1402_v11, %v284_v18  ;;  %v322_v27 = vadd.f32 %v1402_v11, %v285_v19 }
  0x14   : > { %v323_v28 = vadd.f32 %v1402_v11, %v286_v20  ;;  %v324_v29 = vadd.f32 %v1402_v11, %v287_v21  ;;  %v325_v30 = vadd.f32 %v1402_v11, %v288_v22  ;;  %v326_v31 = vadd.f32 %v1402_v11, %v289_v23  ;;  %v1249_v20 = vld [vmem:[%s1388_s23 + $0x50] sm:$0xff]  }
  0x15   : > { %v351_v33 = vmax.f32 %v319_v24, 0.0  ;;  %v352_v34 = vmax.f32 %v320_v25, 0.0  ;;  %v353_v35 = vmax.f32 %v321_v26, 0.0  ;;  %v354_v36 = vmax.f32 %v322_v27, 0.0  ;;  %v1250_v24 = vld [vmem:[%s1388_s23 + $0x58] sm:$0xff]  }
  0x16   : > { %v355_v38 = vmax.f32 %v323_v28, 0.0  ;;  %v356_v39 = vmax.f32 %v324_v29, 0.0  ;;  %v357_v40 = vmax.f32 %v325_v30, 0.0  ;;  %v358_v41 = vmax.f32 %v326_v31, 0.0 }
  0x17   : > { %v383_v43 = vpack.c.bf16 %v352_v34, %v351_v33  ;;  %v384_v44 = vpack.c.bf16 %v354_v36, %v353_v35  ;;  %v1114_v45 = vunpack.c.l.bf16 %v1243_v32  ;;  %v1115_v46 = vunpack.c.h.bf16 %v1243_v32 }
  0x18   : > { %v385_v48 = vpack.c.bf16 %v356_v39, %v355_v38  ;;  %v386_v49 = vpack.c.bf16 %v358_v41, %v357_v40  ;;  %v1118_v50 = vunpack.c.l.bf16 %v1244_v37  ;;  %v1119_v51 = vunpack.c.h.bf16 %v1244_v37  ;;  %v1251_v41 = vld [vmem:[%s1388_s23 + $0x60] sm:$0xff]  }
  0x19   : > { %1289 = vmatprep.mubr.msk.bf16.mxu0 %vm400_vm1, %v383_v43  ;;  %v290_v52 = vmul.f32 %v1114_v45, %v1393_v2  ;;  %v291_v53 = vmul.f32 %v1115_v46, %v1393_v2  ;;  %v1122_v54 = vunpack.c.l.bf16 %v1245_v42  ;;  %v1123_v55 = vunpack.c.h.bf16 %v1245_v42 }
  0x1a   : > { %1290 = vmatmul.mubr.msk.bf16.vlgmr.msra.gmra.mxu0 %vm400_vm1, %v384_v44  ;;  %v292_v56 = vmul.f32 %v1118_v50, %v1393_v2  ;;  %v293_v57 = vmul.f32 %v1119_v51, %v1393_v2  ;;  %v1126_v58 = vunpack.c.l.bf16 %v1246_v47  ;;  %v1127_v59 = vunpack.c.h.bf16 %v1246_v47 }
  0x1b   : > { %1293 = vmatprep.mubr.msk.bf16.mxu0 %vm400_vm1, %v385_v48  ;;  %v327_v60 = vadd.f32 %v1402_v11, %v290_v52  ;;  %v328_v61 = vadd.f32 %v1402_v11, %v291_v53  ;;  %v294_v62 = vmul.f32 %v1122_v54, %v1393_v2  ;;  %v295_v63 = vmul.f32 %v1123_v55, %v1393_v2  ;;  %v1252_v54 = vld [vmem:[%s1388_s23 + $0x68] sm:$0xff]  }
  0x1c   : > { %v329_v0 = vadd.f32 %v1402_v11, %v292_v56  ;;  %v330_v1 = vadd.f32 %v1402_v11, %v293_v57  ;;  %v296_v3 = vmul.f32 %v1126_v58, %v1393_v2  ;;  %v297_v4 = vmul.f32 %v1127_v59, %v1393_v2  ;;  %v1253_v59 = vld [vmem:[%s1388_s23 + $0x70] sm:$0xff]  }
  0x1d   : > { %v359_v6 = vmax.f32 %v327_v60, 0.0  ;;  %v360_v7 = vmax.f32 %v328_v61, 0.0  ;;  %v331_v8 = vadd.f32 %v1402_v11, %v294_v62  ;;  %v332_v9 = vadd.f32 %v1402_v11, %v295_v63 }
  0x1e   : > { %v361_v10 = vmax.f32 %v329_v0, 0.0  ;;  %v362_v12 = vmax.f32 %v330_v1, 0.0  ;;  %v1443_v13 = vadd.f32 %v1402_v11, %v296_v3  ;;  %v1446_v14 = vadd.f32 %v1402_v11, %v297_v4 }
  0x1f   : > { %v387_v16 = vpack.c.bf16 %v360_v7, %v359_v6  ;;  %v363_v17 = vmax.f32 %v331_v8, 0.0  ;;  %v364_v18 = vmax.f32 %v332_v9, 0.0  ;;  %v1130_v19 = vunpack.c.l.bf16 %v1247_v5  ;;  %v1254_v9 = vld [vmem:[%s1388_s23 + $0x78] sm:$0xff]  }
  0x20   : > { %v388_v21 = vpack.c.bf16 %v362_v12, %v361_v10  ;;  %v365_v22 = vmax.f32 %v1443_v13, 0.0  ;;  %v1131_v23 = vunpack.c.h.bf16 %v1247_v5  ;;  %v366_v25 = vmax.f32 %v1446_v14, 0.0 }
  0x21   : > { %v298_v26 = vmul.f32 %v1130_v19, %v1393_v2  ;;  %v1134_v27 = vunpack.c.l.bf16 %v1248_v15  ;;  %v1135_v28 = vunpack.c.h.bf16 %v1248_v15  ;;  %v389_v29 = vpack.c.bf16 %v364_v18, %v363_v17 }
  0x22   : > { %1294 = vmatmul.mubr.msk.bf16.gmra.mxu0 %vm400_vm1, %v386_v49  ;;  %v299_v30 = vmul.f32 %v1131_v23, %v1393_v2  ;;  %v1138_v31 = vunpack.c.l.bf16 %v1249_v20  ;;  %v1139_v32 = vunpack.c.h.bf16 %v1249_v20  ;;  %v1142_v36 = vunpack.c.l.bf16 %v1250_v24 }
  0x23   : > { %1297 = vmatprep.mubr.msk.bf16.mxu0 %vm400_vm1, %v387_v16  ;;  %v335_v33 = vadd.f32 %v1402_v11, %v298_v26  ;;  %v300_v34 = vmul.f32 %v1134_v27, %v1393_v2  ;;  %v301_v35 = vmul.f32 %v1135_v28, %v1393_v2  ;;  %v1143_v40 = vunpack.c.h.bf16 %v1250_v24 }
  0x24   : > { %v336_v37 = vadd.f32 %v1402_v11, %v299_v30  ;;  %v302_v38 = vmul.f32 %v1138_v31, %v1393_v2  ;;  %v303_v39 = vmul.f32 %v1139_v32, %v1393_v2  ;;  %v304_v45 = vmul.f32 %v1142_v36, %v1393_v2 }
  0x25   : > { %v367_v42 = vmax.f32 %v335_v33, 0.0  ;;  %v337_v43 = vadd.f32 %v1402_v11, %v300_v34  ;;  %v338_v44 = vadd.f32 %v1402_v11, %v301_v35  ;;  %v305_v49 = vmul.f32 %v1143_v40, %v1393_v2 }
  0x26   : > { %v368_v46 = vmax.f32 %v336_v37, 0.0  ;;  %v339_v47 = vadd.f32 %v1402_v11, %v302_v38  ;;  %v340_v48 = vadd.f32 %v1402_v11, %v303_v39  ;;  %v341_v52 = vadd.f32 %v1402_v11, %v304_v45 }
  0x27   : > { %v369_v50 = vmax.f32 %v337_v43, 0.0  ;;  %v370_v51 = vmax.f32 %v338_v44, 0.0  ;;  %v1146_v53 = vunpack.c.l.bf16 %v1251_v41  ;;  %v342_v58 = vadd.f32 %v1402_v11, %v305_v49 }
  0x28   : > { %v391_v55 = vpack.c.bf16 %v368_v46, %v367_v42  ;;  %v371_v56 = vmax.f32 %v339_v47, 0.0  ;;  %v372_v57 = vmax.f32 %v340_v48, 0.0  ;;  %v373_v61 = vmax.f32 %v341_v52, 0.0 }
  0x29   : > { %v392_v60 = vpack.c.bf16 %v370_v51, %v369_v50  ;;  %v1147_v62 = vunpack.c.h.bf16 %v1251_v41  ;;  %v306_v63 = vmul.f32 %v1146_v53, %v1393_v2  ;;  %v374_v1 = vmax.f32 %v342_v58, 0.0 }
  0x2a   : > { %1298 = vmatmul.mubr.msk.bf16.gmra.mxu0 %vm400_vm1, %v388_v21  ;;  %1305 = vmatprep.mubr.msk.bf16.mxu1 %vm400_vm1, %v391_v55  ;;  %v393_v0 = vpack.c.bf16 %v372_v57, %v371_v56  ;;  %v1150_v3 = vunpack.c.l.bf16 %v1252_v54  ;;  %v1151_v4 = vunpack.c.h.bf16 %v1252_v54  ;;  %v1154_v7 = vunpack.c.l.bf16 %v1253_v59 }
  0x2b   : > { %1301 = vmatprep.mubr.msk.bf16.mxu0 %vm400_vm1, %v389_v29  ;;  %1306 = vmatmul.mubr.msk.bf16.vlgmr.msra.gmra.mxu1 %vm400_vm1, %v392_v60  ;;  %v307_v5 = vmul.f32 %v1147_v62, %v1393_v2  ;;  %v343_v6 = vadd.f32 %v1402_v11, %v306_v63  ;;  %v1155_v8 = vunpack.c.h.bf16 %v1253_v59  ;;  %v390_v18 = vpack.c.bf16 %v366_v25, %v365_v22 }
  0x2c   : > { %1309 = vmatprep.mubr.msk.bf16.mxu1 %vm400_vm1, %v393_v0  ;;  %v308_v10 = vmul.f32 %v1150_v3, %v1393_v2  ;;  %v309_v12 = vmul.f32 %v1151_v4, %v1393_v2  ;;  %v310_v16 = vmul.f32 %v1154_v7, %v1393_v2  ;;  %v394_v19 = vpack.c.bf16 %v374_v1, %v373_v61 }
  0x2d   : > { %v344_v14 = vadd.f32 %v1402_v11, %v307_v5  ;;  %v375_v15 = vmax.f32 %v343_v6, 0.0  ;;  %v311_v17 = vmul.f32 %v1155_v8, %v1393_v2  ;;  %v1158_v20 = vunpack.c.l.bf16 %v1254_v9 }
  0x2e   : > { %v345_v23 = vadd.f32 %v1402_v11, %v308_v10  ;;  %v346_v24 = vadd.f32 %v1402_v11, %v309_v12  ;;  %v1159_v26 = vunpack.c.h.bf16 %v1254_v9  ;;  %v347_v27 = vadd.f32 %v1402_v11, %v310_v16 }
  0x2f   : > { %v376_v21 = vmax.f32 %v344_v14, 0.0  ;;  %v348_v28 = vadd.f32 %v1402_v11, %v311_v17  ;;  %v312_v22 = vmul.f32 %v1158_v20, %v1393_v2 }
  0x30   : > { %v377_v30 = vmax.f32 %v345_v23, 0.0  ;;  %v378_v13 = vmax.f32 %v346_v24, 0.0  ;;  %v313_v25 = vmul.f32 %v1159_v26, %v1393_v2  ;;  %v379_v31 = vmax.f32 %v347_v27, 0.0 }
  0x31   : > { %v395_v29 = vpack.c.bf16 %v376_v21, %v375_v15  ;;  %v380_v32 = vmax.f32 %v348_v28, 0.0  ;;  %v349_v34 = vadd.f32 %v1402_v11, %v312_v22 }
  0x32   : > { %1302 = vmatmul.mubr.msk.bf16.gmra.mxu0 %vm400_vm1, %v390_v18  ;;  %v396_v33 = vpack.c.bf16 %v378_v13, %v377_v30  ;;  %v350_v35 = vadd.f32 %v1402_v11, %v313_v25 }
  0x33   : > { %1310 = vmatmul.mubr.msk.bf16.gmra.mxu1 %vm400_vm1, %v394_v19  ;;  %v397_v36 = vpack.c.bf16 %v380_v32, %v379_v31  ;;  %v381_v37 = vmax.f32 %v349_v34, 0.0 }
  0x34   : > { %1313 = vmatprep.mubr.msk.bf16.mxu1 %vm400_vm1, %v395_v29  ;;  %v382_v38 = vmax.f32 %v350_v35, 0.0 }
  0x36   : > { %v398_v39 = vpack.c.bf16 %v382_v38, %v381_v37 }
  0x3b   : > { %1314 = vmatmul.mubr.msk.bf16.gmra.mxu1 %vm400_vm1, %v396_v33 }
  0x3c   : > { %1317 = vmatprep.mubr.msk.bf16.mxu1 %vm400_vm1, %v397_v36 }
  0x43   : > { %1318 = vmatmul.mubr.msk.bf16.gmra.mxu1 %vm400_vm1, %v398_v39 }
  0xda   : > { %v1291_v2 = vpop.f32.mrf.mxu0 }
  0xdc   : > { %v487_v40 = vpop.f32.mrf.mxu0 }
  0xde   : > { %v1292_v11 = vpop.f32.mrf.mxu0 }
  0xdf   : > { %v615_v41 = vpack.c.bf16 %v1292_v11, %v1291_v2 }
  0xe0   : > { %v490_v42 = vpop.f32.mrf.mxu0 }
  0xe1   : > { %1255 = vst [vmem:[%s1509_s30 + $0x8] sm:$0xff] %v615_v41   ;;  %v614_v43 = vpack.c.bf16 %v490_v42, %v487_v40  ;;  %v776_v45 = vunpack.c.l.bf16 %v615_v41  ;;  %v777_v52 = vunpack.c.h.bf16 %v615_v41 }
  0xe2   : > { %v1295_v44 = vpop.f32.mrf.mxu0 }
  0xe3   : > { %1164 = vst [vmem:[%s1509_s30] sm:$0xff] %v614_v43   ;;  %v774_v46 = vunpack.c.l.bf16 %v614_v43  ;;  %v775_v47 = vunpack.c.h.bf16 %v614_v43  ;;  %v845_v54 = vmul.f32 %v776_v45, %v776_v45  ;;  %v846_v62 = vmul.f32 %v777_v52, %v777_v52 }
  0xe4   : > { %v503_v48 = vpop.f32.mrf.mxu0 }
  0xe5   : > { %v806_v49 = vadd.f32 %v775_v47, %v774_v46  ;;  %v843_v50 = vmul.f32 %v774_v46, %v774_v46  ;;  %v844_v51 = vmul.f32 %v775_v47, %v775_v47 }
  0xe6   : > { %v1296_v53 = vpop.f32.mrf.mxu0 }
  0xe7   : > { %v807_v55 = vadd.f32 %v806_v49, %v776_v45  ;;  %v875_v56 = vadd.f32 %v844_v51, %v843_v50  ;;  %v617_v57 = vpack.c.bf16 %v1296_v53, %v1295_v44 }
  0xe8   : > { %v506_v58 = vpop.f32.mrf.mxu0 }
  0xe9   : > { %v876_v59 = vadd.f32 %v875_v56, %v845_v54  ;;  %1257 = vst [vmem:[%s1509_s30 + $0x18] sm:$0xff] %v617_v57   ;;  %v616_v60 = vpack.c.bf16 %v506_v58, %v503_v48  ;;  %v808_v1 = vadd.f32 %v807_v55, %v777_v52  ;;  %v780_v5 = vunpack.c.l.bf16 %v617_v57 }
  0xea   : > { %v1299_v61 = vpop.f32.mrf.mxu0  ;;  %v781_v10 = vunpack.c.h.bf16 %v617_v57 }
  0xeb   : > { %1256 = vst [vmem:[%s1509_s30 + $0x10] sm:$0xff] %v616_v60   ;;  %v778_v63 = vunpack.c.l.bf16 %v616_v60  ;;  %v779_v0 = vunpack.c.h.bf16 %v616_v60  ;;  %v1307_v3 = vpop.f32.mrf.mxu1  ;;  %v877_v8 = vadd.f32 %v876_v59, %v846_v62  ;;  %v849_v21 = vmul.f32 %v780_v5, %v780_v5 }
  0xec   : > { %v519_v4 = vpop.f32.mrf.mxu0  ;;  %v850_v30 = vmul.f32 %v781_v10, %v781_v10 }
  0xed   : > { %v809_v6 = vadd.f32 %v808_v1, %v778_v63  ;;  %v847_v7 = vmul.f32 %v778_v63, %v778_v63  ;;  %v551_v9 = vpop.f32.mrf.mxu1  ;;  %v848_v15 = vmul.f32 %v779_v0, %v779_v0 }
  0xee   : > { %v1300_v12 = vpop.f32.mrf.mxu0 }
  0xef   : > { %v810_v14 = vadd.f32 %v809_v6, %v779_v0  ;;  %v878_v16 = vadd.f32 %v877_v8, %v847_v7  ;;  %v619_v17 = vpack.c.bf16 %v1300_v12, %v1299_v61  ;;  %v1308_v18 = vpop.f32.mrf.mxu1 }
  0xf0   : > { %v522_v19 = vpop.f32.mrf.mxu0  ;;  %v1515_v20 = vpack.c.bf16 %v1308_v18, %v1307_v3 }
  0xf1   : > { %v811_v23 = vadd.f32 %v810_v14, %v780_v5  ;;  %v879_v24 = vadd.f32 %v878_v16, %v848_v15  ;;  %1259 = vst [vmem:[%s1509_s30 + $0x28] sm:$0xff] %v619_v17   ;;  %v554_v26 = vpop.f32.mrf.mxu1  ;;  %v618_v27 = vpack.c.bf16 %v522_v19, %v519_v4  ;;  %v784_v36 = vunpack.c.l.bf16 %v619_v17 }
  0xf2   : > { %v1303_v28 = vpop.f32.mrf.mxu0  ;;  %1263 = vst [vmem:[%s1509_s30 + $0x48] sm:$0xff] %v1515_v20   ;;  %v622_v29 = vpack.c.bf16 %v554_v26, %v551_v9  ;;  %v785_v2 = vunpack.c.h.bf16 %v619_v17 }
  0xf3   : > { %v880_v13 = vadd.f32 %v879_v24, %v849_v21  ;;  %v812_v22 = vadd.f32 %v811_v23, %v781_v10  ;;  %v1311_v25 = vpop.f32.mrf.mxu1  ;;  %1258 = vst [vmem:[%s1509_s30 + $0x20] sm:$0xff] %v618_v27   ;;  %v782_v31 = vunpack.c.l.bf16 %v618_v27  ;;  %v783_v32 = vunpack.c.h.bf16 %v618_v27 }
  0xf4   : > { %v535_v33 = vpop.f32.mrf.mxu0  ;;  %1262 = vst [vmem:[%s1509_s30 + $0x40] sm:$0xff] %v622_v29   ;;  %v853_v48 = vmul.f32 %v784_v36, %v784_v36  ;;  %v854_v53 = vmul.f32 %v785_v2, %v785_v2  ;;  %v790_v10 = vunpack.c.l.bf16 %v622_v29  ;;  %v791_v17 = vunpack.c.h.bf16 %v622_v29 }
  0xf5   : > { %v881_v34 = vadd.f32 %v880_v13, %v850_v30  ;;  %v567_v35 = vpop.f32.mrf.mxu1  ;;  %v813_v37 = vadd.f32 %v812_v22, %v782_v31  ;;  %v851_v38 = vmul.f32 %v782_v31, %v782_v31  ;;  %v852_v42 = vmul.f32 %v783_v32, %v783_v32 }
  0xf6   : > { %v1304_v39 = vpop.f32.mrf.mxu0  ;;  %v792_v21 = vunpack.c.l.bf16 %v1515_v20  ;;  %v859_v24 = vmul.f32 %v790_v10, %v790_v10  ;;  %v793_v27 = vunpack.c.h.bf16 %v1515_v20  ;;  %v860_v13 = vmul.f32 %v791_v17, %v791_v17 }
  0xf7   : > { %v621_v40 = vpack.c.bf16 %v1304_v39, %v1303_v28  ;;  %v1312_v11 = vpop.f32.mrf.mxu1  ;;  %v814_v41 = vadd.f32 %v813_v37, %v783_v32  ;;  %v882_v43 = vadd.f32 %v881_v34, %v851_v38 }
  0xf8   : > { %v538_v44 = vpop.f32.mrf.mxu0  ;;  %v1522_v45 = vpack.c.bf16 %v1312_v11, %v1311_v25  ;;  %v861_v32 = vmul.f32 %v792_v21, %v792_v21 }
  0xf9   : > { %1261 = vst [vmem:[%s1509_s30 + $0x38] sm:$0xff] %v621_v40   ;;  %v620_v46 = vpack.c.bf16 %v538_v44, %v535_v33  ;;  %v570_v47 = vpop.f32.mrf.mxu1  ;;  %v815_v49 = vadd.f32 %v814_v41, %v784_v36  ;;  %v883_v50 = vadd.f32 %v882_v43, %v852_v42  ;;  %v788_v60 = vunpack.c.l.bf16 %v621_v40 }
  0xfa   : > { %1265 = vst [vmem:[%s1509_s30 + $0x58] sm:$0xff] %v1522_v45   ;;  %v624_v58 = vpack.c.bf16 %v570_v47, %v567_v35  ;;  %v789_v63 = vunpack.c.h.bf16 %v621_v40  ;;  %v862_v36 = vmul.f32 %v793_v27, %v793_v27  ;;  %v796_v20 = vunpack.c.l.bf16 %v1522_v45 }
  0xfb   : > { %1260 = vst [vmem:[%s1509_s30 + $0x30] sm:$0xff] %v620_v46   ;;  %v786_v51 = vunpack.c.l.bf16 %v620_v46  ;;  %v1315_v52 = vpop.f32.mrf.mxu1  ;;  %v884_v54 = vadd.f32 %v883_v50, %v853_v48  ;;  %v787_v55 = vunpack.c.h.bf16 %v620_v46  ;;  %v816_v56 = vadd.f32 %v815_v49, %v785_v2 }
  0xfc   : > { %1264 = vst [vmem:[%s1509_s30 + $0x50] sm:$0xff] %v624_v58   ;;  %v857_v7 = vmul.f32 %v788_v60, %v788_v60  ;;  %v858_v15 = vmul.f32 %v789_v63, %v789_v63  ;;  %v794_v34 = vunpack.c.l.bf16 %v624_v58  ;;  %v795_v38 = vunpack.c.h.bf16 %v624_v58 }
  0xfd   : > { %v855_v57 = vmul.f32 %v786_v51, %v786_v51  ;;  %v583_v59 = vpop.f32.mrf.mxu1  ;;  %v817_v61 = vadd.f32 %v816_v56, %v786_v51  ;;  %v885_v62 = vadd.f32 %v884_v54, %v854_v53  ;;  %v856_v3 = vmul.f32 %v787_v55, %v787_v55 }
  0xfe   : > { %v863_v40 = vmul.f32 %v794_v34, %v794_v34  ;;  %v797_v41 = vunpack.c.h.bf16 %v1522_v45  ;;  %v864_v43 = vmul.f32 %v795_v38, %v795_v38  ;;  %v865_v46 = vmul.f32 %v796_v20, %v796_v20 }
  0xff   : > { %v1316_v0 = vpop.f32.mrf.mxu1  ;;  %v818_v1 = vadd.f32 %v817_v61, %v787_v55  ;;  %v886_v4 = vadd.f32 %v885_v62, %v855_v57 }
 0x100   : > { %v627_v5 = vpack.c.bf16 %v1316_v0, %v1315_v52  ;;  %v866_v50 = vmul.f32 %v797_v41, %v797_v41 }
 0x101   : > { %v586_v6 = vpop.f32.mrf.mxu1  ;;  %v819_v8 = vadd.f32 %v818_v1, %v788_v60  ;;  %v887_v9 = vadd.f32 %v886_v4, %v856_v3 }
 0x102   : > { %1267 = vst [vmem:[%s1509_s30 + $0x68] sm:$0xff] %v627_v5   ;;  %v626_v12 = vpack.c.bf16 %v586_v6, %v583_v59  ;;  %v800_v54 = vunpack.c.l.bf16 %v627_v5  ;;  %v801_v58 = vunpack.c.h.bf16 %v627_v5 }
 0x103   : > { %v1319_v14 = vpop.f32.mrf.mxu1  ;;  %v888_v16 = vadd.f32 %v887_v9, %v857_v7  ;;  %v820_v18 = vadd.f32 %v819_v8, %v789_v63 }
 0x104   : > { %1266 = vst [vmem:[%s1509_s30 + $0x60] sm:$0xff] %v626_v12   ;;  %v798_v49 = vunpack.c.l.bf16 %v626_v12  ;;  %v799_v52 = vunpack.c.h.bf16 %v626_v12  ;;  %v869_v45 = vmul.f32 %v800_v54, %v800_v54  ;;  %v870_v1 = vmul.f32 %v801_v58, %v801_v58 }
 0x105   : > { %v599_v19 = vpop.f32.mrf.mxu1  ;;  %v821_v23 = vadd.f32 %v820_v18, %v790_v10  ;;  %v889_v26 = vadd.f32 %v888_v16, %v858_v15 }
 0x106   : > { %v867_v56 = vmul.f32 %v798_v49, %v798_v49  ;;  %v868_v60 = vmul.f32 %v799_v52, %v799_v52 }
 0x107   : > { %v1320_v28 = vpop.f32.mrf.mxu1  ;;  %v822_v30 = vadd.f32 %v821_v23, %v791_v17  ;;  %v890_v22 = vadd.f32 %v889_v26, %v859_v24 }
 0x108   : > { %v629_v25 = vpack.c.bf16 %v1320_v28, %v1319_v14 }
 0x109   : > { %v602_v31 = vpop.f32.mrf.mxu1  ;;  %v823_v29 = vadd.f32 %v822_v30, %v792_v21  ;;  %v891_v33 = vadd.f32 %v890_v22, %v860_v13 }
 0x10a   : > { %1269 = vst [vmem:[%s1509_s30 + $0x78] sm:$0xff] %v629_v25   ;;  %v628_v35 = vpack.c.bf16 %v602_v31, %v599_v19  ;;  %v804_v7 = vunpack.c.l.bf16 %v629_v25  ;;  %v805_v12 = vunpack.c.h.bf16 %v629_v25 }
 0x10b   : > { %v892_v37 = vadd.f32 %v891_v33, %v861_v32  ;;  %v824_v39 = vadd.f32 %v823_v29, %v793_v27 }
 0x10c   : > { %1268 = vst [vmem:[%s1509_s30 + $0x70] sm:$0xff] %v628_v35   ;;  %v802_v0 = vunpack.c.l.bf16 %v628_v35  ;;  %v803_v4 = vunpack.c.h.bf16 %v628_v35  ;;  %v873_v16 = vmul.f32 %v804_v7, %v804_v7  ;;  %v874_v19 = vmul.f32 %v805_v12, %v805_v12 }
 0x10d   : > { %v825_v2 = vadd.f32 %v824_v39, %v794_v34  ;;  %v893_v11 = vadd.f32 %v892_v37, %v862_v36 }
 0x10e   : > { %v871_v9 = vmul.f32 %v802_v0, %v802_v0  ;;  %v872_v5 = vmul.f32 %v803_v4, %v803_v4 }
 0x10f   : > { %v826_v42 = vadd.f32 %v825_v2, %v795_v38  ;;  %v894_v44 = vadd.f32 %v893_v11, %v863_v40 }
 0x111   : > { %v827_v47 = vadd.f32 %v826_v42, %v796_v20  ;;  %v895_v48 = vadd.f32 %v894_v44, %v864_v43 }
 0x113   : > { %v896_v51 = vadd.f32 %v895_v48, %v865_v46  ;;  %v828_v53 = vadd.f32 %v827_v47, %v797_v41 }
 0x115   : > { %v829_v55 = vadd.f32 %v828_v53, %v798_v49  ;;  %v897_v57 = vadd.f32 %v896_v51, %v866_v50 }
 0x117   : > { %v830_v59 = vadd.f32 %v829_v55, %v799_v52  ;;  %v898_v61 = vadd.f32 %v897_v57, %v867_v56 }
 0x119   : > { %v831_v62 = vadd.f32 %v830_v59, %v800_v54  ;;  %v899_v63 = vadd.f32 %v898_v61, %v868_v60 }
 0x11b   : > { %v900_v3 = vadd.f32 %v899_v63, %v869_v45  ;;  %v832_v6 = vadd.f32 %v831_v62, %v801_v58 }
 0x11d   : > { %v833_v8 = vadd.f32 %v832_v6, %v802_v0  ;;  %v901_v10 = vadd.f32 %v900_v3, %v870_v1 }
 0x11f   : > { %v834_v14 = vadd.f32 %v833_v8, %v803_v4  ;;  %v902_v15 = vadd.f32 %v901_v10, %v871_v9 }
 0x121   : > { %v835_v17 = vadd.f32 %v834_v14, %v804_v7  ;;  %v903_v18 = vadd.f32 %v902_v15, %v872_v5 }
 0x123   : > { %v836_v21 = vadd.f32 %v835_v17, %v805_v12  ;;  %v904_v23 = vadd.f32 %v903_v18, %v873_v16 }
 0x125   : > { %v837_v24 = vrot.slane %v836_v21, 4  ;;  %v905_v26 = vadd.f32 %v904_v23, %v874_v19 }
 0x127   : > { %v838_v27 = vadd.f32 %v837_v24, %v836_v21  ;;  %v906_v28 = vrot.slane %v905_v26, 4 }
 0x129   : > { %v839_v30 = vrot.slane %v838_v27, 2  ;;  %v907_v13 = vadd.f32 %v906_v28, %v905_v26 }
 0x12b   : > { %v840_v22 = vadd.f32 %v839_v30, %v838_v27  ;;  %v908_v25 = vrot.slane %v907_v13, 2 }
 0x12d   : > { %v841_v31 = vrot.slane %v840_v22, 1  ;;  %v909_v32 = vadd.f32 %v908_v25, %v907_v13 }
 0x12f   : > { %v910_v29 = vrot.slane %v909_v32, 1  ;;  %v842_v33 = vadd.f32 %v841_v31, %v840_v22 }
 0x131   : > { %v911_v34 = vadd.f32 %v910_v29, %v909_v32 }
 0x133   : > { %v913_v35 = vsel %vm912_vm2, %v842_v33, %v911_v34 }
 0x134   : > { %914 = vst [vmem:[%s211_s8] sm:$0x3] %v913_v35 }
 0x135 PF: > { %s15_s15 = sadd.s32 1, %s1339_s15  }
 0x136   : > { %p12_p5 = scmp.ge.s32.totalorder %s15_s15, 4  }
 0x138   :  { %14 = sbr.rel (!%p12_p5) target bundleno = 1 (0x1), region = 74 }

// kernel: dense_layer_forward.3
= control target key start
LH: loop header
LB: loop body
LE: loop exit
PB: predicated region body
PF: predicated region fallthrough
CT: control target
= control target key end

     0   :  { %s4823_s12 = smov 0   ;;  %s5974_s0 = inlined_call_operand.vmem [shape: bf16[2,16,16,128], index: 0, kind: input, shape index: {}]   ;;  %s5975_s1 = inlined_call_operand.vmem [shape: f32[2,128], index: 1, kind: input, shape index: {}]   ;;  %s5976_s2 = inlined_call_operand.vmem [shape: bf16[3,384,32], index: 2, kind: input, shape index: {}]   ;;  %s5977_s3 = inlined_call_operand.vmem [shape: f32[2,32,256], index: 3, kind: output, shape index: {}]  }
   0x1 LB: > { %s3582_s13 = sadd.s32 4294967295, %s4800_s12   ;;  %p3586_p0 = scmp.ge.s32.totalorder %s4800_s12, 1  ;;  %s4800_s12 = sphi %s4823_s12, %s13_s12  }
   0x2   : > { %p137_p1 = scmp.lt.s32.totalorder %s4800_s12, 3 }
   0x4   : > { %p138_p2 = pnand %p3586_p0, %p137_p1 }
   0x6   : > { %141 = sbr.rel (%p138_p2) target bundleno = 640 (0x280), region = 32 }
   0xb   : > { %v4629_v0 = vld [vmem:[%s5976_s2 + $0x138] sm:$0xff]   ;;  %v4631_v2 = vld [vmem:[%s5976_s2 + $0x130] sm:$0xff]   ;;  %p161_p3 = scmp.lt.s32.totalorder %s3582_s13, 1  ;;  %v4633_v4 = vld [vmem:[%s5976_s2 + $0x128] sm:$0xff]   ;;  %v4802_v7 = vmov 0   ;;  %vm486_vm0 = vcmask 1040384  }
   0xc   : > { %v4630_v1 = vld [vmem:[%s5976_s2 + $0xf8] sm:$0xff]   ;;  %4604 = vmatprep.subr.bf16.mxu1 %v4629_v0  ;;  %4052 = vmatprep.subr.bf16.mxu0 %v4629_v0  ;;  %v4632_v3 = vld [vmem:[%s5976_s2 + $0xf0] sm:$0xff]   ;;  %v4634_v5 = vld [vmem:[%s5976_s2 + $0xe8] sm:$0xff]   ;;  %572 = vst [vmem:[#allocation2] sm:$0xff] %v4802_v7  ;;  %vm487_vm1 = vsmask.f32 256 }
   0xd   : > { %4612 = vmatpush3.bf16.msra.mxu1 %v4630_v1  ;;  %4053 = vmatpush3.bf16.msra.mxu0 %v4630_v1  ;;  %s6037_s13 = smov (!%p161_p3, %s3582_s13), 1  ;;  %v4635_v6 = vld [vmem:[%s5976_s2 + $0x120] sm:$0xff]   ;;  %573 = vst [vmem:[#allocation2 + $0x8] sm:$0xf] %v4802_v7  ;;  %575 = vst [vmem:[#allocation2 + $0x14] sm:$0xf] %v4802_v7 }
   0xe   : > { %4605 = vmatprep.subr.bf16.mxu1 %v4631_v2  ;;  %4054 = vmatprep.subr.bf16.mxu0 %v4631_v2  ;;  %578 = vst [vmem:[#allocation2 + $0x1a0] sm:$0xf] %v4802_v7  ;;  %580 = vst [vmem:[#allocation2 + $0x1ac] sm:$0xf] %v4802_v7  ;;  %s3971_s28 = sshll.u32 %s6037_s13, 7  ;;  %v4636_v8 = vld [vmem:[%s5976_s2 + $0xe0] sm:$0xff]  }
   0xf   : > { %v4637_v9 = vld [vmem:[%s5976_s2 + $0x118] sm:$0xff]   ;;  %s4864_s8 = scalar_lea.vmem %s5974_s0, %s3971_s28  ;;  %v4639_v11 = vld [vmem:[%s5976_s2 + $0x110] sm:$0xff]   ;;  %v4876_v13 = vld [vmem:[%s5975_s1] ss:$0 sm:$0xff]  ;;  %vm553_vm3 = vcmask 1047552   ;;  %s3972_s22 = sshll.u32 %s6037_s13, 6 }
  0x10   : > { %v4638_v10 = vld [vmem:[%s5976_s2 + $0xd8] sm:$0xff]   ;;  %v3974_v12 = vld [vmem:[%s4864_s8] sm:$0xff]   ;;  %v4640_v14 = vld [vmem:[%s5976_s2 + $0xd0] sm:$0xff]   ;;  %vm554_vm4 = vsmask.f32 7424  ;;  %s170_s25 = scalar_lea.vmem %s5977_s3, %s3972_s22 }
  0x11   : > { %4613 = vmatpush3.bf16.msra.mxu1 %v4632_v3  ;;  %4055 = vmatpush3.bf16.msra.mxu0 %v4632_v3  ;;  %v3975_v15 = vunpack.c.l.bf16 %v3974_v12  ;;  %v3976_v16 = vunpack.c.h.bf16 %v3974_v12  ;;  %v4048_v17 = vld [vmem:[%s4864_s8 + $0x60] sm:$0xff]   ;;  %v4641_v21 = vld [vmem:[%s5976_s2 + $0x108] sm:$0xff]   ;;  %v4038_v39 = vld [vmem:[%s4864_s8 + $0x10] sm:$0xff]  }
  0x12   : > { %4606 = vmatprep.subr.bf16.mxu1 %v4633_v4  ;;  %4056 = vmatprep.subr.bf16.mxu0 %v4633_v4  ;;  %v4885_v18 = vld [vmem:[%s5975_s1 + $0x1] ss:$0 sm:$0xff]  ;;  %v4023_v19 = vunpack.c.l.bf16 %v4048_v17  ;;  %v4024_v20 = vunpack.c.h.bf16 %v4048_v17  ;;  %v4037_v24 = vld [vmem:[%s4864_s8 + $0x8] sm:$0xff]   ;;  %v3983_v52 = vunpack.c.l.bf16 %v4038_v39  ;;  %v3984_v56 = vunpack.c.h.bf16 %v4038_v39  ;;  %v4927_v60 = vld [vmem:[%s5976_s2 + $0x178] sm:$0xff]  }
  0x13   : > { %v241_v22 = vmul.f32 %v3975_v15, %v4876_v13  ;;  %v242_v23 = vmul.f32 %v3976_v16, %v4876_v13  ;;  %v3979_v27 = vunpack.c.l.bf16 %v4037_v24  ;;  %v3980_v28 = vunpack.c.h.bf16 %v4037_v24  ;;  %v4049_v29 = vld [vmem:[%s4864_s8 + $0x68] sm:$0xff]   ;;  %v4643_v44 = vld [vmem:[%s5976_s2 + $0x100] sm:$0xff]   ;;  %vm4943_vm2 = vmand %vm486_vm0, %vm487_vm1 }
  0x14   : > { %v265_v25 = vmul.f32 %v4023_v19, %v4876_v13  ;;  %v266_v26 = vmul.f32 %v4024_v20, %v4876_v13  ;;  %v4027_v32 = vunpack.c.l.bf16 %v4049_v29  ;;  %v4028_v33 = vunpack.c.h.bf16 %v4049_v29  ;;  %v4642_v34 = vld [vmem:[%s5976_s2 + $0xc8] sm:$0xff]   ;;  %v4644_v57 = vld [vmem:[%s5976_s2 + $0xc0] sm:$0xff]   ;;  %v4050_v12 = vld [vmem:[%s4864_s8 + $0x70] sm:$0xff]  }
  0x15   : > { %4614 = vmatpush3.bf16.msra.mxu1 %v4634_v5  ;;  %4057 = vmatpush3.bf16.msra.mxu0 %v4634_v5  ;;  %v278_v30 = vadd.f32 %v4885_v18, %v241_v22  ;;  %v279_v31 = vadd.f32 %v4885_v18, %v242_v23  ;;  %v243_v37 = vmul.f32 %v3979_v27, %v4876_v13  ;;  %v4031_v27 = vunpack.c.l.bf16 %v4050_v12  ;;  %v4646_v39 = vld [vmem:[%s5976_s2 + $0x170] sm:$0xff]   ;;  %vm5047_vm5 = vmand %vm553_vm3, %vm554_vm4 }
  0x16   : > { %4607 = vmatprep.subr.bf16.mxu1 %v4635_v6  ;;  %4058 = vmatprep.subr.bf16.mxu0 %v4635_v6  ;;  %v302_v35 = vadd.f32 %v4885_v18, %v265_v25  ;;  %v303_v36 = vadd.f32 %v4885_v18, %v266_v26  ;;  %v244_v38 = vmul.f32 %v3980_v28, %v4876_v13  ;;  %v4693_v7 = vld [vmem:[#allocation2 + $0x8] ss:$12 sps:$4 sm:$0xff]  }
  0x17   : > { %v310_v40 = vmax.f32 %v278_v30, 0.0  ;;  %v311_v41 = vmax.f32 %v279_v31, 0.0  ;;  %v267_v42 = vmul.f32 %v4027_v32, %v4876_v13  ;;  %v268_v43 = vmul.f32 %v4028_v33, %v4876_v13 }
  0x18   : > { %v334_v45 = vmax.f32 %v302_v35, 0.0  ;;  %v335_v46 = vmax.f32 %v303_v36, 0.0  ;;  %v280_v47 = vadd.f32 %v4885_v18, %v243_v37  ;;  %v281_v48 = vadd.f32 %v4885_v18, %v244_v38  ;;  %v4039_v36 = vld [vmem:[%s4864_s8 + $0x18] sm:$0xff]  }
  0x19   : > { %4615 = vmatpush3.bf16.msra.mxu1 %v4636_v8  ;;  %4059 = vmatpush3.bf16.msra.mxu0 %v4636_v8  ;;  %v4913_v49 = vpack.c.bf16 %v311_v41, %v310_v40  ;;  %v304_v50 = vadd.f32 %v4885_v18, %v267_v42  ;;  %v305_v51 = vadd.f32 %v4885_v18, %v268_v43 }
  0x1a   : > { %4608 = vmatprep.subr.bf16.mxu1 %v4637_v9  ;;  %4060 = vmatprep.subr.bf16.mxu0 %v4637_v9  ;;  %v4917_v53 = vpack.c.bf16 %v335_v46, %v334_v45  ;;  %v312_v54 = vmax.f32 %v280_v47, 0.0  ;;  %v313_v55 = vmax.f32 %v281_v48, 0.0  ;;  %v245_v2 = vmul.f32 %v3983_v52, %v4876_v13  ;;  %v4662_v46 = vld [vmem:[%s5976_s2 + $0xb0] sm:$0xff]  }
  0x1b   : > { %v359_v58 = vshrl.u32 %v4913_v49, 16  ;;  %v362_v59 = vshll.u32 %v4913_v49, 16  ;;  %v336_v61 = vmax.f32 %v304_v50, 0.0  ;;  %v337_v62 = vmax.f32 %v305_v51, 0.0  ;;  %1575 = vmatprep.mubr.bf16.mxu0 %v4913_v49  ;;  %v4051_v51 = vld [vmem:[%s4864_s8 + $0x78] sm:$0xff]  }
  0x1c   : > { %v443_v63 = vshrl.u32 %v4917_v53, 16  ;;  %v446_v0 = vshll.u32 %v4917_v53, 16  ;;  %v4931_v1 = vpack.c.bf16 %v313_v55, %v312_v54  ;;  %v246_v6 = vmul.f32 %v3984_v56, %v4876_v13  ;;  %1671 = vmatprep.mubr.bf16.mxu1 %v4917_v53  ;;  %v4040_v56 = vld [vmem:[%s4864_s8 + $0x20] sm:$0xff]  }
  0x1d   : > { %4616 = vmatpush3.bf16.msra.mxu1 %v4638_v10  ;;  %4061 = vmatpush3.bf16.msra.mxu0 %v4638_v10  ;;  %v361_v3 = vrot.slane %v359_v58, 7  ;;  %v4936_v4 = vrot.slane %v362_v59, 1  ;;  %v4938_v5 = vpack.c.bf16 %v337_v62, %v336_v61  ;;  %v282_v19 = vadd.f32 %v4885_v18, %v245_v2  ;;  %v4667_v61 = vld [vmem:[%s5976_s2 + $0xa8] sm:$0xff]  }
  0x1e   : > { %4609 = vmatprep.subr.bf16.mxu1 %v4639_v11  ;;  %4062 = vmatprep.subr.bf16.mxu0 %v4639_v11  ;;  %v445_v8 = vrot.slane %v443_v63, 7  ;;  %v4949_v9 = vrot.slane %v446_v0, 1  ;;  %v366_v10 = vshrl.u32 %v4931_v1, 16  ;;  %v369_v11 = vshll.u32 %v4931_v1, 16  ;;  %v4647_v62 = vld [vmem:[%s5976_s2 + $0x168] sm:$0xff]  }
  0x1f   : > { %v364_v15 = vor.u32 %v362_v59, %v361_v3  ;;  %v450_v16 = vshrl.u32 %v4938_v5, 16  ;;  %v453_v17 = vshll.u32 %v4938_v5, 16  ;;  %v283_v23 = vadd.f32 %v4885_v18, %v246_v6 }
  0x20   : > { %v448_v20 = vor.u32 %v446_v0, %v445_v8  ;;  %v507_v22 = vrot.slane %v369_v11, 1  ;;  %v314_v26 = vmax.f32 %v282_v19, 0.0  ;;  %v269_v45 = vmul.f32 %v4031_v27, %v4876_v13 }
  0x21   : > { %4617 = vmatpush3.bf16.msra.mxu1 %v4640_v14  ;;  %4063 = vmatpush3.bf16.msra.mxu0 %v4640_v14  ;;  %v4653_v14 = vld [vmem:[%s5976_s2 + $0xb8] sm:$0xff]   ;;  %v489_v24 = vsel %vm4943_vm2, 0, %v364_v15  ;;  %v452_v25 = vrot.slane %v450_v16, 7  ;;  %v315_v38 = vmax.f32 %v283_v23, 0.0  ;;  %v3987_v50 = vunpack.c.l.bf16 %v4039_v36  ;;  %v4648_v23 = vld [vmem:[%s5976_s2 + $0x160] sm:$0xff]  }
  0x22   : > { %4610 = vmatprep.subr.bf16.mxu1 %v4641_v21  ;;  %4064 = vmatprep.subr.bf16.mxu0 %v4641_v21  ;;  %v368_v21 = vrot.slane %v366_v10, 7  ;;  %v3593_v28 = vcombine.low %v489_v24, %v4913_v49  ;;  %v3595_v29 = vcombine.high %v489_v24, %v4913_v49  ;;  %v501_v30 = vsel %vm4943_vm2, 0, %v448_v20 }
  0x23   : > { %v3641_v32 = vcombine.low %v501_v30, %v4917_v53  ;;  %v3643_v33 = vcombine.high %v501_v30, %v4917_v53  ;;  %v455_v35 = vor.u32 %v453_v17, %v452_v25  ;;  %v4991_v43 = vpack.c.bf16 %v315_v38, %v314_v26 }
  0x24   : > { %v371_v31 = vor.u32 %v369_v11, %v368_v21  ;;  %854 = vst [vmem:[#allocation2 + $0x18] sm:$0xff] %v3593_v28  ;;  %856 = vst [vmem:[#allocation2 + $0x24] sm:$0xff] %v3595_v29  ;;  %v3988_v59 = vunpack.c.h.bf16 %v4039_v36  ;;  %v4035_v2 = vunpack.c.l.bf16 %v4051_v51  ;;  %v4036_v8 = vunpack.c.h.bf16 %v4051_v51  ;;  %v4676_v28 = vld [vmem:[%s5976_s2 + $0xa0] sm:$0xff]  }
  0x25   : > { %4618 = vmatpush3.bf16.msra.mxu1 %v4642_v34  ;;  %4065 = vmatpush3.bf16.msra.mxu0 %v4642_v34  ;;  %v4972_v34 = vor.u32 %v507_v22, %v366_v10  ;;  %902 = vst [vmem:[#allocation2 + $0x138] sm:$0xff] %v3641_v32  ;;  %904 = vst [vmem:[#allocation2 + $0x144] sm:$0xff] %v3643_v33  ;;  %v502_v42 = vsel %vm4943_vm2, 0, %v455_v35  ;;  %v373_v52 = vshrl.u32 %v4991_v43, 16  ;;  %v376_v54 = vshll.u32 %v4991_v43, 16 }
  0x26   : > { %4611 = vmatprep.subr.bf16.mxu1 %v4643_v44  ;;  %4066 = vmatprep.subr.bf16.mxu0 %v4643_v44  ;;  %v4979_v37 = vsel %vm4943_vm2, 0, %v371_v31  ;;  %v4032_v44 = vunpack.c.h.bf16 %v4050_v12  ;;  %v3645_v47 = vcombine.low %v502_v42, %v4938_v5  ;;  %v3647_v48 = vcombine.high %v502_v42, %v4938_v5 }
  0x27   : > { %v3597_v40 = vcombine.low %v4979_v37, %v4931_v1  ;;  %v3599_v41 = vcombine.high %v4979_v37, %v4931_v1  ;;  %v375_v0 = vrot.slane %v373_v52, 7  ;;  %v248_v6 = vmul.f32 %v3988_v59, %v4876_v13 }
  0x28   : > { %v270_v55 = vmul.f32 %v4032_v44, %v4876_v13  ;;  %906 = vst [vmem:[#allocation2 + $0x150] sm:$0xff] %v3645_v47  ;;  %908 = vst [vmem:[#allocation2 + $0x15c] sm:$0xff] %v3647_v48  ;;  %v3991_v10 = vunpack.c.l.bf16 %v4040_v56  ;;  %v271_v15 = vmul.f32 %v4035_v2, %v4876_v13  ;;  %v272_v20 = vmul.f32 %v4036_v8, %v4876_v13  ;;  %v4681_v47 = vld [vmem:[%s5976_s2 + $0x98] sm:$0xff]  }
  0x29   : > { %4619 = vmatpush3.bf16.msra.mxu1 %v4644_v57  ;;  %4067 = vmatpush3.bf16.msra.mxu0 %v4644_v57  ;;  %858 = vst [vmem:[#allocation2 + $0x30] sm:$0xff] %v3597_v40  ;;  %860 = vst [vmem:[#allocation2 + $0x3c] sm:$0xff] %v3599_v41  ;;  %v306_v57 = vadd.f32 %v4885_v18, %v269_v45  ;;  %v378_v11 = vor.u32 %v376_v54, %v375_v0  ;;  %v3992_v21 = vunpack.c.h.bf16 %v4040_v56 }
  0x2a   : > { %4460 = vmatprep.subr.bf16.mxu1 %v4927_v60  ;;  %4508 = vmatprep.subr.bf16.mxu0 %v4653_v14  ;;  %v285_v19 = vadd.f32 %v4885_v18, %v248_v6  ;;  %v249_v22 = vmul.f32 %v3991_v10, %v4876_v13  ;;  %v308_v27 = vadd.f32 %v4885_v18, %v271_v15 }
  0x2b   : > { %v338_v3 = vmax.f32 %v306_v57, 0.0  ;;  %v309_v32 = vadd.f32 %v4885_v18, %v272_v20  ;;  %v250_v38 = vmul.f32 %v3992_v21, %v4876_v13  ;;  %v4041_v57 = vld [vmem:[%s4864_s8 + $0x28] sm:$0xff]  }
  0x2c   : > { %1576 = vmatmul.mubr.bf16.vlgmr.msra.gmra.mxu0 %v489_v24  ;;  %1672 = vmatmul.mubr.bf16.vlgmr.msra.gmra.mxu1 %v501_v30  ;;  %v491_v24 = vsel %vm4943_vm2, 0, %v378_v11  ;;  %v317_v31 = vmax.f32 %v285_v19, 0.0  ;;  %v340_v36 = vmax.f32 %v308_v27, 0.0  ;;  %v286_v44 = vadd.f32 %v4885_v18, %v249_v22 }
  0x2d   : > { %4509 = vmatpush3.bf16.msra.mxu0 %v4653_v14  ;;  %4461 = vmatpush3.bf16.msra.mxu1 %v4927_v60  ;;  %v307_v60 = vadd.f32 %v4885_v18, %v270_v55  ;;  %v3601_v29 = vcombine.low %v491_v24, %v4991_v43  ;;  %v3603_v30 = vcombine.high %v491_v24, %v4991_v43  ;;  %v341_v41 = vmax.f32 %v309_v32, 0.0 }
  0x2e   : > { %1583 = vmatprep.mubr.bf16.mxu0 %v4931_v1  ;;  %4462 = vmatprep.subr.bf16.mxu1 %v4646_v39  ;;  %v247_v1 = vmul.f32 %v3987_v50, %v4876_v13  ;;  %v287_v45 = vadd.f32 %v4885_v18, %v250_v38  ;;  %v557_v55 = vsel %vm5047_vm5, %v4972_v34, 0  ;;  %v5086_v34 = vld [vmem:[%s5976_s2 + $0x90] sm:$0xff]   ;;  %v3995_v20 = vunpack.c.l.bf16 %v4041_v57 }
  0x2f   : > { %4510 = vmatprep.subr.bf16.mxu0 %v4662_v46  ;;  %1679 = vmatprep.mubr.bf16.mxu1 %v4938_v5  ;;  %v339_v12 = vmax.f32 %v307_v60, 0.0  ;;  %862 = vst [vmem:[#allocation2 + $0x48] sm:$0xff] %v3601_v29  ;;  %864 = vst [vmem:[#allocation2 + $0x54] sm:$0xff] %v3603_v30  ;;  %v5069_v51 = vpack.c.bf16 %v341_v41, %v340_v36  ;;  %v3598_v6 = vcombine.low %v557_v55, %v557_v55  ;;  %v4042_v36 = vld [vmem:[%s4864_s8 + $0x30] sm:$0xff]   ;;  %v5125_v41 = vld [vmem:[%s5976_s2 + $0x88] sm:$0xff]  }
  0x30   : > { %v284_v14 = vadd.f32 %v4885_v18, %v247_v1  ;;  %v4650_v1 = vld [vmem:[%s5976_s2 + $0x150] sm:$0xff]   ;;  %v3600_v19 = vcombine.high %v557_v55, %v557_v55  ;;  %v251_v30 = vmul.f32 %v3995_v20, %v4876_v13  ;;  %v4692_v20 = vld [vmem:[%s5976_s2 + $0x80] sm:$0xff]  }
  0x31   : > { %4511 = vmatpush3.bf16.msra.mxu0 %v4662_v46  ;;  %4463 = vmatpush3.bf16.msra.mxu1 %v4646_v39  ;;  %v5032_v25 = vpack.c.bf16 %v339_v12, %v338_v3  ;;  %v506_v46 = vor.u32 %v4936_v4, %v359_v58  ;;  %v318_v58 = vmax.f32 %v286_v44, 0.0  ;;  %v319_v4 = vmax.f32 %v287_v45, 0.0  ;;  %859 = vst [vmem:[#allocation2 + $0x38] sm:$0xf] %v3598_v6  ;;  %v4655_v6 = vld [vmem:[%s5976_s2 + $0x78] sm:$0xff]   ;;  %v4688_v5 = vld [vmem:[%s5976_s2 + $0x40] sm:$0xff]  }
  0x32   : > { %4512 = vmatprep.subr.bf16.mxu0 %v4667_v61  ;;  %4464 = vmatprep.subr.bf16.mxu1 %v4647_v62  ;;  %v316_v26 = vmax.f32 %v284_v14, 0.0  ;;  %861 = vst [vmem:[#allocation2 + $0x44] sm:$0xf] %v3600_v19  ;;  %v288_v44 = vadd.f32 %v4885_v18, %v251_v30 }
  0x33   : > { %v457_v33 = vshrl.u32 %v5032_v25, 16  ;;  %v460_v35 = vshll.u32 %v5032_v25, 16  ;;  %v556_v56 = vsel %vm5047_vm5, %v506_v46, 0  ;;  %v5093_v2 = vpack.c.bf16 %v319_v4, %v318_v58  ;;  %v4652_v46 = vld [vmem:[%s5976_s2 + $0x140] sm:$0xff]   ;;  %v4043_v58 = vld [vmem:[%s4864_s8 + $0x38] sm:$0xff]  }
  0x34   : > { %1584 = vmatmul.mubr.bf16.gmra.mxu0 %v4979_v37  ;;  %1680 = vmatmul.mubr.bf16.gmra.mxu1 %v502_v42  ;;  %v4649_v37 = vld [vmem:[%s5976_s2 + $0x158] sm:$0xff]   ;;  %v5054_v40 = vpack.c.bf16 %v317_v31, %v316_v26  ;;  %v3594_v0 = vcombine.low %v556_v56, %v556_v56  ;;  %v3596_v3 = vcombine.high %v556_v56, %v556_v56  ;;  %v4651_v26 = vld [vmem:[%s5976_s2 + $0x148] sm:$0xff]   ;;  %v509_v31 = vrot.slane %v376_v54, 1  ;;  %v5144_v4 = vld [vmem:[%s4864_s8 + $0x40] sm:$0xff]  }
  0x35   : > { %4513 = vmatpush3.bf16.msra.mxu0 %v4667_v61  ;;  %4465 = vmatpush3.bf16.msra.mxu1 %v4647_v62  ;;  %v459_v42 = vrot.slane %v457_v33, 7  ;;  %v464_v61 = vshrl.u32 %v5069_v51, 16  ;;  %v467_v62 = vshll.u32 %v5069_v51, 16  ;;  %v387_v14 = vshrl.u32 %v5093_v2, 16 }
  0x36   : > { %4514 = vmatprep.subr.bf16.mxu0 %v4676_v28  ;;  %4466 = vmatprep.subr.bf16.mxu1 %v4648_v23  ;;  %v380_v48 = vshrl.u32 %v5054_v40, 16  ;;  %v383_v50 = vshll.u32 %v5054_v40, 16  ;;  %855 = vst [vmem:[#allocation2 + $0x20] sm:$0xf] %v3594_v0  ;;  %v390_v15 = vshll.u32 %v5093_v2, 16  ;;  %v510_v45 = vor.u32 %v509_v31, %v373_v52 }
  0x37   : > { %1591 = vmatprep.mubr.bf16.mxu0 %v4991_v43  ;;  %v462_v49 = vor.u32 %v460_v35, %v459_v42  ;;  %v466_v12 = vrot.slane %v464_v61, 7  ;;  %857 = vst [vmem:[#allocation2 + $0x2c] sm:$0xf] %v3596_v3  ;;  %v389_v27 = vrot.slane %v387_v14, 7  ;;  %1687 = vmatprep.mubr.bf16.mxu1 %v5032_v25  ;;  %v320_v52 = vmax.f32 %v288_v44, 0.0 }
  0x38   : > { %v382_v59 = vrot.slane %v380_v48, 7  ;;  %v511_v32 = vrot.slane %v383_v50, 1  ;;  %v4003_v19 = vunpack.c.l.bf16 %v4043_v58 }
  0x39   : > { %4515 = vmatpush3.bf16.msra.mxu0 %v4676_v28  ;;  %4467 = vmatpush3.bf16.msra.mxu1 %v4648_v23  ;;  %v503_v60 = vsel %vm4943_vm2, 0, %v462_v49  ;;  %v469_v22 = vor.u32 %v467_v62, %v466_v12  ;;  %v3996_v28 = vunpack.c.h.bf16 %v4041_v57  ;;  %v392_v42 = vor.u32 %v390_v15, %v389_v27  ;;  %v4656_v30 = vld [vmem:[#allocation2 + $0x38] ss:$12 sps:$4 sm:$0xff]  }
  0x3a   : > { %4516 = vmatprep.subr.bf16.mxu0 %v4681_v47  ;;  %4468 = vmatprep.subr.bf16.mxu1 %v4649_v37  ;;  %v3649_v8 = vcombine.low %v503_v60, %v5032_v25  ;;  %v3651_v10 = vcombine.high %v503_v60, %v5032_v25  ;;  %v385_v11 = vor.u32 %v383_v50, %v382_v59  ;;  %v3999_v50 = vunpack.c.l.bf16 %v4042_v36 }
  0x3b   : > { %v504_v29 = vsel %vm4943_vm2, 0, %v469_v22  ;;  %v252_v54 = vmul.f32 %v3996_v28, %v4876_v13  ;;  %v493_v55 = vsel %vm4943_vm2, 0, %v392_v42  ;;  %v4000_v49 = vunpack.c.h.bf16 %v4042_v36 }
  0x3c   : > { %1592 = vmatmul.mubr.bf16.gmra.mxu0 %v491_v24  ;;  %910 = vst [vmem:[#allocation2 + $0x168] sm:$0xff] %v3649_v8  ;;  %912 = vst [vmem:[#allocation2 + $0x174] sm:$0xff] %v3651_v10  ;;  %v492_v21 = vsel %vm4943_vm2, 0, %v385_v11  ;;  %1688 = vmatmul.mubr.bf16.gmra.mxu1 %v503_v60  ;;  %v3653_v38 = vcombine.low %v504_v29, %v5069_v51  ;;  %v3609_v56 = vcombine.low %v493_v55, %v5093_v2 }
  0x3d   : > { %4517 = vmatpush3.bf16.msra.mxu0 %v4681_v47  ;;  %4469 = vmatpush3.bf16.msra.mxu1 %v4649_v37  ;;  %v3605_v23 = vcombine.low %v492_v21, %v5054_v40  ;;  %v3607_v24 = vcombine.high %v492_v21, %v5054_v40  ;;  %v3655_v37 = vcombine.high %v504_v29, %v5069_v51  ;;  %v513_v12 = vrot.slane %v390_v15, 1 }
  0x3e   : > { %4518 = vmatprep.subr.bf16.mxu0 %v5086_v34  ;;  %4470 = vmatprep.subr.bf16.mxu1 %v4650_v1  ;;  %914 = vst [vmem:[#allocation2 + $0x180] sm:$0xff] %v3653_v38  ;;  %v512_v47 = vor.u32 %v511_v32, %v380_v48  ;;  %v289_v43 = vadd.f32 %v4885_v18, %v252_v54  ;;  %v4654_v59 = vld [vmem:[#allocation2 + $0x20] ss:$12 sps:$4 sm:$0xff]   ;;  %870 = vst [vmem:[#allocation2 + $0x78] sm:$0xff] %v3609_v56  ;;  %v4004_v22 = vunpack.c.h.bf16 %v4043_v58 }
  0x3f   : > { %866 = vst [vmem:[#allocation2 + $0x60] sm:$0xff] %v3605_v23  ;;  %868 = vst [vmem:[#allocation2 + $0x6c] sm:$0xff] %v3607_v24  ;;  %1599 = vmatprep.mubr.bf16.mxu0 %v5054_v40  ;;  %1695 = vmatprep.mubr.bf16.mxu1 %v5069_v51  ;;  %v3611_v57 = vcombine.high %v493_v55, %v5093_v2  ;;  %v558_v40 = vsel %vm5047_vm5, %v510_v45, 0  ;;  %v253_v10 = vmul.f32 %v3999_v50, %v4876_v13 }
  0x40   : > { %916 = vst [vmem:[#allocation2 + $0x18c] sm:$0xff] %v3655_v37  ;;  %v559_v48 = vsel %vm5047_vm5, %v512_v47, 0  ;;  %v321_v0 = vmax.f32 %v289_v43, 0.0  ;;  %v3602_v60 = vcombine.low %v558_v40, %v558_v40  ;;  %v4007_v23 = vunpack.c.l.bf16 %v5144_v4  ;;  %v5183_v37 = vld [vmem:[%s4864_s8 + $0x50] sm:$0xff]  }
  0x41   : > { %4471 = vmatpush3.bf16.msra.mxu1 %v4650_v1  ;;  %4519 = vmatpush3.bf16.msra.mxu0 %v5086_v34  ;;  %v3604_v1 = vcombine.high %v558_v40, %v558_v40  ;;  %v3606_v3 = vcombine.low %v559_v48, %v559_v48  ;;  %872 = vst [vmem:[#allocation2 + $0x84] sm:$0xff] %v3611_v57  ;;  %v4008_v24 = vunpack.c.h.bf16 %v5144_v4  ;;  %v4659_v43 = vld [vmem:[%s5976_s2 + $0x70] sm:$0xff]  }
  0x42   : > { %4472 = vmatprep.subr.bf16.mxu1 %v4651_v26  ;;  %4520 = vmatprep.subr.bf16.mxu0 %v5125_v41  ;;  %v3608_v8 = vcombine.high %v559_v48, %v559_v48  ;;  %v5159_v11 = vpack.c.bf16 %v321_v0, %v320_v52  ;;  %863 = vst [vmem:[#allocation2 + $0x50] sm:$0xf] %v3602_v60  ;;  %v4015_v48 = vunpack.c.l.bf16 %v5183_v37 }
  0x43   : > { %865 = vst [vmem:[#allocation2 + $0x5c] sm:$0xf] %v3604_v1  ;;  %867 = vst [vmem:[#allocation2 + $0x68] sm:$0xf] %v3606_v3  ;;  %v254_v34 = vmul.f32 %v4000_v49, %v4876_v13  ;;  %v514_v28 = vor.u32 %v513_v12, %v387_v14  ;;  %v255_v32 = vmul.f32 %v4003_v19, %v4876_v13  ;;  %v4016_v1 = vunpack.c.h.bf16 %v5183_v37  ;;  %v4664_v19 = vld [vmem:[%s5976_s2 + $0x68] sm:$0xff]  }
  0x44   : > { %1600 = vmatmul.mubr.bf16.gmra.mxu0 %v492_v21  ;;  %1696 = vmatmul.mubr.bf16.gmra.mxu1 %v504_v29  ;;  %869 = vst [vmem:[#allocation2 + $0x74] sm:$0xf] %v3608_v8  ;;  %v290_v21 = vadd.f32 %v4885_v18, %v253_v10  ;;  %v394_v15 = vshrl.u32 %v5159_v11, 16  ;;  %v5177_v29 = vld [vmem:[%s4864_s8 + $0x48] sm:$0xff]   ;;  %v256_v36 = vmul.f32 %v4004_v22, %v4876_v13 }
  0x45   : > { %4473 = vmatpush3.bf16.msra.mxu1 %v4651_v26  ;;  %1607 = vmatprep.mubr.bf16.mxu0 %v5093_v2  ;;  %v397_v26 = vshll.u32 %v5159_v11, 16  ;;  %v291_v27 = vadd.f32 %v4885_v18, %v254_v34  ;;  %v257_v38 = vmul.f32 %v4007_v23, %v4876_v13  ;;  %v4657_v2 = vld [vmem:[%s5976_s2 + $0x38] sm:$0xff]   ;;  %v560_v54 = vsel %vm5047_vm5, %v514_v28, 0  ;;  %v4661_v34 = vld [vmem:[%s5976_s2 + $0x30] sm:$0xff]  }
  0x46   : > { %4474 = vmatprep.subr.bf16.mxu1 %v4652_v46  ;;  %4476 = vmatprep.mubr.bf16.mxu1 %v4654_v59  ;;  %v322_v31 = vmax.f32 %v290_v21, 0.0  ;;  %v396_v14 = vrot.slane %v394_v15, 7  ;;  %v3610_v45 = vcombine.low %v560_v54, %v560_v54  ;;  %v292_v47 = vadd.f32 %v4885_v18, %v255_v32 }
  0x47   : > { %4521 = vmatpush3.bf16.msra.mxu0 %v5125_v41  ;;  %v323_v42 = vmax.f32 %v291_v27, 0.0  ;;  %v515_v44 = vrot.slane %v397_v26, 1  ;;  %v293_v50 = vadd.f32 %v4885_v18, %v256_v36  ;;  %v4712_v41 = vld [vmem:[%s5976_s2 + $0x1f8] sm:$0xff]   ;;  %v258_v58 = vmul.f32 %v4008_v24, %v4876_v13 }
  0x48   : > { %4522 = vmatprep.subr.bf16.mxu0 %v4692_v20  ;;  %871 = vst [vmem:[#allocation2 + $0x80] sm:$0xf] %v3610_v45  ;;  %v294_v56 = vadd.f32 %v4885_v18, %v257_v38  ;;  %v4011_v57 = vunpack.c.l.bf16 %v5177_v29  ;;  %v4012_v40 = vunpack.c.h.bf16 %v5177_v29  ;;  %v324_v22 = vmax.f32 %v292_v47, 0.0 }
  0x49   : > { %4475 = vmatpush3.bf16.msra.mxu1 %v4652_v46  ;;  %v3612_v46 = vcombine.high %v560_v54, %v560_v54  ;;  %v5199_v52 = vpack.c.bf16 %v323_v42, %v322_v31  ;;  %v516_v49 = vor.u32 %v515_v44, %v394_v15  ;;  %v295_v60 = vadd.f32 %v4885_v18, %v258_v58  ;;  %v5242_v42 = vld [vmem:[%s5975_s1] ss:$0 sm:$0xff] }
  0x4a   : > { %4188 = vmatprep.subr.bf16.mxu1 %v4655_v6  ;;  %v4658_v4 = vld [vmem:[#allocation2 + $0x50] ss:$12 sps:$4 sm:$0xff]   ;;  %v325_v23 = vmax.f32 %v293_v50, 0.0  ;;  %v326_v27 = vmax.f32 %v294_v56, 0.0  ;;  %v259_v29 = vmul.f32 %v4011_v57, %v4876_v13  ;;  %v260_v36 = vmul.f32 %v4012_v40, %v4876_v13  ;;  %v4671_v56 = vld [vmem:[%s5976_s2 + $0x20] sm:$0xff]  }
  0x4b   : > { %873 = vst [vmem:[#allocation2 + $0x8c] sm:$0xf] %v3612_v46  ;;  %4523 = vmatpush3.bf16.msra.mxu0 %v4692_v20  ;;  %v401_v0 = vshrl.u32 %v5199_v52, 16  ;;  %v404_v8 = vshll.u32 %v5199_v52, 16  ;;  %v561_v10 = vsel %vm5047_vm5, %v516_v49, 0  ;;  %v327_v28 = vmax.f32 %v295_v60, 0.0 }
  0x4c   : > { %1608 = vmatmul.mubr.bf16.gmra.mxu0 %v493_v55  ;;  %v399_v55 = vor.u32 %v397_v26, %v396_v14  ;;  %4324 = vmatprep.subr.bf16.mxu0 %v4712_v41  ;;  %v3614_v20 = vcombine.low %v561_v10, %v561_v10  ;;  %v3616_v21 = vcombine.high %v561_v10, %v561_v10  ;;  %v4666_v26 = vld [vmem:[%s5976_s2 + $0x28] sm:$0xff]   ;;  %v5260_v49 = vld [vmem:[%s4864_s8 + $0x58] sm:$0xff]  }
  0x4d   : > { %4477 = vmatmul.mubr.bf16.vlgmr.msra.gmra.mxu1 %v4656_v30  ;;  %v403_v12 = vrot.slane %v401_v0, 7  ;;  %v517_v24 = vrot.slane %v404_v8, 1  ;;  %1615 = vmatprep.mubr.bf16.mxu0 %v5159_v11  ;;  %v4660_v30 = vld [vmem:[#allocation2 + $0x68] ss:$12 sps:$4 sm:$0xff]   ;;  %v5227_v31 = vpack.c.bf16 %v325_v23, %v324_v22  ;;  %v261_v38 = vmul.f32 %v4015_v48, %v4876_v13  ;;  %v4673_v60 = vld [vmem:[%s5976_s2 + $0x58] sm:$0xff]  }
  0x4e   : > { %v494_v59 = vsel %vm4943_vm2, 0, %v399_v55  ;;  %4189 = vmatpush3.bf16.msra.mxu1 %v4657_v2  ;;  %4480 = vmatprep.mubr.bf16.mxu1 %v4658_v4  ;;  %875 = vst [vmem:[#allocation2 + $0x98] sm:$0xf] %v3614_v20  ;;  %877 = vst [vmem:[#allocation2 + $0xa4] sm:$0xf] %v3616_v21  ;;  %v4669_v2 = vld [vmem:[%s5976_s2 + $0x60] sm:$0xff]   ;;  %v5236_v14 = vpack.c.bf16 %v327_v28, %v326_v27  ;;  %v262_v13 = vmul.f32 %v5242_v42, %v4016_v1 }
  0x4f   : > { %v3613_v3 = vcombine.low %v494_v59, %v5159_v11  ;;  %v3615_v6 = vcombine.high %v494_v59, %v5159_v11  ;;  %4190 = vmatprep.subr.bf16.mxu1 %v4659_v43  ;;  %v406_v15 = vor.u32 %v404_v8, %v403_v12  ;;  %v518_v32 = vor.u32 %v517_v24, %v401_v0  ;;  %v5256_v55 = vld [vmem:[%s5975_s1 + $0x1] ss:$0 sm:$0xff] }
  0x50   : > { %v296_v11 = vadd.f32 %v4885_v18, %v259_v29  ;;  %v408_v46 = vshrl.u32 %v5227_v31, 16  ;;  %v411_v47 = vshll.u32 %v5227_v31, 16  ;;  %v415_v50 = vshrl.u32 %v5236_v14, 16 }
  0x51   : > { %874 = vst [vmem:[#allocation2 + $0x90] sm:$0xff] %v3613_v3  ;;  %876 = vst [vmem:[#allocation2 + $0x9c] sm:$0xff] %v3615_v6  ;;  %v495_v37 = vsel %vm4943_vm2, 0, %v406_v15  ;;  %v562_v18 = vsel %vm5047_vm5, %v518_v32, 0  ;;  %v418_v41 = vshll.u32 %v5236_v14, 16  ;;  %v297_v43 = vadd.f32 %v5256_v55, %v260_v36  ;;  %v4678_v36 = vld [vmem:[%s5976_s2 + $0x50] sm:$0xff]  }
  0x52   : > { %4191 = vmatpush3.bf16.msra.mxu1 %v4661_v34  ;;  %v3617_v54 = vcombine.low %v495_v37, %v5199_v52  ;;  %v3619_v44 = vcombine.high %v495_v37, %v5199_v52  ;;  %v4663_v45 = vld [vmem:[#allocation2 + $0x80] ss:$12 sps:$4 sm:$0xff]   ;;  %v410_v58 = vrot.slane %v408_v46, 7  ;;  %v3618_v4 = vcombine.low %v562_v18, %v562_v18 }
  0x53   : > { %4192 = vmatprep.subr.bf16.mxu1 %v4664_v19  ;;  %v3620_v57 = vcombine.high %v562_v18, %v562_v18  ;;  %v519_v40 = vrot.slane %v411_v47, 1  ;;  %v417_v48 = vrot.slane %v415_v50, 7  ;;  %v298_v1 = vadd.f32 %v5256_v55, %v261_v38 }
  0x54   : > { %1616 = vmatmul.mubr.bf16.gmra.mxu0 %v494_v59  ;;  %878 = vst [vmem:[#allocation2 + $0xa8] sm:$0xff] %v3617_v54  ;;  %880 = vst [vmem:[#allocation2 + $0xb4] sm:$0xff] %v3619_v44  ;;  %v521_v59 = vrot.slane %v418_v41, 1  ;;  %v413_v0 = vor.u32 %v411_v47, %v410_v58  ;;  %v299_v3 = vadd.f32 %v5256_v55, %v262_v13  ;;  %v4019_v6 = vunpack.c.l.bf16 %v5260_v49  ;;  %v4683_v54 = vld [vmem:[%s5976_s2 + $0x48] sm:$0xff]  }
  0x55   : > { %4481 = vmatmul.mubr.bf16.gmra.mxu1 %v4660_v30  ;;  %1623 = vmatprep.mubr.bf16.mxu0 %v5199_v52  ;;  %879 = vst [vmem:[#allocation2 + $0xb0] sm:$0xf] %v3618_v4  ;;  %881 = vst [vmem:[#allocation2 + $0xbc] sm:$0xf] %v3620_v57  ;;  %v520_v8 = vor.u32 %v519_v40, %v408_v46  ;;  %v420_v10 = vor.u32 %v418_v41, %v417_v48  ;;  %v328_v12 = vmax.f32 %v296_v11, 0.0  ;;  %v4675_v52 = vld [vmem:[%s5976_s2 + $0x18] sm:$0xff]  }
  0x56   : > { %4484 = vmatprep.mubr.bf16.mxu1 %v4663_v45  ;;  %4193 = vmatpush3.bf16.msra.mxu1 %v4666_v26  ;;  %v522_v34 = vor.u32 %v521_v59, %v415_v50  ;;  %v4665_v19 = vld [vmem:[#allocation2 + $0x98] ss:$12 sps:$4 sm:$0xff]   ;;  %v5277_v20 = vsel %vm4943_vm2, 0, %v413_v0  ;;  %v329_v21 = vmax.f32 %v297_v43, 0.0  ;;  %v330_v22 = vmax.f32 %v298_v1, 0.0 }
  0x57   : > { %4194 = vmatprep.subr.bf16.mxu1 %v4669_v2  ;;  %v331_v23 = vmax.f32 %v299_v3, 0.0  ;;  %v3621_v24 = vcombine.low %v5277_v20, %v5227_v31  ;;  %v3623_v15 = vcombine.high %v5277_v20, %v5227_v31  ;;  %v563_v26 = vsel %vm5047_vm5, %v520_v8, 0  ;;  %v4680_v2 = vld [vmem:[%s5976_s2 + $0x10] sm:$0xff]  }
  0x58   : > { %v5287_v27 = vsel %vm4943_vm2, 0, %v420_v10  ;;  %v3622_v28 = vcombine.low %v563_v26, %v563_v26  ;;  %v3624_v29 = vcombine.high %v563_v26, %v563_v26  ;;  %v564_v38 = vsel %vm5047_vm5, %v522_v34, 0 }
  0x59   : > { %v3625_v30 = vcombine.low %v5287_v27, %v5236_v14  ;;  %v3627_v32 = vcombine.high %v5287_v27, %v5236_v14  ;;  %882 = vst [vmem:[#allocation2 + $0xc0] sm:$0xff] %v3621_v24  ;;  %884 = vst [vmem:[#allocation2 + $0xcc] sm:$0xff] %v3623_v15  ;;  %v3626_v11 = vcombine.low %v564_v38, %v564_v38  ;;  %v4020_v47 = vunpack.c.h.bf16 %v5260_v49 }
  0x5a   : > { %4195 = vmatpush3.bf16.msra.mxu1 %v4671_v56  ;;  %883 = vst [vmem:[#allocation2 + $0xc8] sm:$0xf] %v3622_v28  ;;  %885 = vst [vmem:[#allocation2 + $0xd4] sm:$0xf] %v3624_v29  ;;  %v3628_v13 = vcombine.high %v564_v38, %v564_v38  ;;  %v5309_v46 = vpack.c.bf16 %v331_v23, %v330_v22  ;;  %v263_v50 = vmul.f32 %v5242_v42, %v4019_v6  ;;  %v4690_v28 = vld [vmem:[%s5976_s2] sm:$0xff]  }
  0x5b   : > { %4196 = vmatprep.subr.bf16.mxu1 %v4673_v60  ;;  %886 = vst [vmem:[#allocation2 + $0xd8] sm:$0xff] %v3625_v30  ;;  %888 = vst [vmem:[#allocation2 + $0xe4] sm:$0xff] %v3627_v32  ;;  %v530_v41 = vor.u32 %v4949_v9, %v443_v63  ;;  %v531_v43 = vrot.slane %v453_v17, 1  ;;  %v533_v58 = vrot.slane %v460_v35, 1  ;;  %v264_v40 = vmul.f32 %v5242_v42, %v4020_v47  ;;  %v4685_v9 = vld [vmem:[%s5976_s2 + $0x8] sm:$0xff]   ;;  %v5365_v32 = vld [vmem:[%s5976_s2 + $0x238] sm:$0xff]  }
  0x5c   : > { %1624 = vmatmul.mubr.bf16.gmra.mxu0 %v495_v37  ;;  %v5298_v37 = vpack.c.bf16 %v329_v21, %v328_v12  ;;  %v4668_v18 = vld [vmem:[#allocation2 + $0xb0] ss:$12 sps:$4 sm:$0xff]   ;;  %887 = vst [vmem:[#allocation2 + $0xe0] sm:$0xf] %v3626_v11  ;;  %889 = vst [vmem:[#allocation2 + $0xec] sm:$0xf] %v3628_v13  ;;  %v300_v48 = vadd.f32 %v5256_v55, %v263_v50 }
  0x5d   : > { %4485 = vmatmul.mubr.bf16.gmra.mxu1 %v4665_v19  ;;  %1631 = vmatprep.mubr.bf16.mxu0 %v5227_v31  ;;  %v429_v49 = vshrl.u32 %v5309_v46, 16  ;;  %v432_v57 = vshll.u32 %v5309_v46, 16  ;;  %v568_v53 = vsel %vm5047_vm5, %v530_v41, 0  ;;  %v532_v63 = vor.u32 %v531_v43, %v450_v16 }
  0x5e   : > { %v422_v44 = vshrl.u32 %v5298_v37, 16  ;;  %v425_v45 = vshll.u32 %v5298_v37, 16  ;;  %4197 = vmatpush3.bf16.msra.mxu1 %v4675_v52  ;;  %4488 = vmatprep.mubr.bf16.mxu1 %v4668_v18  ;;  %v301_v42 = vadd.f32 %v5256_v55, %v264_v40  ;;  %v332_v60 = vmax.f32 %v300_v48, 0.0 }
  0x5f   : > { %4198 = vmatprep.subr.bf16.mxu1 %v4678_v36  ;;  %v525_v59 = vrot.slane %v432_v57, 1  ;;  %v431_v0 = vrot.slane %v429_v49, 7  ;;  %v3642_v1 = vcombine.low %v568_v53, %v568_v53  ;;  %v3644_v3 = vcombine.high %v568_v53, %v568_v53 }
  0x60   : > { %v523_v4 = vrot.slane %v425_v45, 1  ;;  %v424_v56 = vrot.slane %v422_v44, 7  ;;  %v534_v10 = vor.u32 %v533_v58, %v457_v33  ;;  %v333_v12 = vmax.f32 %v301_v42, 0.0 }
  0x61   : > { %v4670_v16 = vld [vmem:[#allocation2 + $0xc8] ss:$12 sps:$4 sm:$0xff]   ;;  %v526_v6 = vor.u32 %v525_v59, %v429_v49  ;;  %v434_v8 = vor.u32 %v432_v57, %v431_v0  ;;  %903 = vst [vmem:[#allocation2 + $0x140] sm:$0xf] %v3642_v1  ;;  %905 = vst [vmem:[#allocation2 + $0x14c] sm:$0xf] %v3644_v3 }
  0x62   : > { %v524_v17 = vor.u32 %v523_v4, %v422_v44  ;;  %v427_v35 = vor.u32 %v425_v45, %v424_v56  ;;  %4199 = vmatpush3.bf16.msra.mxu1 %v4680_v2  ;;  %v569_v52 = vsel %vm5047_vm5, %v532_v63, 0  ;;  %v5353_v24 = vpack.c.bf16 %v333_v12, %v332_v60  ;;  %v4695_v63 = vld [vmem:[#allocation2 + $0x20] ss:$12 sps:$4 sm:$0xff]   ;;  %v4721_v60 = vld [vmem:[%s5976_s2 + $0x1b0] sm:$0xff]  }
  0x63   : > { %4200 = vmatprep.subr.bf16.mxu1 %v4683_v54  ;;  %v4672_v19 = vld [vmem:[#allocation2 + $0xe0] ss:$12 sps:$4 sm:$0xff]   ;;  %v566_v23 = vsel %vm5047_vm5, %v526_v6, 0  ;;  %v5357_v15 = vsel %vm4943_vm2, 0, %v434_v8  ;;  %v3646_v26 = vcombine.low %v569_v52, %v569_v52  ;;  %v3648_v2 = vcombine.high %v569_v52, %v569_v52  ;;  %v4700_v3 = vld [vmem:[#allocation2 + $0x50] ss:$12 sps:$4 sm:$0xff]  }
  0x64   : > { %1632 = vmatmul.mubr.bf16.gmra.mxu0 %v5277_v20  ;;  %v565_v34 = vsel %vm5047_vm5, %v524_v17, 0  ;;  %v5343_v55 = vsel %vm4943_vm2, 0, %v427_v35  ;;  %v3634_v29 = vcombine.low %v566_v23, %v566_v23  ;;  %v3636_v30 = vcombine.high %v566_v23, %v566_v23  ;;  %v4713_v17 = vld [vmem:[%s5976_s2 + $0x1b8] sm:$0xff]   ;;  %v4720_v35 = vld [vmem:[%s5976_s2 + $0x1f0] sm:$0xff]   ;;  %v4793_v0 = vld [vmem:[#allocation2] sm:$0xff] }
  0x65   : > { %1639 = vmatprep.mubr.bf16.mxu0 %v5236_v14  ;;  %4489 = vmatmul.mubr.bf16.gmra.mxu1 %v4670_v16  ;;  %v3630_v21 = vcombine.low %v565_v34, %v565_v34  ;;  %v3632_v22 = vcombine.high %v565_v34, %v565_v34  ;;  %v3629_v25 = vcombine.low %v5343_v55, %v5298_v37  ;;  %v436_v36 = vshrl.u32 %v5353_v24, 16  ;;  %v4727_v1 = vld [vmem:[%s5976_s2 + $0x1e8] sm:$0xff]   ;;  %v4729_v8 = vld [vmem:[%s5976_s2 + $0x1e0] sm:$0xff]   ;;  %v4704_v34 = vld [vmem:[%s5976_s2 + $0x230] sm:$0xff]  }
  0x66   : > { %v3631_v33 = vcombine.high %v5343_v55, %v5298_v37  ;;  %4201 = vmatpush3.bf16.msra.mxu1 %v4685_v9  ;;  %4492 = vmatprep.mubr.bf16.mxu1 %v4672_v19  ;;  %v439_v38 = vshll.u32 %v5353_v24, 16  ;;  %907 = vst [vmem:[#allocation2 + $0x158] sm:$0xf] %v3646_v26  ;;  %895 = vst [vmem:[#allocation2 + $0x110] sm:$0xf] %v3634_v29  ;;  %v570_v11 = vsel %vm5047_vm5, %v534_v10, 0 }
  0x67   : > { %891 = vst [vmem:[#allocation2 + $0xf8] sm:$0xf] %v3630_v21  ;;  %893 = vst [vmem:[#allocation2 + $0x104] sm:$0xf] %v3632_v22  ;;  %4202 = vmatprep.subr.bf16.mxu1 %v4688_v5  ;;  %v535_v13 = vrot.slane %v467_v62, 1  ;;  %v438_v44 = vrot.slane %v436_v36, 7  ;;  %v3650_v45 = vcombine.low %v570_v11, %v570_v11  ;;  %v3652_v47 = vcombine.high %v570_v11, %v570_v11 }
  0x68   : > { %890 = vst [vmem:[#allocation2 + $0xf0] sm:$0xff] %v3629_v25  ;;  %892 = vst [vmem:[#allocation2 + $0xfc] sm:$0xff] %v3631_v33  ;;  %v527_v54 = vrot.slane %v439_v38, 1  ;;  %v4682_v40 = vld [vmem:[#allocation2 + $0x140] ss:$12 sps:$4 sm:$0xff]   ;;  %v5397_v42 = vcombine.high %v4793_v0, %v4793_v0  ;;  %v5412_v10 = vcombine.low %v4793_v0, %v4793_v0  ;;  %v4737_v21 = vld [vmem:[%s5976_s2 + $0x1d8] sm:$0xff]  }
  0x69   : > { %897 = vst [vmem:[#allocation2 + $0x11c] sm:$0xf] %v3636_v30  ;;  %909 = vst [vmem:[#allocation2 + $0x164] sm:$0xf] %v3648_v2  ;;  %v536_v18 = vor.u32 %v535_v13, %v464_v61  ;;  %v441_v41 = vor.u32 %v439_v38, %v438_v44  ;;  %v4698_v9 = vld [vmem:[#allocation2 + $0x38] ss:$12 sps:$4 sm:$0xff]  }
  0x6a   : > { %4203 = vmatpush3.bf16.msra.mxu1 %v4690_v28  ;;  %v528_v50 = vor.u32 %v527_v54, %v436_v36  ;;  %911 = vst [vmem:[#allocation2 + $0x170] sm:$0xf] %v3650_v45  ;;  %913 = vst [vmem:[#allocation2 + $0x17c] sm:$0xf] %v3652_v47  ;;  %v4703_v5 = vld [vmem:[#allocation2 + $0x68] ss:$12 sps:$4 sm:$0xff]  }
  0x6b   : > { %4556 = vmatprep.subr.bf16.mxu1 %v5365_v32  ;;  %v571_v62 = vsel %vm5047_vm5, %v536_v18, 0  ;;  %v5384_v49 = vsel %vm4943_vm2, 0, %v441_v41  ;;  %v4728_v16 = vld [vmem:[%s5976_s2 + $0x1a8] sm:$0xff]   ;;  %v4730_v12 = vld [vmem:[%s5976_s2 + $0x1a0] sm:$0xff]   ;;  %v4738_v25 = vld [vmem:[%s5976_s2 + $0x198] sm:$0xff]  }
  0x6c   : > { %1640 = vmatmul.mubr.bf16.gmra.mxu0 %v5287_v27  ;;  %v3654_v58 = vcombine.low %v571_v62, %v571_v62  ;;  %v3656_v4 = vcombine.high %v571_v62, %v571_v62  ;;  %v567_v56 = vsel %vm5047_vm5, %v528_v50, 0  ;;  %v4696_v6 = vld [vmem:[#allocation2 + $0x1c] ss:$12 sps:$4 sm:$0xff]   ;;  %v4706_v52 = vld [vmem:[#allocation2 + $0x80] ss:$12 sps:$4 sm:$0xff]   ;;  %v4739_v23 = vld [vmem:[%s5976_s2 + $0x1d0] sm:$0xff]  }
  0x6d   : > { %1647 = vmatprep.mubr.bf16.mxu0 %v5298_v37  ;;  %v3638_v61 = vcombine.low %v567_v56, %v567_v56  ;;  %v3640_v57 = vcombine.high %v567_v56, %v567_v56  ;;  %v4717_v19 = vld [vmem:[%s5976_s2 + $0x228] sm:$0xff]   ;;  %v4709_v22 = vld [vmem:[#allocation2 + $0x98] ss:$12 sps:$4 sm:$0xff]   ;;  %v5434_v26 = vld [vmem:[#allocation2 + $0x34] ss:$12 sps:$4 sm:$0xff]  }
  0x6e   : > { %v4674_v43 = vld [vmem:[#allocation2 + $0xf8] ss:$12 sps:$4 sm:$0xff]   ;;  %915 = vst [vmem:[#allocation2 + $0x188] sm:$0xf] %v3654_v58  ;;  %917 = vst [vmem:[#allocation2 + $0x194] sm:$0xf] %v3656_v4 }
  0x6f   : > { %4493 = vmatmul.mubr.bf16.gmra.mxu1 %v4674_v43  ;;  %899 = vst [vmem:[#allocation2 + $0x128] sm:$0xf] %v3638_v61  ;;  %901 = vst [vmem:[#allocation2 + $0x134] sm:$0xf] %v3640_v57  ;;  %v4699_v33 = vld [vmem:[#allocation2 + $0x18] ss:$12 sps:$4 sm:$0xff]  }
  0x70   : > { %v4677_v51 = vld [vmem:[#allocation2 + $0x110] ss:$12 sps:$4 sm:$0xff]   ;;  %v4684_v48 = vld [vmem:[#allocation2 + $0x158] ss:$12 sps:$4 sm:$0xff]   ;;  %v4746_v30 = vld [vmem:[%s5976_s2 + $0x1c8] sm:$0xff]  }
  0x71   : > { %4496 = vmatprep.mubr.bf16.mxu1 %v4677_v51  ;;  %v4687_v53 = vld [vmem:[#allocation2 + $0x170] ss:$12 sps:$4 sm:$0xff]   ;;  %v4734_v28 = vld [vmem:[%s5976_s2 + $0x220] sm:$0xff]   ;;  %v4716_v38 = vld [vmem:[#allocation2 + $0xc8] ss:$12 sps:$4 sm:$0xff]  }
  0x72   : > { %v4740_v29 = vld [vmem:[%s5976_s2 + $0x190] sm:$0xff]   ;;  %v4750_v36 = vld [vmem:[%s5976_s2 + $0x218] sm:$0xff]   ;;  %v4747_v2 = vld [vmem:[%s5976_s2 + $0x188] sm:$0xff]  }
  0x73   : > { %v4705_v11 = vld [vmem:[#allocation2 + $0x30] ss:$12 sps:$4 sm:$0xff]   ;;  %v4748_v13 = vld [vmem:[%s5976_s2 + $0x1c0] sm:$0xff]   ;;  %v4707_v54 = vld [vmem:[#allocation2 + $0x4c] ss:$12 sps:$4 sm:$0xff]  }
  0x74   : > { %1648 = vmatmul.mubr.bf16.gmra.mxu0 %v5343_v55  ;;  %v4751_v44 = vld [vmem:[%s5976_s2 + $0x210] sm:$0xff]   ;;  %v4749_v45 = vld [vmem:[%s5976_s2 + $0x180] sm:$0xff]   ;;  %v4752_v18 = vld [vmem:[%s5976_s2 + $0x208] sm:$0xff]  }
  0x75   : > { %1655 = vmatprep.mubr.bf16.mxu0 %v5309_v46  ;;  %v4689_v59 = vld [vmem:[#allocation2 + $0x188] ss:$12 sps:$4 sm:$0xff]   ;;  %v4719_v47 = vld [vmem:[#allocation2 + $0xe0] ss:$12 sps:$4 sm:$0xff]   ;;  %v4724_v50 = vld [vmem:[#allocation2 + $0xf8] ss:$12 sps:$4 sm:$0xff]  }
  0x76   : > { %v4679_v39 = vld [vmem:[#allocation2 + $0x128] ss:$12 sps:$4 sm:$0xff]   ;;  %v4714_v62 = vld [vmem:[#allocation2 + $0x64] ss:$12 sps:$4 sm:$0xff]   ;;  %v4718_v56 = vld [vmem:[#allocation2 + $0x60] ss:$12 sps:$4 sm:$0xff]  }
  0x77   : > { %4497 = vmatmul.mubr.bf16.gmra.mxu1 %v4679_v39  ;;  %v4710_v41 = vld [vmem:[#allocation2 + $0x48] ss:$12 sps:$4 sm:$0xff]   ;;  %v4760_v43 = vld [vmem:[%s5976_s2 + $0x200] sm:$0xff]   ;;  %v4726_v58 = vld [vmem:[#allocation2 + $0x110] ss:$12 sps:$4 sm:$0xff]  }
  0x78   : > { %4500 = vmatprep.mubr.bf16.mxu1 %v4682_v40  ;;  %v4733_v4 = vld [vmem:[#allocation2 + $0x128] ss:$12 sps:$4 sm:$0xff]   ;;  %v4736_v61 = vld [vmem:[#allocation2 + $0x140] ss:$12 sps:$4 sm:$0xff]   ;;  %v4743_v57 = vld [vmem:[#allocation2 + $0x158] ss:$12 sps:$4 sm:$0xff]  }
  0x79   : > { %v4722_v51 = vld [vmem:[#allocation2 + $0x7c] ss:$12 sps:$4 sm:$0xff]   ;;  %v4725_v40 = vld [vmem:[#allocation2 + $0x78] ss:$12 sps:$4 sm:$0xff]   ;;  %v4731_v39 = vld [vmem:[#allocation2 + $0x94] ss:$12 sps:$4 sm:$0xff]  }
  0x7c   : > { %1656 = vmatmul.mubr.bf16.gmra.mxu0 %v5357_v15 }
  0x7d   : > { %1663 = vmatprep.mubr.bf16.mxu0 %v5353_v24 }
  0x7f   : > { %4501 = vmatmul.mubr.bf16.gmra.mxu1 %v4684_v48  ;;  %v4735_v48 = vld [vmem:[#allocation2 + $0x90] ss:$12 sps:$4 sm:$0xff]  }
  0x80   : > { %4504 = vmatprep.mubr.bf16.mxu1 %v4687_v53  ;;  %v4741_v53 = vld [vmem:[#allocation2 + $0xac] ss:$12 sps:$4 sm:$0xff]  }
  0x84   : > { %1664 = vmatmul.mubr.bf16.gmra.mxu0 %v5384_v49 }
  0x85   : > { %4524 = vmatprep.mubr.bf16.mxu0 %v4693_v7  ;;  %v4745_v7 = vld [vmem:[#allocation2 + $0x170] ss:$12 sps:$4 sm:$0xff]  }
  0x87   : > { %4505 = vmatmul.mubr.bf16.gmra.mxu1 %v4689_v59 }
  0x88   : > { %2297 = vmatprep.mubr.bf16.mxu1 %v5397_v42 }
  0x8c   : > { %4525 = vmatmul.mubr.bf16.vlgmr.msra.gmra.mxu0 %v4695_v63  ;;  %v4744_v63 = vld [vmem:[#allocation2 + $0xa8] ss:$12 sps:$4 sm:$0xff]  }
  0x8d   : > { %4528 = vmatprep.mubr.bf16.mxu0 %v4698_v9  ;;  %4325 = vmatpush3.bf16.msra.mxu0 %v4713_v17 }
  0x8e   : > { %4326 = vmatprep.subr.bf16.mxu0 %v4720_v35 }
  0x8f   : > { %2298 = vmatmul.mubr.bf16.vlgmr.msra.gmra.mxu1 %v5412_v10 }
  0x90   : > { %4557 = vmatpush3.bf16.msra.mxu1 %v5365_v32  ;;  %2305 = vmatprep.mubr.bf16.mxu1 %v4696_v6  ;;  %v4711_v32 = vld [vmem:[#allocation2 + $0xb0] ss:$12 sps:$4 sm:$0xff]  }
  0x91   : > { %4327 = vmatpush3.bf16.msra.mxu0 %v4721_v60  ;;  %4558 = vmatprep.subr.bf16.mxu1 %v4704_v34  ;;  %v4758_v60 = vld [vmem:[#allocation2 + $0xc4] ss:$12 sps:$4 sm:$0xff]  }
  0x92   : > { %4328 = vmatprep.subr.bf16.mxu0 %v4727_v1 }
  0x94   : > { %4529 = vmatmul.mubr.bf16.gmra.mxu0 %v4700_v3  ;;  %4559 = vmatpush3.bf16.msra.mxu1 %v4704_v34 }
  0x95   : > { %4532 = vmatprep.mubr.bf16.mxu0 %v4703_v5  ;;  %4329 = vmatpush3.bf16.msra.mxu0 %v4728_v16  ;;  %v5485_v5 = vld [vmem:[#allocation2 + $0x13c] ss:$12 sps:$4 sm:$0xff]  }
  0x96   : > { %4330 = vmatprep.subr.bf16.mxu0 %v4729_v8  ;;  %4560 = vmatprep.subr.bf16.mxu1 %v4717_v19 }
  0x97   : > { %2306 = vmatmul.mubr.bf16.gmra.mxu1 %v4699_v33 }
  0x98   : > { %2313 = vmatprep.mubr.bf16.mxu1 %v5434_v26  ;;  %4561 = vmatpush3.bf16.msra.mxu1 %v4717_v19 }
  0x99   : > { %4331 = vmatpush3.bf16.msra.mxu0 %v4730_v12  ;;  %4562 = vmatprep.subr.bf16.mxu1 %v4734_v28 }
  0x9a   : > { %4332 = vmatprep.subr.bf16.mxu0 %v4737_v21 }
  0x9c   : > { %4533 = vmatmul.mubr.bf16.gmra.mxu0 %v4706_v52  ;;  %4563 = vmatpush3.bf16.msra.mxu1 %v4734_v28 }
  0x9d   : > { %4536 = vmatprep.mubr.bf16.mxu0 %v4709_v22  ;;  %4333 = vmatpush3.bf16.msra.mxu0 %v4738_v25  ;;  %v4762_v22 = vld [vmem:[#allocation2 + $0xc0] ss:$12 sps:$4 sm:$0xff]  }
  0x9e   : > { %4334 = vmatprep.subr.bf16.mxu0 %v4739_v23  ;;  %4564 = vmatprep.subr.bf16.mxu1 %v4750_v36  ;;  %v4765_v23 = vld [vmem:[#allocation2 + $0xdc] ss:$12 sps:$4 sm:$0xff]  }
  0x9f   : > { %2314 = vmatmul.mubr.bf16.gmra.mxu1 %v4705_v11 }
  0xa0   : > { %2321 = vmatprep.mubr.bf16.mxu1 %v4707_v54  ;;  %4565 = vmatpush3.bf16.msra.mxu1 %v4750_v36 }
  0xa1   : > { %4335 = vmatpush3.bf16.msra.mxu0 %v4740_v29  ;;  %4566 = vmatprep.subr.bf16.mxu1 %v4751_v44 }
  0xa2   : > { %4336 = vmatprep.subr.bf16.mxu0 %v4746_v30  ;;  %v5497_v30 = vld [vmem:[#allocation2 + $0x154] ss:$12 sps:$4 sm:$0xff]  }
  0xa4   : > { %4537 = vmatmul.mubr.bf16.gmra.mxu0 %v4711_v32  ;;  %4567 = vmatpush3.bf16.msra.mxu1 %v4751_v44 }
  0xa5   : > { %4540 = vmatprep.mubr.bf16.mxu0 %v4716_v38  ;;  %4337 = vmatpush3.bf16.msra.mxu0 %v4747_v2 }
  0xa6   : > { %4338 = vmatprep.subr.bf16.mxu0 %v4748_v13  ;;  %4568 = vmatprep.subr.bf16.mxu1 %v4752_v18  ;;  %v4768_v13 = vld [vmem:[#allocation2 + $0xd8] ss:$12 sps:$4 sm:$0xff]  }
  0xa7   : > { %2322 = vmatmul.mubr.bf16.gmra.mxu1 %v4710_v41 }
  0xa8   : > { %2329 = vmatprep.mubr.bf16.mxu1 %v4714_v62  ;;  %4569 = vmatpush3.bf16.msra.mxu1 %v4752_v18 }
  0xa9   : > { %4339 = vmatpush3.bf16.msra.mxu0 %v4749_v45  ;;  %4570 = vmatprep.subr.bf16.mxu1 %v4760_v43  ;;  %v4771_v45 = vld [vmem:[#allocation2 + $0xf4] ss:$12 sps:$4 sm:$0xff]  }
  0xac   : > { %4541 = vmatmul.mubr.bf16.gmra.mxu0 %v4719_v47  ;;  %4571 = vmatpush3.bf16.msra.mxu1 %v4760_v43  ;;  %v5505_v47 = vld [vmem:[#allocation2 + $0x150] ss:$12 sps:$4 sm:$0xff]  }
  0xad   : > { %4544 = vmatprep.mubr.bf16.mxu0 %v4724_v50 }
  0xaf   : > { %2330 = vmatmul.mubr.bf16.gmra.mxu1 %v4718_v56 }
  0xb0   : > { %2337 = vmatprep.mubr.bf16.mxu1 %v4722_v51 }
  0xb4   : > { %4545 = vmatmul.mubr.bf16.gmra.mxu0 %v4726_v58 }
  0xb5   : > { %4548 = vmatprep.mubr.bf16.mxu0 %v4733_v4 }
  0xb7   : > { %2338 = vmatmul.mubr.bf16.gmra.mxu1 %v4725_v40 }
  0xb8   : > { %2345 = vmatprep.mubr.bf16.mxu1 %v4731_v39 }
  0xbc   : > { %4549 = vmatmul.mubr.bf16.gmra.mxu0 %v4736_v61 }
  0xbd   : > { %4552 = vmatprep.mubr.bf16.mxu0 %v4743_v57 }
  0xbf   : > { %2346 = vmatmul.mubr.bf16.gmra.mxu1 %v4735_v48 }
  0xc0   : > { %2353 = vmatprep.mubr.bf16.mxu1 %v4741_v53 }
  0xc4   : > { %4553 = vmatmul.mubr.bf16.gmra.mxu0 %v4745_v7 }
  0xc5   : > { %3133 = vmatprep.mubr.bf16.mxu0 %v5434_v26  ;;  %v5493_v26 = vld [vmem:[#allocation2 + $0x138] ss:$12 sps:$4 sm:$0xff]  }
  0xc7   : > { %2354 = vmatmul.mubr.bf16.gmra.mxu1 %v4744_v63 }
  0xc8   : > { %2361 = vmatprep.mubr.bf16.mxu1 %v5227_v31 }
  0xcc   : > { %3134 = vmatmul.mubr.bf16.vlgmr.msra.gmra.mxu0 %v4705_v11 }
  0xcd   : > { %3141 = vmatprep.mubr.bf16.mxu0 %v4707_v54 }
  0xcf   : > { %2362 = vmatmul.mubr.bf16.gmra.mxu1 %v5277_v20 }
  0xd0   : > { %2369 = vmatprep.mubr.bf16.mxu1 %v5236_v14 }
  0xd4   : > { %3142 = vmatmul.mubr.bf16.gmra.mxu0 %v4710_v41 }
  0xd5   : > { %3149 = vmatprep.mubr.bf16.mxu0 %v4714_v62  ;;  %v5509_v62 = vld [vmem:[#allocation2 + $0x16c] ss:$12 sps:$4 sm:$0xff]  }
  0xd7   : > { %2370 = vmatmul.mubr.bf16.gmra.mxu1 %v5287_v27 }
  0xd8   : > { %2377 = vmatprep.mubr.bf16.mxu1 %v5298_v37 }
  0xdc   : > { %3150 = vmatmul.mubr.bf16.gmra.mxu0 %v4718_v56 }
  0xdd   : > { %3157 = vmatprep.mubr.bf16.mxu0 %v4722_v51 }
  0xdf   : > { %2378 = vmatmul.mubr.bf16.gmra.mxu1 %v5343_v55 }
  0xe0   : > { %2385 = vmatprep.mubr.bf16.mxu1 %v5309_v46 }
  0xe4   : > { %3158 = vmatmul.mubr.bf16.gmra.mxu0 %v4725_v40  ;;  %v4769_v40 = vld [vmem:[#allocation2 + $0xf0] ss:$12 sps:$4 sm:$0xff]  }
  0xe5   : > { %3165 = vmatprep.mubr.bf16.mxu0 %v4731_v39 }
  0xe7   : > { %2386 = vmatmul.mubr.bf16.gmra.mxu1 %v5357_v15 }
  0xe8   : > { %2393 = vmatprep.mubr.bf16.mxu1 %v5353_v24 }
  0xec   : > { %v4068_v9 = vpop.f32.mrf.mxu0  ;;  %v4140_v31 = vpop.f32.mrf.mxu1  ;;  %3166 = vmatmul.mubr.bf16.gmra.mxu0 %v4735_v48  ;;  %v5515_v48 = vld [vmem:[#allocation2 + $0x168] ss:$12 sps:$4 sm:$0xff]  }
  0xed   : > { %3173 = vmatprep.mubr.bf16.mxu0 %v4741_v53 }
  0xee   : > { %v4069_v17 = vpop.f32.mrf.mxu0  ;;  %v4141_v20 = vpop.f32.mrf.mxu1 }
  0xef   : > { %v5475_v35 = vadd.f32 %v4069_v17, %v4068_v9  ;;  %v5478_v14 = vadd.f32 %v4141_v20, %v4140_v31  ;;  %2394 = vmatmul.mubr.bf16.gmra.mxu1 %v5384_v49  ;;  %v4772_v31 = vld [vmem:[#allocation2 + $0x38] ss:$12 sps:$4 sm:$0xff]  }
  0xf0   : > { %v4071_v27 = vpop.f32.mrf.mxu0  ;;  %v4143_v37 = vpop.f32.mrf.mxu1  ;;  %2401 = vmatprep.mubr.bf16.mxu1 %v5485_v5 }
  0xf2   : > { %v4072_v59 = vpop.f32.mrf.mxu0  ;;  %v4144_v0 = vpop.f32.mrf.mxu1 }
  0xf3   : > { %v5481_v55 = vadd.f32 %v4072_v59, %v4071_v27  ;;  %v5483_v1 = vadd.f32 %v4144_v0, %v4143_v37 }
  0xf4   : > { %v4074_v3 = vpop.f32.mrf.mxu0  ;;  %v4146_v16 = vpop.f32.mrf.mxu1  ;;  %3174 = vmatmul.mubr.bf16.gmra.mxu0 %v4744_v63 }
  0xf5   : > { %3181 = vmatprep.mubr.bf16.mxu0 %v4758_v60 }
  0xf6   : > { %v4075_v6 = vpop.f32.mrf.mxu0  ;;  %v4147_v34 = vpop.f32.mrf.mxu1 }
  0xf7   : > { %v5487_v8 = vadd.f32 %v4075_v6, %v4074_v3  ;;  %v5490_v12 = vadd.f32 %v4147_v34, %v4146_v16  ;;  %2402 = vmatmul.mubr.bf16.gmra.mxu1 %v5493_v26  ;;  %v4773_v34 = vld [vmem:[#allocation2 + $0x50] ss:$12 sps:$4 sm:$0xff]  }
  0xf8   : > { %v4077_v52 = vpop.f32.mrf.mxu0  ;;  %v4149_v19 = vpop.f32.mrf.mxu1  ;;  %2409 = vmatprep.mubr.bf16.mxu1 %v5497_v30 }
  0xfa   : > { %v4078_v21 = vpop.f32.mrf.mxu0  ;;  %v4150_v33 = vpop.f32.mrf.mxu1 }
  0xfb   : > { %v4079_v25 = vadd.f32 %v4078_v21, %v4077_v52  ;;  %v5495_v28 = vadd.f32 %v4150_v33, %v4149_v19  ;;  %v4774_v21 = vld [vmem:[#allocation2 + $0x68] ss:$12 sps:$4 sm:$0xff]  }
  0xfc   : > { %v4080_v29 = vpop.f32.mrf.mxu0  ;;  %3182 = vmatmul.mubr.bf16.gmra.mxu0 %v4762_v22  ;;  %v4152_v2 = vpop.f32.mrf.mxu1 }
  0xfd   : > { %3189 = vmatprep.mubr.bf16.mxu0 %v4765_v23 }
  0xfe   : > { %v4081_v32 = vpop.f32.mrf.mxu0  ;;  %v4153_v54 = vpop.f32.mrf.mxu1 }
  0xff   : > { %v5499_v36 = vadd.f32 %v4081_v32, %v4080_v29  ;;  %v5507_v18 = vadd.f32 %v4153_v54, %v4152_v2  ;;  %2410 = vmatmul.mubr.bf16.gmra.mxu1 %v5505_v47 }
 0x100   : > { %v4083_v38 = vpop.f32.mrf.mxu0  ;;  %v4155_v41 = vpop.f32.mrf.mxu1  ;;  %2417 = vmatprep.mubr.bf16.mxu1 %v5509_v62 }
 0x102   : > { %v4084_v11 = vpop.f32.mrf.mxu0  ;;  %v4156_v58 = vpop.f32.mrf.mxu1 }
 0x103   : > { %v5503_v44 = vadd.f32 %v4084_v11, %v4083_v38  ;;  %v5512_v56 = vadd.f32 %v4156_v58, %v4155_v41 }
 0x104   : > { %v4086_v50 = vpop.f32.mrf.mxu0  ;;  %3190 = vmatmul.mubr.bf16.gmra.mxu0 %v4768_v13  ;;  %v4158_v61 = vpop.f32.mrf.mxu1 }
 0x105   : > { %3197 = vmatprep.mubr.bf16.mxu0 %v4771_v45 }
 0x106   : > { %v4087_v43 = vpop.f32.mrf.mxu0  ;;  %v4159_v39 = vpop.f32.mrf.mxu1 }
 0x107   : > { %v4088_v4 = vadd.f32 %v4087_v43, %v4086_v50  ;;  %v5517_v53 = vadd.f32 %v4159_v39, %v4158_v61  ;;  %2418 = vmatmul.mubr.bf16.gmra.mxu1 %v5515_v48 }
 0x108   : > { %v4089_v51 = vpop.f32.mrf.mxu0  ;;  %v4161_v9 = vpop.f32.mrf.mxu1  ;;  %4572 = vmatprep.mubr.bf16.mxu1 %v4772_v31 }
 0x10a   : > { %v4090_v57 = vpop.f32.mrf.mxu0  ;;  %v4162_v20 = vpop.f32.mrf.mxu1 }
 0x10b   : > { %v4091_v7 = vadd.f32 %v4090_v57, %v4089_v51  ;;  %v5521_v37 = vadd.f32 %v4162_v20, %v4161_v9  ;;  %v4777_v57 = vld [vmem:[#allocation2 + $0xb0] ss:$12 sps:$4 sm:$0xff]  }
 0x10c   : > { %v4092_v63 = vpop.f32.mrf.mxu0  ;;  %3198 = vmatmul.mubr.bf16.gmra.mxu0 %v4769_v40 }
 0x10d   : > { %3205 = vmatprep.mubr.bf16.mxu0 %v5309_v46  ;;  %v4478_v0 = vpop.f32.mrf.mxu1 }
 0x10e   : > { %v4093_v17 = vpop.f32.mrf.mxu0  ;;  %v5524_v60 = vadd.f32 %v4478_v0, %v5487_v8 }
 0x10f   : > { %v4094_v27 = vadd.f32 %v4093_v17, %v4092_v63  ;;  %v1738_v16 = vpop.f32.mrf.mxu1  ;;  %4573 = vmatmul.mubr.bf16.vlgmr.msra.gmra.mxu1 %v4773_v34  ;;  %v4778_v63 = vld [vmem:[#allocation2 + $0xc8] ss:$12 sps:$4 sm:$0xff]  }
 0x110   : > { %v4095_v59 = vpop.f32.mrf.mxu0  ;;  %v5527_v52 = vadd.f32 %v5475_v35, %v1738_v16  ;;  %4576 = vmatprep.mubr.bf16.mxu1 %v4774_v21 }
 0x111   : > { %v4479_v19 = vpop.f32.mrf.mxu1 }
 0x112   : > { %v4096_v3 = vpop.f32.mrf.mxu0  ;;  %v5529_v46 = vadd.f32 %v4479_v19, %v4079_v25  ;;  %v4775_v25 = vld [vmem:[#allocation2 + $0x80] ss:$12 sps:$4 sm:$0xff]  }
 0x113   : > { %v4097_v6 = vadd.f32 %v4096_v3, %v4095_v59  ;;  %v1741_v33 = vpop.f32.mrf.mxu1  ;;  %v4779_v3 = vld [vmem:[#allocation2 + $0xe0] ss:$12 sps:$4 sm:$0xff]  }
 0x114   : > { %v4098_v22 = vpop.f32.mrf.mxu0  ;;  %3206 = vmatmul.mubr.bf16.gmra.mxu0 %v5357_v15  ;;  %v5534_v8 = vadd.f32 %v5481_v55, %v1741_v33 }
 0x115   : > { %3213 = vmatprep.mubr.bf16.mxu0 %v5353_v24  ;;  %v4482_v29 = vpop.f32.mrf.mxu1  ;;  %v4776_v24 = vld [vmem:[#allocation2 + $0x98] ss:$12 sps:$4 sm:$0xff]  }
 0x116   : > { %v4099_v23 = vpop.f32.mrf.mxu0  ;;  %v5536_v35 = vadd.f32 %v4482_v29, %v4088_v4 }
 0x117   : > { %v4100_v32 = vadd.f32 %v4099_v23, %v4098_v22  ;;  %v1754_v2 = vpop.f32.mrf.mxu1  ;;  %4577 = vmatmul.mubr.bf16.gmra.mxu1 %v4775_v25  ;;  %v4781_v25 = vld [vmem:[#allocation2 + $0x110] ss:$12 sps:$4 sm:$0xff]  }
 0x118   : > { %v4101_v38 = vpop.f32.mrf.mxu0  ;;  %v5539_v11 = vadd.f32 %v5499_v36, %v1754_v2  ;;  %4580 = vmatprep.mubr.bf16.mxu1 %v4776_v24  ;;  %v4786_v2 = vld [vmem:[#allocation2 + $0x184] ss:$12 sps:$4 sm:$0xff]   ;;  %v4782_v24 = vld [vmem:[#allocation2 + $0x128] ss:$12 sps:$4 sm:$0xff]  }
 0x119   : > { %v4483_v13 = vpop.f32.mrf.mxu1 }
 0x11a   : > { %v4102_v15 = vpop.f32.mrf.mxu0  ;;  %v5541_v45 = vadd.f32 %v4483_v13, %v4091_v7 }
 0x11b   : > { %v4103_v54 = vadd.f32 %v4102_v15, %v4101_v38  ;;  %v1757_v50 = vpop.f32.mrf.mxu1 }
 0x11c   : > { %v4104_v55 = vpop.f32.mrf.mxu0  ;;  %3214 = vmatmul.mubr.bf16.gmra.mxu0 %v5384_v49  ;;  %v5546_v41 = vadd.f32 %v5503_v44, %v1757_v50 }
 0x11d   : > { %3221 = vmatprep.mubr.bf16.mxu0 %v5485_v5  ;;  %v4486_v36 = vpop.f32.mrf.mxu1 }
 0x11e   : > { %v4105_v43 = vpop.f32.mrf.mxu0  ;;  %v5548_v4 = vadd.f32 %v4486_v36, %v4100_v32 }
 0x11f   : > { %v4106_v58 = vadd.f32 %v4105_v43, %v4104_v55  ;;  %v1770_v61 = vpop.f32.mrf.mxu1  ;;  %4581 = vmatmul.mubr.bf16.gmra.mxu1 %v4777_v57 }
 0x120   : > { %v4107_v51 = vpop.f32.mrf.mxu0  ;;  %v5550_v40 = vadd.f32 %v4094_v27, %v1770_v61  ;;  %4584 = vmatprep.mubr.bf16.mxu1 %v4778_v63 }
 0x121   : > { %v4487_v49 = vpop.f32.mrf.mxu1 }
 0x122   : > { %v4108_v39 = vpop.f32.mrf.mxu0  ;;  %v5552_v5 = vadd.f32 %v4487_v49, %v4103_v54  ;;  %v4783_v49 = vld [vmem:[#allocation2 + $0x140] ss:$12 sps:$4 sm:$0xff]  }
 0x123   : > { %v4109_v7 = vadd.f32 %v4108_v39, %v4107_v51  ;;  %v1773_v44 = vpop.f32.mrf.mxu1  ;;  %v4784_v51 = vld [vmem:[#allocation2 + $0x180] ss:$12 sps:$4 sm:$0xff]  }
 0x124   : > { %v4110_v9 = vpop.f32.mrf.mxu0  ;;  %3222 = vmatmul.mubr.bf16.gmra.mxu0 %v5493_v26  ;;  %v5556_v31 = vadd.f32 %v4097_v6, %v1773_v44  ;;  %v4780_v26 = vld [vmem:[#allocation2 + $0xf8] ss:$12 sps:$4 sm:$0xff]  }
 0x125   : > { %3229 = vmatprep.mubr.bf16.mxu0 %v5497_v30  ;;  %v4490_v27 = vpop.f32.mrf.mxu1 }
 0x126   : > { %v4111_v17 = vpop.f32.mrf.mxu0 }
 0x127   : > { %v4112_v20 = vadd.f32 %v4111_v17, %v4110_v9  ;;  %v1786_v16 = vpop.f32.mrf.mxu1  ;;  %4585 = vmatmul.mubr.bf16.gmra.mxu1 %v4779_v3 }
 0x128   : > { %v4113_v59 = vpop.f32.mrf.mxu0  ;;  %v5560_v19 = vadd.f32 %v4106_v58, %v1786_v16  ;;  %4588 = vmatprep.mubr.bf16.mxu1 %v4780_v26 }
 0x129   : > { %v5558_v0 = vadd.f32 %v4490_v27, %v4112_v20  ;;  %v4491_v22 = vpop.f32.mrf.mxu1 }
 0x12a   : > { %v4114_v34 = vpop.f32.mrf.mxu0 }
 0x12b   : > { %v4115_v21 = vadd.f32 %v4114_v34, %v4113_v59  ;;  %v1789_v6 = vpop.f32.mrf.mxu1 }
 0x12c   : > { %v4116_v33 = vpop.f32.mrf.mxu0  ;;  %3230 = vmatmul.mubr.bf16.gmra.mxu0 %v5505_v47  ;;  %v5566_v29 = vadd.f32 %v4109_v7, %v1789_v6 }
 0x12d   : > { %v5563_v30 = vadd.f32 %v4491_v22, %v4115_v21  ;;  %3237 = vmatprep.mubr.bf16.mxu0 %v5509_v62  ;;  %v4788_v21 = vld [vmem:[#allocation2 + $0x170] ss:$12 sps:$4 sm:$0xff]  }
 0x12e   : > { %v4117_v23 = vpop.f32.mrf.mxu0 }
 0x12f   : > { %v4118_v32 = vadd.f32 %v4117_v23, %v4116_v33  ;;  %v4494_v13 = vpop.f32.mrf.mxu1  ;;  %4589 = vmatmul.mubr.bf16.gmra.mxu1 %v4781_v25  ;;  %v4789_v33 = vld [vmem:[#allocation2 + $0x188] ss:$12 sps:$4 sm:$0xff]  }
 0x130   : > { %v4119_v38 = vpop.f32.mrf.mxu0  ;;  %4592 = vmatprep.mubr.bf16.mxu1 %v4782_v24 }
 0x131   : > { %v1802_v47 = vpop.f32.mrf.mxu1 }
 0x132   : > { %v4120_v15 = vpop.f32.mrf.mxu0  ;;  %v5569_v62 = vadd.f32 %v4118_v32, %v1802_v47  ;;  %v4790_v47 = vld [vmem:[#allocation2 + $0x1a0] ss:$12 sps:$4 sm:$0xff]  }
 0x133   : > { %v4121_v54 = vadd.f32 %v4120_v15, %v4119_v38  ;;  %v4495_v43 = vpop.f32.mrf.mxu1 }
 0x134   : > { %v4122_v55 = vpop.f32.mrf.mxu0  ;;  %3238 = vmatmul.mubr.bf16.gmra.mxu0 %v5515_v48  ;;  %v4787_v48 = vld [vmem:[#allocation2 + $0x158] ss:$12 sps:$4 sm:$0xff]  }
 0x135   : > { %3245 = vmatprep.mubr.bf16.mxu0 %v4786_v2  ;;  %v1805_v61 = vpop.f32.mrf.mxu1 }
 0x136   : > { %v4123_v50 = vpop.f32.mrf.mxu0  ;;  %v5573_v39 = vadd.f32 %v4121_v54, %v1805_v61 }
 0x137   : > { %v4124_v36 = vadd.f32 %v4123_v50, %v4122_v55  ;;  %v4498_v17 = vpop.f32.mrf.mxu1  ;;  %4593 = vmatmul.mubr.bf16.gmra.mxu1 %v4783_v49 }
 0x138   : > { %v4125_v58 = vpop.f32.mrf.mxu0  ;;  %4596 = vmatprep.mubr.bf16.mxu1 %v4787_v48 }
 0x139   : > { %v5571_v57 = vadd.f32 %v4494_v13, %v4124_v36  ;;  %v1818_v59 = vpop.f32.mrf.mxu1 }
 0x13a   : > { %v4126_v7 = vpop.f32.mrf.mxu0 }
 0x13b   : > { %v4127_v63 = vadd.f32 %v4126_v7, %v4125_v58  ;;  %v4499_v34 = vpop.f32.mrf.mxu1 }
 0x13c   : > { %v4128_v9 = vpop.f32.mrf.mxu0  ;;  %3246 = vmatmul.mubr.bf16.gmra.mxu0 %v4784_v51 }
 0x13d   : > { %v5575_v44 = vadd.f32 %v4495_v43, %v4127_v63  ;;  %3253 = vmatprep.mubr.bf16.mxu0 %v5397_v42  ;;  %v1821_v6 = vpop.f32.mrf.mxu1 }
 0x13e   : > { %v4129_v20 = vpop.f32.mrf.mxu0 }
 0x13f   : > { %v4130_v27 = vadd.f32 %v4129_v20, %v4128_v9  ;;  %v4502_v42 = vpop.f32.mrf.mxu1  ;;  %4597 = vmatmul.mubr.bf16.gmra.mxu1 %v4788_v21 }
 0x140   : > { %v4131_v3 = vpop.f32.mrf.mxu0  ;;  %v5584_v2 = vadd.f32 %v4502_v42, %v5490_v12  ;;  %4600 = vmatprep.mubr.bf16.mxu1 %v4789_v33 }
 0x141   : > { %v5578_v16 = vadd.f32 %v4130_v27, %v1818_v59  ;;  %v1834_v15 = vpop.f32.mrf.mxu1 }
 0x142   : > { %v4132_v26 = vpop.f32.mrf.mxu0  ;;  %v5587_v54 = vadd.f32 %v5478_v14, %v1834_v15 }
 0x143   : > { %v4133_v22 = vadd.f32 %v4132_v26, %v4131_v3  ;;  %v4503_v55 = vpop.f32.mrf.mxu1 }
 0x144   : > { %v4134_v23 = vpop.f32.mrf.mxu0  ;;  %3254 = vmatmul.mubr.bf16.gmra.mxu0 %v5412_v10  ;;  %v5592_v50 = vadd.f32 %v4503_v55, %v5495_v28 }
 0x145   : > { %v5581_v32 = vadd.f32 %v4133_v22, %v1821_v6  ;;  %v1837_v36 = vpop.f32.mrf.mxu1 }
 0x146   : > { %v4135_v38 = vpop.f32.mrf.mxu0  ;;  %v5595_v12 = vadd.f32 %v5483_v1, %v1837_v36 }
 0x147   : > { %v4136_v25 = vadd.f32 %v4135_v38, %v4134_v23  ;;  %v4506_v61 = vpop.f32.mrf.mxu1  ;;  %4601 = vmatmul.mubr.bf16.gmra.mxu1 %v4790_v47 }
 0x148   : > { %v4137_v13 = vpop.f32.mrf.mxu0  ;;  %v5600_v49 = vadd.f32 %v4506_v61, %v5517_v53 }
 0x149   : > { %v5589_v24 = vadd.f32 %v4498_v17, %v4136_v25  ;;  %v1850_v7 = vpop.f32.mrf.mxu1 }
 0x14a   : > { %v4138_v10 = vpop.f32.mrf.mxu0  ;;  %v5603_v48 = vadd.f32 %v5507_v18, %v1850_v7 }
 0x14b   : > { %v4139_v43 = vadd.f32 %v4138_v10, %v4137_v13  ;;  %v4507_v28 = vpop.f32.mrf.mxu1 }
 0x14c   : > { %v4526_v58 = vpop.f32.mrf.mxu0  ;;  %v5606_v17 = vadd.f32 %v4507_v28, %v5521_v37 }
 0x14d   : > { %v5597_v51 = vadd.f32 %v4499_v34, %v4139_v43  ;;  %v1853_v1 = vpop.f32.mrf.mxu1 }
 0x14e   : > { %v2460_v14 = vpop.f32.mrf.mxu0  ;;  %v5609_v27 = vadd.f32 %v5512_v56, %v1853_v1 }
 0x14f   : > { %v4204_v59 = vpop.f32.mrf.mxu1 }
 0x150   : > { %v4527_v63 = vpop.f32.mrf.mxu0 }
 0x151   : > { %v4205_v34 = vpop.f32.mrf.mxu1 }
 0x152   : > { %v2463_v9 = vpop.f32.mrf.mxu0  ;;  %v4206_v21 = vadd.f32 %v4205_v34, %v4204_v59 }
 0x153   : > { %v4207_v26 = vpop.f32.mrf.mxu1 }
 0x154   : > { %v4530_v20 = vpop.f32.mrf.mxu0  ;;  %v2300_v18 = vadd.f32 %v4206_v21, %v5527_v52 }
 0x155   : > { %v4208_v33 = vpop.f32.mrf.mxu1 }
 0x156   : > { %v2476_v3 = vpop.f32.mrf.mxu0  ;;  %v5614_v23 = vadd.f32 %v2460_v14, %v2300_v18  ;;  %v4209_v37 = vadd.f32 %v4208_v33, %v4207_v26 }
 0x157   : > { %v4210_v42 = vpop.f32.mrf.mxu1 }
 0x158   : > { %v4531_v53 = vpop.f32.mrf.mxu0  ;;  %v2303_v56 = vadd.f32 %v4209_v37, %v5534_v8 }
 0x159   : > { %v4211_v25 = vpop.f32.mrf.mxu1 }
 0x15a   : > { %v2479_v22 = vpop.f32.mrf.mxu0  ;;  %v5619_v13 = vadd.f32 %v2463_v9, %v2303_v56  ;;  %v4212_v55 = vadd.f32 %v4211_v25, %v4210_v42 }
 0x15b   : > { %v4213_v47 = vpop.f32.mrf.mxu1 }
 0x15c   : > { %v5612_v6 = vpop.f32.mrf.mxu0  ;;  %v2308_v52 = vadd.f32 %v4212_v55, %v5524_v60 }
 0x15d   : > { %v4214_v43 = vpop.f32.mrf.mxu1 }
 0x15e   : > { %v2492_v38 = vpop.f32.mrf.mxu0  ;;  %v4215_v61 = vadd.f32 %v4214_v43, %v4213_v47  ;;  %v5624_v14 = vadd.f32 %v4526_v58, %v2308_v52 }
 0x15f   : > { %v4216_v7 = vpop.f32.mrf.mxu1 }
 0x160   : > { %v5617_v15 = vpop.f32.mrf.mxu0  ;;  %v2311_v8 = vadd.f32 %v4215_v61, %v5529_v46 }
 0x161   : > { %v4217_v1 = vpop.f32.mrf.mxu1 }
 0x162   : > { %v2495_v10 = vpop.f32.mrf.mxu0  ;;  %v4218_v9 = vadd.f32 %v4217_v1, %v4216_v7  ;;  %v5631_v34 = vadd.f32 %v4527_v63, %v2311_v8 }
 0x163   : > { %v4219_v21 = vpop.f32.mrf.mxu1 }
 0x164   : > { %v5622_v36 = vpop.f32.mrf.mxu0  ;;  %v2316_v60 = vadd.f32 %v4218_v9, %v5539_v11 }
 0x165   : > { %v4220_v18 = vpop.f32.mrf.mxu1 }
 0x166   : > { %v5626_v28 = vpop.f32.mrf.mxu0  ;;  %v4221_v58 = vadd.f32 %v4220_v18, %v4219_v21  ;;  %v5638_v37 = vadd.f32 %v2476_v3, %v2316_v60 }
 0x167   : > { %v4222_v42 = vpop.f32.mrf.mxu1 }
 0x168   : > { %v5629_v59 = vpop.f32.mrf.mxu0  ;;  %v2319_v46 = vadd.f32 %v4221_v58, %v5546_v41 }
 0x169   : > { %v4223_v25 = vpop.f32.mrf.mxu1 }
 0x16a   : > { %v5633_v26 = vpop.f32.mrf.mxu0  ;;  %v4224_v63 = vadd.f32 %v4223_v25, %v4222_v42  ;;  %v5645_v47 = vadd.f32 %v2479_v22, %v2319_v46 }
 0x16b   : > { %v4225_v52 = vpop.f32.mrf.mxu1 }
 0x16c   : > { %v5636_v33 = vpop.f32.mrf.mxu0  ;;  %v2324_v11 = vadd.f32 %v4224_v63, %v5536_v35 }
 0x16d   : > { %v4226_v61 = vpop.f32.mrf.mxu1 }
 0x16e   : > { %v5640_v56 = vpop.f32.mrf.mxu0  ;;  %v4227_v3 = vadd.f32 %v4226_v61, %v4225_v52  ;;  %v5652_v8 = vadd.f32 %v4530_v20, %v2324_v11 }
 0x16f   : > { %v4228_v1 = vpop.f32.mrf.mxu1 }
 0x170   : > { %v5643_v55 = vpop.f32.mrf.mxu0  ;;  %v2327_v41 = vadd.f32 %v4227_v3, %v5541_v45 }
 0x171   : > { %v4229_v21 = vpop.f32.mrf.mxu1 }
 0x172   : > { %v5647_v43 = vpop.f32.mrf.mxu0  ;;  %v4230_v22 = vadd.f32 %v4229_v21, %v4228_v1  ;;  %v5659_v18 = vadd.f32 %v4531_v53, %v2327_v41 }
 0x173   : > { %v4231_v58 = vpop.f32.mrf.mxu1 }
 0x174   : > { %v5650_v7 = vpop.f32.mrf.mxu0  ;;  %v2332_v35 = vadd.f32 %v4230_v22, %v5550_v40 }
 0x175   : > { %v4232_v46 = vpop.f32.mrf.mxu1 }
 0x176   : > { %v5654_v9 = vpop.f32.mrf.mxu0  ;;  %v4233_v20 = vadd.f32 %v4232_v46, %v4231_v58  ;;  %v5666_v63 = vadd.f32 %v2492_v38, %v2332_v35 }
 0x177   : > { %v4234_v52 = vpop.f32.mrf.mxu1 }
 0x178   : > { %v5657_v60 = vpop.f32.mrf.mxu0  ;;  %v2335_v45 = vadd.f32 %v4233_v20, %v5556_v31 }
 0x179   : > { %v4235_v61 = vpop.f32.mrf.mxu1 }
 0x17a   : > { %v5661_v42 = vpop.f32.mrf.mxu0  ;;  %v4236_v53 = vadd.f32 %v4235_v61, %v4234_v52  ;;  %v5673_v1 = vadd.f32 %v2495_v10, %v2335_v45 }
 0x17b   : > { %v4237_v41 = vpop.f32.mrf.mxu1 }
 0x17c   : > { %v5664_v25 = vpop.f32.mrf.mxu0  ;;  %v2340_v40 = vadd.f32 %v4236_v53, %v5548_v4 }
 0x17d   : > { %5982 = vst [vmem:[#allocation3_spill] sm:$0xff] %v5664_v25  ;;  %v4238_v22 = vpop.f32.mrf.mxu1 }
 0x17e   : > { %v5668_v11 = vpop.f32.mrf.mxu0  ;;  %v4239_v38 = vadd.f32 %v4238_v22, %v4237_v41  ;;  %v5681_v35 = vadd.f32 %v5612_v6, %v2340_v40 }
 0x17f   : > { %v4240_v46 = vpop.f32.mrf.mxu1 }
 0x180   : > { %v5671_v3 = vpop.f32.mrf.mxu0  ;;  %v2343_v20 = vadd.f32 %v4239_v38, %v5552_v5 }
 0x181   : > { %5983 = vst [vmem:[#allocation4_spill] sm:$0xff] %v5671_v3  ;;  %v4241_v52 = vpop.f32.mrf.mxu1 }
 0x182   : > { %v5675_v21 = vpop.f32.mrf.mxu0  ;;  %v4242_v45 = vadd.f32 %v4241_v52, %v4240_v46  ;;  %v5689_v61 = vadd.f32 %v5617_v15, %v2343_v20 }
 0x183   : > { %v4243_v4 = vpop.f32.mrf.mxu1 }
 0x184   : > { %v5678_v58 = vpop.f32.mrf.mxu0  ;;  %5987 = vst [vmem:[#allocation8_spill] sm:$0xff] %v5689_v61  ;;  %v2348_v41 = vadd.f32 %v4242_v45, %v5560_v19 }
 0x185   : > { %5984 = vst [vmem:[#allocation5_spill] sm:$0xff] %v5678_v58  ;;  %v4244_v22 = vpop.f32.mrf.mxu1 }
 0x186   : > { %v5683_v31 = vpop.f32.mrf.mxu0  ;;  %v4245_v40 = vadd.f32 %v4244_v22, %v4243_v4  ;;  %v5697_v58 = vadd.f32 %v5626_v28, %v2348_v41 }
 0x187   : > { %5985 = vst [vmem:[#allocation6_spill] sm:$0xff] %v5683_v31  ;;  %v4246_v5 = vpop.f32.mrf.mxu1 }
 0x188   : > { %v5686_v10 = vpop.f32.mrf.mxu0  ;;  %5989 = vst [vmem:[#allocation10_spill] sm:$0xff] %v5697_v58  ;;  %v2351_v46 = vadd.f32 %v4245_v40, %v5566_v29 }
 0x189   : > { %5986 = vst [vmem:[#allocation7_spill] sm:$0xff] %v5686_v10  ;;  %v4247_v52 = vpop.f32.mrf.mxu1 }
 0x18a   : > { %v5691_v53 = vpop.f32.mrf.mxu0  ;;  %v4248_v20 = vadd.f32 %v4247_v52, %v4246_v5  ;;  %v5705_v10 = vadd.f32 %v5633_v26, %v2351_v46 }
 0x18b   : > { %5988 = vst [vmem:[#allocation9_spill] sm:$0xff] %v5691_v53  ;;  %v4249_v19 = vpop.f32.mrf.mxu1 }
 0x18c   : > { %v5694_v6 = vpop.f32.mrf.mxu0  ;;  %5990 = vst [vmem:[#allocation11_spill] sm:$0xff] %v5705_v10  ;;  %v2356_v4 = vadd.f32 %v4248_v20, %v5558_v0 }
 0x18d   : > { %v4250_v22 = vpop.f32.mrf.mxu1 }
 0x18e   : > { %v5699_v38 = vpop.f32.mrf.mxu0  ;;  %v4251_v41 = vadd.f32 %v4250_v22, %v4249_v19  ;;  %v5713_v53 = vadd.f32 %v5622_v36, %v2356_v4 }
 0x18f   : > { %v4252_v29 = vpop.f32.mrf.mxu1 }
 0x190   : > { %v5702_v15 = vpop.f32.mrf.mxu0  ;;  %5991 = vst [vmem:[#allocation12_spill] sm:$0xff] %v5713_v53  ;;  %v2359_v5 = vadd.f32 %v4251_v41, %v5563_v30 }
 0x191   : > { %v4253_v52 = vpop.f32.mrf.mxu1 }
 0x192   : > { %v5707_v45 = vpop.f32.mrf.mxu0  ;;  %v4254_v46 = vadd.f32 %v4253_v52, %v4252_v29  ;;  %v5721_v31 = vadd.f32 %v5629_v59, %v2359_v5 }
 0x193   : > { %v4255_v0 = vpop.f32.mrf.mxu1 }
 0x194   : > { %v5710_v28 = vpop.f32.mrf.mxu0  ;;  %5992 = vst [vmem:[#allocation13_spill] sm:$0xff] %v5721_v31  ;;  %v2364_v19 = vadd.f32 %v4254_v46, %v5569_v62 }
 0x195   : > { %v4256_v22 = vpop.f32.mrf.mxu1 }
 0x196   : > { %v5715_v40 = vpop.f32.mrf.mxu0  ;;  %v4257_v4 = vadd.f32 %v4256_v22, %v4255_v0  ;;  %v5729_v3 = vadd.f32 %v5640_v56, %v2364_v19 }
 0x197   : > { %v4258_v30 = vpop.f32.mrf.mxu1 }
 0x198   : > { %v5718_v26 = vpop.f32.mrf.mxu0  ;;  %v2367_v29 = vadd.f32 %v4257_v4, %v5573_v39 }
 0x199   : > { %v4259_v52 = vpop.f32.mrf.mxu1 }
 0x19a   : > { %v5723_v20 = vpop.f32.mrf.mxu0  ;;  %v4260_v5 = vadd.f32 %v4259_v52, %v4258_v30  ;;  %v5737_v25 = vadd.f32 %v5647_v43, %v2367_v29 }
 0x19b   : > { %v4261_v62 = vpop.f32.mrf.mxu1 }
 0x19c   : > { %v5726_v36 = vpop.f32.mrf.mxu0  ;;  %v2372_v0 = vadd.f32 %v4260_v5, %v5571_v57 }
 0x19d   : > { %v4262_v22 = vpop.f32.mrf.mxu1 }
 0x19e   : > { %v5731_v41 = vpop.f32.mrf.mxu0  ;;  %v4263_v19 = vadd.f32 %v4262_v22, %v4261_v62  ;;  %v5745_v31 = vadd.f32 %v5636_v33, %v2372_v0 }
 0x19f   : > { %v4264_v39 = vpop.f32.mrf.mxu1 }
 0x1a0   : > { %v5734_v59 = vpop.f32.mrf.mxu0  ;;  %v2375_v30 = vadd.f32 %v4263_v19, %v5575_v44 }
 0x1a1   : > { %v4265_v52 = vpop.f32.mrf.mxu1 }
 0x1a2   : > { %v5739_v46 = vpop.f32.mrf.mxu0  ;;  %v4266_v29 = vadd.f32 %v4265_v52, %v4264_v39  ;;  %v5753_v53 = vadd.f32 %v5643_v55, %v2375_v30 }
 0x1a3   : > { %v4267_v57 = vpop.f32.mrf.mxu1 }
 0x1a4   : > { %v5742_v56 = vpop.f32.mrf.mxu0  ;;  %v2380_v62 = vadd.f32 %v4266_v29, %v5578_v16 }
 0x1a5   : > { %v4268_v22 = vpop.f32.mrf.mxu1 }
 0x1a6   : > { %v5747_v4 = vpop.f32.mrf.mxu0  ;;  %v4269_v0 = vadd.f32 %v4268_v22, %v4267_v57  ;;  %v5761_v10 = vadd.f32 %v5654_v9, %v2380_v62 }
 0x1a7   : > { %v4270_v44 = vpop.f32.mrf.mxu1 }
 0x1a8   : > { %v5750_v43 = vpop.f32.mrf.mxu0  ;;  %5993 = vst [vmem:[#allocation14_spill] sm:$0xff] %v5761_v10  ;;  %v2383_v39 = vadd.f32 %v4269_v0, %v5581_v32 }
 0x1a9   : > { %v4271_v52 = vpop.f32.mrf.mxu1 }
 0x1aa   : > { %v5755_v5 = vpop.f32.mrf.mxu0  ;;  %v4272_v30 = vadd.f32 %v4271_v52, %v4270_v44  ;;  %v5769_v58 = vadd.f32 %v5661_v42, %v2383_v39 }
 0x1ab   : > { %v4273_v16 = vpop.f32.mrf.mxu1 }
 0x1ac   : > { %v5758_v33 = vpop.f32.mrf.mxu0  ;;  %5994 = vst [vmem:[#allocation15_spill] sm:$0xff] %v5769_v58  ;;  %v2388_v57 = vadd.f32 %v4272_v30, %v5589_v24 }
 0x1ad   : > { %v4274_v22 = vpop.f32.mrf.mxu1 }
 0x1ae   : > { %v5763_v19 = vpop.f32.mrf.mxu0  ;;  %v4275_v62 = vadd.f32 %v4274_v22, %v4273_v16  ;;  %v5777_v10 = vadd.f32 %v5650_v7, %v2388_v57 }
 0x1af   : > { %v4276_v32 = vpop.f32.mrf.mxu1 }
 0x1b0   : > { %v5766_v55 = vpop.f32.mrf.mxu0  ;;  %5995 = vst [vmem:[#allocation16_spill] sm:$0xff] %v5777_v10  ;;  %v2391_v44 = vadd.f32 %v4275_v62, %v5597_v51 }
 0x1b1   : > { %v4277_v52 = vpop.f32.mrf.mxu1 }
 0x1b2   : > { %v5771_v29 = vpop.f32.mrf.mxu0  ;;  %v4278_v39 = vadd.f32 %v4277_v52, %v4276_v32  ;;  %v5785_v58 = vadd.f32 %v5657_v60, %v2391_v44 }
 0x1b3   : > { %v4279_v24 = vpop.f32.mrf.mxu1 }
 0x1b4   : > { %v5774_v9 = vpop.f32.mrf.mxu0  ;;  %5996 = vst [vmem:[#allocation17_spill] sm:$0xff] %v5785_v58  ;;  %v2396_v16 = vadd.f32 %v4278_v39, %v5587_v54 }
 0x1b5   : > { %v4280_v22 = vpop.f32.mrf.mxu1 }
 0x1b6   : > { %v5779_v0 = vpop.f32.mrf.mxu0  ;;  %v4281_v57 = vadd.f32 %v4280_v22, %v4279_v24  ;;  %v5793_v10 = vadd.f32 %v5668_v11, %v2396_v16 }
 0x1b7   : > { %v4282_v51 = vpop.f32.mrf.mxu1 }
 0x1b8   : > { %v5782_v42 = vpop.f32.mrf.mxu0  ;;  %5997 = vst [vmem:[#allocation18_spill] sm:$0xff] %v5793_v10  ;;  %v2399_v32 = vadd.f32 %v4281_v57, %v5595_v12 }
 0x1b9   : > { %v4283_v52 = vpop.f32.mrf.mxu1 }
 0x1ba   : > { %v5787_v30 = vpop.f32.mrf.mxu0  ;;  %v4284_v44 = vadd.f32 %v4283_v52, %v4282_v51  ;;  %v5801_v58 = vadd.f32 %v5675_v21, %v2399_v32 }
 0x1bb   : > { %v4285_v54 = vpop.f32.mrf.mxu1 }
 0x1bc   : > { %v5790_v7 = vpop.f32.mrf.mxu0  ;;  %5998 = vst [vmem:[#allocation19_spill] sm:$0xff] %v5801_v58  ;;  %v5806_v24 = vadd.f32 %v4284_v44, %v5584_v2 }
 0x1bd   : > { %v4286_v11 = vpop.f32.mrf.mxu1 }
 0x1be   : > { %v5795_v62 = vpop.f32.mrf.mxu0  ;;  %5999 = vst [vmem:[#allocation20_spill] sm:$0xff] %v5806_v24  ;;  %v4287_v22 = vadd.f32 %v4286_v11, %v4285_v54 }
 0x1bf   : > { %v4288_v10 = vpop.f32.mrf.mxu1 }
 0x1c0   : > { %v5798_v60 = vpop.f32.mrf.mxu0  ;;  %v5813_v12 = vadd.f32 %v4287_v22, %v5592_v50 }
 0x1c1   : > { %v4289_v57 = vpop.f32.mrf.mxu1 }
 0x1c2   : > { %v5803_v39 = vpop.f32.mrf.mxu0  ;;  %6002 = vst [vmem:[#allocation23_spill] sm:$0xff] %v5813_v12  ;;  %v4290_v21 = vadd.f32 %v4289_v57, %v4288_v10 }
 0x1c3   : > { %v4291_v32 = vpop.f32.mrf.mxu1 }
 0x1c4   : > { %v5808_v16 = vpop.f32.mrf.mxu0  ;;  %v5820_v2 = vadd.f32 %v4290_v21, %v5603_v48 }
 0x1c5   : > { %6000 = vst [vmem:[#allocation21_spill] sm:$0xff] %v5808_v16  ;;  %v4292_v44 = vpop.f32.mrf.mxu1 }
 0x1c6   : > { %v5810_v61 = vpop.f32.mrf.mxu0  ;;  %6005 = vst [vmem:[#allocation26_spill] sm:$0xff] %v5820_v2  ;;  %v4293_v54 = vadd.f32 %v4292_v44, %v4291_v32 }
 0x1c7   : > { %6001 = vst [vmem:[#allocation22_spill] sm:$0xff] %v5810_v61  ;;  %v4294_v11 = vpop.f32.mrf.mxu1 }
 0x1c8   : > { %v5815_v51 = vpop.f32.mrf.mxu0  ;;  %v5827_v50 = vadd.f32 %v4293_v54, %v5609_v27  ;;  %v4342_v27 = vadd.f32 %v5699_v38, %v5694_v6  ;;  %v4348_v6 = vadd.f32 %v5715_v40, %v5710_v28 }
 0x1c9   : > { %6003 = vst [vmem:[#allocation24_spill] sm:$0xff] %v5815_v51  ;;  %v4295_v22 = vpop.f32.mrf.mxu1 }
 0x1ca   : > { %v5817_v52 = vpop.f32.mrf.mxu0  ;;  %6006 = vst [vmem:[#allocation27_spill] sm:$0xff] %v5827_v50  ;;  %v4296_v10 = vadd.f32 %v4295_v22, %v4294_v11 }
 0x1cb   : > { %6004 = vst [vmem:[#allocation25_spill] sm:$0xff] %v5817_v52  ;;  %v4297_v57 = vpop.f32.mrf.mxu1 }
 0x1cc   : > { %v5822_v24 = vpop.f32.mrf.mxu0  ;;  %v5834_v48 = vadd.f32 %v4296_v10, %v5600_v49  ;;  %v4345_v10 = vadd.f32 %v5707_v45, %v5702_v15 }
 0x1cd   : > { %v4298_v21 = vpop.f32.mrf.mxu1 }
 0x1ce   : > { %v5824_v58 = vpop.f32.mrf.mxu0  ;;  %6007 = vst [vmem:[#allocation28_spill] sm:$0xff] %v5834_v48  ;;  %v4299_v32 = vadd.f32 %v4298_v21, %v4297_v57 }
 0x1cf   : > { %v4574_v44 = vpop.f32.mrf.mxu1 }
 0x1d0   : > { %v5829_v12 = vpop.f32.mrf.mxu0  ;;  %v5843_v54 = vadd.f32 %v4299_v32, %v5606_v17 }
 0x1d1   : > { %v3296_v11 = vpop.f32.mrf.mxu1 }
 0x1d2   : > { %v5831_v51 = vpop.f32.mrf.mxu0  ;;  %6008 = vst [vmem:[#allocation29_spill] sm:$0xff] %v5843_v54  ;;  %v3297_v50 = vadd.f32 %v4342_v27, %v3296_v11  ;;  %v3305_v27 = vadd.f32 %v4574_v44, %v4348_v6  ;;  %v4354_v44 = vadd.f32 %v5731_v41, %v5726_v36  ;;  %v4360_v41 = vadd.f32 %v5747_v4, %v5742_v56 }
 0x1d3   : > { %v4575_v61 = vpop.f32.mrf.mxu1  ;;  %v4366_v4 = vadd.f32 %v5763_v19, %v5758_v33 }
 0x1d4   : > { %v5836_v2 = vpop.f32.mrf.mxu0  ;;  %v3423_v57 = vadd.f32 %v3297_v50, %v5614_v23  ;;  %v4351_v23 = vadd.f32 %v5723_v20, %v5718_v26  ;;  %v3425_v28 = vadd.f32 %v3305_v27, %v5624_v14 }
 0x1d5   : > { %v3299_v21 = vpop.f32.mrf.mxu1 }
 0x1d6   : > { %v5838_v52 = vpop.f32.mrf.mxu0  ;;  %v3300_v17 = vadd.f32 %v4345_v10, %v3299_v21  ;;  %3455 = vxpose.xlu0.b32.start [1/16] (narrow) %v3423_v57, 32  ;;  %v3308_v50 = vadd.f32 %v4575_v61, %v4351_v23  ;;  %v4357_v61 = vadd.f32 %v5739_v46, %v5734_v59  ;;  %v4363_v59 = vadd.f32 %v5755_v5, %v5750_v43 }
 0x1d7   : > { %v4578_v38 = vpop.f32.mrf.mxu1  ;;  %v4396_v19 = vadd.f32 %v5838_v52, %v5836_v2 }
 0x1d8   : > { %v5845_v22 = vpop.f32.mrf.mxu0  ;;  %v3424_v11 = vadd.f32 %v3300_v17, %v5619_v13  ;;  %v3426_v26 = vadd.f32 %v3308_v50, %v5631_v34  ;;  %v3321_v34 = vadd.f32 %v4578_v38, %v4360_v41  ;;  %v4390_v38 = vadd.f32 %v5824_v58, %v5822_v24 }
 0x1d9   : > { %v3312_v54 = vpop.f32.mrf.mxu1  ;;  %v4375_v41 = vadd.f32 %v5787_v30, %v5782_v42 }
 0x1da   : > { %v5847_v49 = vpop.f32.mrf.mxu0  ;;  %3456 = vxpose.xlu0.b32.cont [2/16] (narrow) %v3424_v11, 32  ;;  %v3313_v21 = vadd.f32 %v4354_v44, %v3312_v54 }
 0x1db   : > { %v4579_v15 = vpop.f32.mrf.mxu1 }
 0x1dc   : > { %v5852_v48 = vpop.f32.mrf.mxu0  ;;  %v3427_v27 = vadd.f32 %v3313_v21, %v5638_v37  ;;  %v3324_v46 = vadd.f32 %v4579_v15, %v4363_v59 }
 0x1dd   : > { %v3315_v40 = vpop.f32.mrf.mxu1 }
 0x1de   : > { %v5856_v32 = vpop.f32.mrf.mxu0  ;;  %3457 = vxpose.xlu0.b32.cont [3/16] (narrow) %v3425_v28, 32  ;;  %v3316_v17 = vadd.f32 %v4357_v61, %v3315_v40  ;;  %v3429_v40 = vadd.f32 %v3321_v34, %v5652_v8  ;;  %v3430_v43 = vadd.f32 %v3324_v46, %v5659_v18  ;;  %v4369_v8 = vadd.f32 %v5771_v29, %v5766_v55  ;;  %v6010_v46 = vld [vmem:[#allocation21_spill] sm:$0xff] }
 0x1df   : > { %v4582_v13 = vpop.f32.mrf.mxu1  ;;  %v4393_v61 = vadd.f32 %v5831_v51, %v5829_v12  ;;  %v4372_v55 = vadd.f32 %v5779_v0, %v5774_v9  ;;  %v4399_v12 = vadd.f32 %v5847_v49, %v5845_v22  ;;  %v4402_v9 = vadd.f32 %v5856_v32, %v5852_v48  ;;  %v6009_v32 = vld [vmem:[#allocation8_spill] sm:$0xff] }
 0x1e0   : > { %v5859_v16 = vpop.f32.mrf.mxu0  ;;  %v3428_v23 = vadd.f32 %v3316_v17, %v5645_v47 }
 0x1e1   : > { %v3328_v20 = vpop.f32.mrf.mxu1 }
 0x1e2   : > { %v5863_v45 = vpop.f32.mrf.mxu0  ;;  %3458 = vxpose.xlu0.b32.cont [4/16] (narrow) %v3426_v26, 32  ;;  %v3329_v21 = vadd.f32 %v4366_v4, %v3328_v20 }
 0x1e3   : > { %v4583_v14 = vpop.f32.mrf.mxu1  ;;  %v4405_v42 = vadd.f32 %v5863_v45, %v5859_v16 }
 0x1e4   : > { %v5866_v10 = vpop.f32.mrf.mxu0  ;;  %v3431_v18 = vadd.f32 %v3329_v21, %v5666_v63  ;;  %v3340_v0 = vadd.f32 %v4583_v14, %v4375_v41  ;;  %v6022_v41 = vld [vmem:[#allocation18_spill] sm:$0xff] }
 0x1e5   : > { %v3331_v11 = vpop.f32.mrf.mxu1 }
 0x1e6   : > { %v5870_v57 = vpop.f32.mrf.mxu0  ;;  %3459 = vxpose.xlu0.b32.cont [5/16] (narrow) %v3427_v27, 32  ;;  %v3332_v17 = vadd.f32 %v4369_v8, %v3331_v11  ;;  %v3337_v27 = vadd.f32 %v4582_v13, %v4372_v55  ;;  %v3434_v14 = vadd.f32 %v3340_v0, %v6009_v32 }
 0x1e7   : > { %v5882_v54 = vpop.f32.mrf.mxu1 }
 0x1e8   : > { %v5873_v6 = vpop.f32.mrf.mxu0  ;;  %v3433_v49 = vadd.f32 %v3337_v27, %v5681_v35  ;;  %v4381_v35 = vadd.f32 %v5803_v39, %v5798_v60  ;;  %v6020_v27 = vld [vmem:[#allocation17_spill] sm:$0xff] }
 0x1e9   : > { %v3344_v50 = vpop.f32.mrf.mxu1 }
 0x1ea   : > { %v5878_v36 = vpop.f32.mrf.mxu0  ;;  %3460 = vxpose.xlu0.b32.cont [6/16] (narrow) %v3428_v23, 32 }
 0x1eb   : > { %v5889_v37 = vpop.f32.mrf.mxu1  ;;  %v4411_v60 = vadd.f32 %v5878_v36, %v5873_v6  ;;  %v6018_v36 = vld [vmem:[#allocation16_spill] sm:$0xff] }
 0x1ec   : > { %v5885_v28 = vpop.f32.mrf.mxu0 }
 0x1ed   : > { %v3347_v44 = vpop.f32.mrf.mxu1 }
 0x1ee   : > { %v5892_v56 = vpop.f32.mrf.mxu0  ;;  %3461 = vxpose.xlu0.b32.cont [7/16] (narrow) %v3429_v40, 32  ;;  %v4408_v40 = vadd.f32 %v5870_v57, %v5866_v10  ;;  %v3348_v16 = vadd.f32 %v4381_v35, %v3347_v44  ;;  %v6027_v35 = vld [vmem:[#allocation4_spill] sm:$0xff] }
 0x1ef   : > { %v4590_v47 = vpop.f32.mrf.mxu1 }
 0x1f0   : > { %v5899_v26 = vpop.f32.mrf.mxu0  ;;  %v3369_v52 = vadd.f32 %v4590_v47, %v4396_v19 }
 0x1f1   : > { %v3360_v5 = vpop.f32.mrf.mxu1 }
 0x1f2   : > { %v3361_v15 = vadd.f32 %v4390_v38, %v3360_v5  ;;  %3462 = vxpose.xlu0.b32.cont [8/16] (narrow) %v3430_v43, 32  ;;  %v5909_v24 = vpop.f32.mrf.mxu0  ;;  %v3441_v22 = vadd.f32 %v3369_v52, %v5745_v31  ;;  %v6014_v5 = vld [vmem:[#allocation15_spill] sm:$0xff] }
 0x1f3   : > { %v4591_v33 = vpop.f32.mrf.mxu1 }
 0x1f4   : > { %v3439_v58 = vadd.f32 %v3361_v15, %v5729_v3  ;;  %v3432_v3 = vadd.f32 %v3332_v17, %v5673_v1  ;;  %v4418_v63 = vpop.f32.mrf.mxu0  ;;  %v3372_v34 = vadd.f32 %v4591_v33, %v4399_v12  ;;  %v4378_v1 = vadd.f32 %v5795_v62, %v5790_v7  ;;  %v6011_v7 = vld [vmem:[#allocation22_spill] sm:$0xff]  ;;  %v6015_v15 = vld [vmem:[#allocation11_spill] sm:$0xff]  ;;  %v6017_v33 = vld [vmem:[#allocation25_spill] sm:$0xff] }
 0x1f5   : > { %v3363_v20 = vpop.f32.mrf.mxu1  ;;  %v4384_v62 = vadd.f32 %v6011_v7, %v6010_v46  ;;  %v3436_v10 = vadd.f32 %v3348_v16, %v6015_v15  ;;  %v4414_v17 = vadd.f32 %v5892_v56, %v5885_v28  ;;  %v4417_v12 = vadd.f32 %v5909_v24, %v5899_v26 }
 0x1f6   : > { %v3364_v29 = vadd.f32 %v4393_v61, %v3363_v20  ;;  %3487 = vxpose.xlu1.b32.start [1/16] (narrow) %v3439_v58, 32  ;;  %3463 = vxpose.xlu0.b32.cont [9/16] (narrow) %v3431_v18, 32  ;;  %v4419_v13 = vpop.f32.mrf.mxu0  ;;  %v3345_v30 = vadd.f32 %v4378_v1, %v3344_v50  ;;  %v3442_v48 = vadd.f32 %v3372_v34, %v5753_v53  ;;  %v6012_v50 = vld [vmem:[#allocation14_spill] sm:$0xff]  ;;  %v6016_v61 = vld [vmem:[#allocation24_spill] sm:$0xff] }
 0x1f7   : > { %v4594_v51 = vpop.f32.mrf.mxu1  ;;  %v6013_v53 = vld [vmem:[#allocation10_spill] sm:$0xff]  ;;  %v3353_v39 = vadd.f32 %v5882_v54, %v4384_v62  ;;  %v4387_v19 = vadd.f32 %v6017_v33, %v6016_v61  ;;  %v6019_v18 = vld [vmem:[#allocation12_spill] sm:$0xff] }
 0x1f8   : > { %v3440_v2 = vadd.f32 %v3364_v29, %v5737_v25  ;;  %v4421_v59 = vpop.f32.mrf.mxu0  ;;  %v3435_v47 = vadd.f32 %v3345_v30, %v6013_v53  ;;  %v3385_v43 = vadd.f32 %v4594_v51, %v4408_v40  ;;  %v6025_v30 = vld [vmem:[#allocation3_spill] sm:$0xff] }
 0x1f9   : > { %v3376_v11 = vpop.f32.mrf.mxu1  ;;  %v3356_v58 = vadd.f32 %v5889_v37, %v4387_v19  ;;  %v3437_v20 = vadd.f32 %v3353_v39, %v6019_v18  ;;  %v4420_v37 = vadd.f32 %v4419_v13, %v4418_v63  ;;  %v6031_v39 = vld [vmem:[#allocation9_spill] sm:$0xff] }
 0x1fa   : > { %3488 = vxpose.xlu1.b32.cont [2/16] (narrow) %v3440_v2, 32  ;;  %3464 = vxpose.xlu0.b32.cont [10/16] (narrow) %v3432_v3, 32  ;;  %v3377_v23 = vadd.f32 %v4402_v9, %v3376_v11  ;;  %v4422_v38 = vpop.f32.mrf.mxu0  ;;  %v3445_v54 = vadd.f32 %v3385_v43, %v6018_v36  ;;  %v6021_v2 = vld [vmem:[#allocation13_spill] sm:$0xff] }
 0x1fb   : > { %v4595_v25 = vpop.f32.mrf.mxu1  ;;  %v3438_v3 = vadd.f32 %v3356_v58, %v6021_v2  ;;  %v6034_v19 = vld [vmem:[#allocation29_spill] sm:$0xff] }
 0x1fc   : > { %v3443_v4 = vadd.f32 %v3377_v23, %v6012_v50  ;;  %v4424_v57 = vpop.f32.mrf.mxu0  ;;  %v3388_v6 = vadd.f32 %v4595_v25, %v4411_v60  ;;  %v6023_v25 = vld [vmem:[#allocation19_spill] sm:$0xff]  ;;  %v6029_v50 = vld [vmem:[#allocation6_spill] sm:$0xff] }
 0x1fd   : > { %v3379_v31 = vpop.f32.mrf.mxu1  ;;  %v6030_v60 = vld [vmem:[#allocation27_spill] sm:$0xff] }
 0x1fe   : > { %3489 = vxpose.xlu1.b32.cont [3/16] (narrow) %v3441_v22, 32  ;;  %3465 = vxpose.xlu0.b32.cont [11/16] (narrow) %v3433_v49, 32  ;;  %v3380_v45 = vadd.f32 %v4405_v42, %v3379_v31  ;;  %v4425_v55 = vpop.f32.mrf.mxu0  ;;  %v3446_v52 = vadd.f32 %v3388_v6, %v6020_v27  ;;  %v4423_v22 = vadd.f32 %v4422_v38, %v4421_v59  ;;  %v6024_v42 = vld [vmem:[#allocation20_spill] sm:$0xff]  ;;  %v6026_v31 = vld [vmem:[#allocation23_spill] sm:$0xff] }
 0x1ff   : > { %v4598_v21 = vpop.f32.mrf.mxu1  ;;  %v2565_v23 = vadd.f32 %v6025_v30, %v6024_v42  ;;  %v2568_v46 = vadd.f32 %v6027_v35, %v6026_v31  ;;  %v2576_v43 = vadd.f32 %v6031_v39, %v6030_v60 }
 0x200   : > { %v3444_v8 = vadd.f32 %v3380_v45, %v6014_v5  ;;  %v4427_v28 = vpop.f32.mrf.mxu0  ;;  %v3401_v49 = vadd.f32 %v4598_v21, %v4420_v37  ;;  %v6028_v45 = vld [vmem:[#allocation26_spill] sm:$0xff] }
 0x201   : > { %v3392_v44 = vpop.f32.mrf.mxu1 }
 0x202   : > { %3490 = vxpose.xlu1.b32.cont [4/16] (narrow) %v3442_v48, 32  ;;  %3466 = vxpose.xlu0.b32.cont [12/16] (narrow) %v3434_v14, 32  ;;  %v3393_v51 = vadd.f32 %v4414_v17, %v3392_v44  ;;  %v4428_v0 = vpop.f32.mrf.mxu0  ;;  %v4426_v48 = vadd.f32 %v4425_v55, %v4424_v57  ;;  %v3449_v14 = vadd.f32 %v3401_v49, %v2565_v23  ;;  %v6033_v57 = vld [vmem:[#allocation5_spill] sm:$0xff]  ;;  %v6035_v17 = vld [vmem:[#allocation7_spill] sm:$0xff] }
 0x203   : > { %v4599_v29 = vpop.f32.mrf.mxu1  ;;  %v4429_v7 = vadd.f32 %v4428_v0, %v4427_v28  ;;  %v2584_v58 = vadd.f32 %v6035_v17, %v6034_v19 }
 0x204   : > { %v3447_v9 = vadd.f32 %v3393_v51, %v6022_v41  ;;  %v4430_v24 = vpop.f32.mrf.mxu0  ;;  %v3404_v32 = vadd.f32 %v4599_v29, %v4423_v22 }
 0x205   : > { %v3395_v56 = vpop.f32.mrf.mxu1 }
 0x206   : > { %3491 = vxpose.xlu1.b32.cont [5/16] (narrow) %v3443_v4, 32  ;;  %3467 = vxpose.xlu0.b32.cont [13/16] (narrow) %v3435_v47, 32  ;;  %v3396_v11 = vadd.f32 %v4417_v12, %v3395_v56  ;;  %v4431_v63 = vpop.f32.mrf.mxu0  ;;  %v3450_v62 = vadd.f32 %v3404_v32, %v2568_v46  ;;  %v2573_v4 = vadd.f32 %v6029_v50, %v6028_v45 }
 0x207   : > { %v4602_v34 = vpop.f32.mrf.mxu1  ;;  %v4432_v53 = vadd.f32 %v4431_v63, %v4430_v24 }
 0x208   : > { %v3448_v26 = vadd.f32 %v3396_v11, %v6023_v25  ;;  %v4433_v40 = vpop.f32.mrf.mxu0 }
 0x209   : > { %v3408_v1 = vpop.f32.mrf.mxu1  ;;  %v3417_v5 = vadd.f32 %v4602_v34, %v4432_v53 }
 0x20a   : > { %3492 = vxpose.xlu1.b32.cont [6/16] (narrow) %v3444_v8, 32  ;;  %3468 = vxpose.xlu0.b32.cont [14/16] (narrow) %v3436_v10, 32  ;;  %v3409_v59 = vadd.f32 %v4426_v48, %v3408_v1  ;;  %v4434_v21 = vpop.f32.mrf.mxu0  ;;  %v6032_v10 = vld [vmem:[#allocation28_spill] sm:$0xff] }
 0x20b   : > { %v4603_v13 = vpop.f32.mrf.mxu1  ;;  %v4435_v8 = vadd.f32 %v4434_v21, %v4433_v40  ;;  %v2581_v44 = vadd.f32 %v6033_v57, %v6032_v10 }
 0x20c   : > { %v3451_v38 = vadd.f32 %v3409_v59, %v2573_v4 }
 0x20d   : > { %v3411_v16 = vpop.f32.mrf.mxu1  ;;  %v3420_v61 = vadd.f32 %v4603_v13, %v4435_v8  ;;  %v3453_v33 = vadd.f32 %v3417_v5, %v2581_v44 }
 0x20e   : > { %3493 = vxpose.xlu1.b32.cont [7/16] (narrow) %v3445_v54, 32  ;;  %3469 = vxpose.xlu0.b32.cont [15/16] (narrow) %v3437_v20, 32  ;;  %v3412_v47 = vadd.f32 %v4429_v7, %v3411_v16 }
 0x20f   : > { %v3454_v6 = vadd.f32 %v3420_v61, %v2584_v58 }
 0x210   : > { %v3452_v15 = vadd.f32 %v3412_v47, %v2576_v43 }
 0x212   : > { %3494 = vxpose.xlu1.b32.cont [8/16] (narrow) %v3446_v52, 32  ;;  %3470 = vxpose.xlu0.b32.end [16/16] (narrow) %v3438_v3, 32 }
 0x216   : > { %3495 = vxpose.xlu1.b32.cont [9/16] (narrow) %v3447_v9, 32 }
 0x21a   : > { %3496 = vxpose.xlu1.b32.cont [10/16] (narrow) %v3448_v26, 32 }
 0x21e   : > { %3497 = vxpose.xlu1.b32.cont [11/16] (narrow) %v3449_v14, 32 }
 0x222   : > { %3498 = vxpose.xlu1.b32.cont [12/16] (narrow) %v3450_v62, 32 }
 0x226   : > { %3499 = vxpose.xlu1.b32.cont [13/16] (narrow) %v3451_v38, 32 }
 0x22a   : > { %3500 = vxpose.xlu1.b32.cont [14/16] (narrow) %v3452_v15, 32 }
 0x22e   : > { %3501 = vxpose.xlu1.b32.cont [15/16] (narrow) %v3453_v33, 32 }
 0x232   : > { %3502 = vxpose.xlu1.b32.end [16/16] (narrow) %v3454_v6, 32 }
 0x252   : > { %v3471_v36 = vpop.trf.xlu0 }
 0x253   : > { %3519 = vst [vmem:[%s170_s25] sm:$0xff] %v3471_v36 }
 0x256   : > { %v3472_v54 = vpop.trf.xlu0 }
 0x257   : > { %3521 = vst [vmem:[%s170_s25 + $0x10] sm:$0xff] %v3472_v54 }
 0x25a   : > { %v3473_v18 = vpop.trf.xlu0 }
 0x25b   : > { %3523 = vst [vmem:[%s170_s25 + $0x20] sm:$0xff] %v3473_v18 }
 0x25e   : > { %v3474_v20 = vpop.trf.xlu0 }
 0x25f   : > { %3525 = vst [vmem:[%s170_s25 + $0x30] sm:$0xff] %v3474_v20 }
 0x272   : > { %v3503_v55 = vpop.trf.xlu1 }
 0x273   : > { %3520 = vst [vmem:[%s170_s25 + $0x8] sm:$0xff] %v3503_v55 }
 0x276   : > { %v3504_v29 = vpop.trf.xlu1 }
 0x277   : > { %3522 = vst [vmem:[%s170_s25 + $0x18] sm:$0xff] %v3504_v29 }
 0x27a   : > { %v3505_v12 = vpop.trf.xlu1 }
 0x27b   : > { %3524 = vst [vmem:[%s170_s25 + $0x28] sm:$0xff] %v3505_v12 }
 0x27e   : > { %v3506_v51 = vpop.trf.xlu1 }
 0x27f   : > { %3526 = vst [vmem:[%s170_s25 + $0x38] sm:$0xff] %v3506_v51 }
 0x280 PF: > { %s13_s12 = sadd.s32 1, %s4800_s12  }
 0x281   : > { %p10_p4 = scmp.ge.s32.totalorder %s13_s12, 4  }
 0x283   :  { %12 = sbr.rel (!%p10_p4) target bundleno = 1 (0x1), region = 67 }

</bundles_post_ra>
